<compile_context>
chip_gen: v5e
topology: v5e:2x2
jax: 0.10.0
libtpu: 0.0.40
codegen_flags: <defaults>
</compile_context>

<pallas_src>
import functools

import jax
import jax.numpy as jnp
from jax.experimental import pallas as pl
from jax.experimental.pallas import tpu as pltpu

KSIZE = 7
PAD = KSIZE // 2          # 3
IN_CH = 2                 # pooled channels: [max, mean] (PyTorch cat order)


def _make_kernel(total_c: int):
    """Kernel factory; closes over the total channel count (for the mean)."""
    inv_c = 1.0 / float(total_c)

    def kernel(params_ref, x_ref, o_ref, max_acc, sum_acc, pad_ref):
        # params_ref: SMEM (2*7*7 + 1,) f32  -- conv weight (OIHW, O=1) flat + bias
        # x_ref:      VMEM (1, TC, H, W)     -- channel chunk of one image
        # o_ref:      VMEM (1, 1, H, W)      -- spatial attention map
        # max_acc:    VMEM (H, W) f32        -- running channel max
        # sum_acc:    VMEM (H, W) f32        -- running channel sum
        # pad_ref:    VMEM (2, H+6, W+6) f32 -- zero-padded pooled maps
        c_step = pl.program_id(1)
        n_c = pl.num_programs(1)
        H = o_ref.shape[2]
        W = o_ref.shape[3]

        @pl.when(c_step == 0)
        def _init():
            max_acc[...] = jnp.full_like(max_acc, -jnp.inf)
            sum_acc[...] = jnp.zeros_like(sum_acc)
            # Zero the padded scratch once per image: the interior is rewritten
            # on the last channel step, the 3-pixel border stays zero because
            # scratch persists across grid iterations on each core.
            pad_ref[...] = jnp.zeros_like(pad_ref)

        # Running channel-wise max / sum for this chunk (max in input dtype,
        # sum accumulated in f32; only (H,W) results are cast).
        chunk = x_ref[0]                                           # (TC, H, W)
        max_acc[...] = jnp.maximum(
            max_acc[...], jnp.max(chunk, axis=0).astype(jnp.float32))
        sum_acc[...] = sum_acc[...] + jnp.sum(chunk, axis=0, dtype=jnp.float32)

        # Epilogue: pad, 7x7 cross-correlation, sigmoid, store.
        @pl.when(c_step == n_c - 1)
        def _finalize():
            pad_ref[0, pl.ds(PAD, H), pl.ds(PAD, W)] = max_acc[...]
            pad_ref[1, pl.ds(PAD, H), pl.ds(PAD, W)] = (
                sum_acc[...] * jnp.float32(inv_c))

            bias = params_ref[IN_CH * KSIZE * KSIZE]
            acc = None
            for ch in range(IN_CH):
                for kj in range(KSIZE):
                    # One lane-shifted plane per (channel, kj), reused for all
                    # 7 ki values: 14 lane shifts total instead of 98.
                    plane = pad_ref[ch, :, pl.ds(kj, W)]           # (H+6, W) f32
                    for ki in range(KSIZE):
                        w = params_ref[(ch * KSIZE + ki) * KSIZE + kj]
                        tap = plane[ki:ki + H, :]                  # static slice
                        if acc is None:
                            acc = w * tap + bias                   # fold bias in
                        else:
                            acc = acc + w * tap

            o_ref[0, 0] = jax.nn.sigmoid(acc).astype(o_ref.dtype)

    return kernel


def _vmem_capacity_bytes() -> int:
    """Physical VMEM of the local TPU; conservative fallback = v7x (64 MiB)."""
    try:
        return int(pltpu.get_tpu_info().vmem_capacity_bytes)
    except Exception:
        return 64 * 1024 * 1024


def _pick_channel_tile(C, H, W, in_itemsize, out_itemsize, budget):
    """Largest divisor of C whose double-buffered input block fits the budget."""
    fixed = (2 * H * W * out_itemsize                              # 2x out block
             + 2 * H * W * 4                                       # max/sum acc
             + IN_CH * (H + 2 * PAD) * (W + 2 * PAD) * 4)          # pad scratch
    avail = max(budget - fixed, 1 << 20)
    # Per channel: double-buffered input block, plus an f32 temporary for the
    # sum reduction when the input is low precision.
    per_chan = H * W * (2 * in_itemsize + (0 if in_itemsize >= 4 else 4))
    tc_cap = int(max(1, min(C, avail // per_chan)))
    for tc in range(tc_cap, 0, -1):
        if C % tc == 0:
            return tc
    return 1


@jax.jit
def spatial_attention(x, weight, bias):
    """SpatialAttention forward.

    x:      (B, C, H, W)
    weight: (1, 2, 7, 7)   Conv2d(2, 1, 7, padding=3) weight
    bias:   (1,)           Conv2d bias
    returns (B, 1, H, W) = sigmoid(conv(cat([max_c(x), mean_c(x)], 1)))
    """
    B, C, H, W = x.shape
    assert weight.shape == (1, IN_CH, KSIZE, KSIZE)

    in_itemsize = jnp.dtype(x.dtype).itemsize
    out_itemsize = in_itemsize

    capacity = _vmem_capacity_bytes()
    budget = (capacity * 3) // 4                 # leave 25% headroom
    tc = _pick_channel_tile(C, H, W, in_itemsize, out_itemsize, budget)
    num_c_blocks = C // tc

    # Tiny parameter vector -> SMEM (weights read as scalars inside the kernel).
    params = jnp.concatenate(
        [weight.astype(jnp.float32).reshape(-1),
         bias.astype(jnp.float32).reshape(-1)])                    # (99,)

    cost = pl.CostEstimate(
        flops=2 * B * H * W * (C + IN_CH * KSIZE * KSIZE),
        transcendentals=B * H * W,
        bytes_accessed=(B * C * H * W + B * H * W) * in_itemsize)

    kernel = _make_kernel(C)

    return pl.pallas_call(
        kernel,
        out_shape=jax.ShapeDtypeStruct((B, 1, H, W), x.dtype),
        grid_spec=pltpu.PrefetchScalarGridSpec(
            num_scalar_prefetch=0,
            grid=(B, num_c_blocks),                       # channel axis LAST
            in_specs=[
                pl.BlockSpec(memory_space=pltpu.MemorySpace.SMEM),   # params
                pl.BlockSpec((1, tc, H, W), lambda b, c: (b, c, 0, 0)),
            ],
            out_specs=pl.BlockSpec((1, 1, H, W), lambda b, c: (b, 0, 0, 0)),
            scratch_shapes=[
                pltpu.VMEM((H, W), jnp.float32),                     # max acc
                pltpu.VMEM((H, W), jnp.float32),                     # sum acc
                pltpu.VMEM((IN_CH, H + 2 * PAD, W + 2 * PAD), jnp.float32),
            ],
        ),
        compiler_params=pltpu.CompilerParams(
            dimension_semantics=("parallel", "arbitrary"),
            vmem_limit_bytes=int(budget)),
        cost_estimate=cost,
    )(params, x)


if __name__ == "__main__":
    key = jax.random.PRNGKey(0)
    kx, kw, kb = jax.random.split(key, 3)

    B, C, H, W = 2, 4, 16, 16
    x = jax.random.normal(kx, (B, C, H, W), dtype=jnp.float32)

    # PyTorch default Conv2d init: U(-1/sqrt(fan_in), 1/sqrt(fan_in)), fan_in = 2*7*7.
    fan_in = IN_CH * KSIZE * KSIZE
    bound = 1.0 / (fan_in ** 0.5)
    weight = jax.random.uniform(kw, (1, IN_CH, KSIZE, KSIZE), jnp.float32,
                                minval=-bound, maxval=bound)
    bias = jax.random.uniform(kb, (1,), jnp.float32, minval=-bound, maxval=bound)

    y = spatial_attention(x, weight, bias)
    y = jax.block_until_ready(y)

    # Pure-JAX reference.
    max_map = jnp.max(x, axis=1, keepdims=True)
    avg_map = jnp.mean(x, axis=1, keepdims=True)
    pooled = jnp.concatenate([max_map, avg_map], axis=1)              # (B,2,H,W)
    conv = jax.lax.conv_general_dilated(
        pooled, weight, window_strides=(1, 1),
        padding=((PAD, PAD), (PAD, PAD)),
        dimension_numbers=("NCHW", "OIHW", "NCHW"))
    ref = jax.nn.sigmoid(conv + bias.reshape(1, 1, 1, 1))

    assert y.shape == (B, 1, H, W) and y.dtype == x.dtype
    err = float(jnp.max(jnp.abs(y - ref)))
    assert err < 1e-5, f"max abs err {err}"
    print("KERNEL_OK")
</pallas_src>

<mosaic_0001>
module attributes {stable_mosaic.version = 11 : i64} {
  func.func @kernel(%arg0: i32, %arg1: i32, %arg2: memref<99xf32, #tpu.memory_space<smem>>, %arg3: memref<1x4x16x16xf32, #tpu.memory_space<vmem>>, %arg4: memref<1x1x16x16xf32, #tpu.memory_space<vmem>>, %arg5: memref<16x16xf32, #tpu.memory_space<vmem>>, %arg6: memref<16x16xf32, #tpu.memory_space<vmem>>, %arg7: memref<2x22x22xf32, #tpu.memory_space<vmem>>) attributes {dimension_semantics = [#tpu.dimension_semantics<parallel>, #tpu.dimension_semantics<arbitrary>], iteration_bounds = array<i64: 2, 1>, scalar_prefetch = 0 : i64, scratch_operands = 3 : i64, tpu.core_type = #tpu.core_type<tc>, window_params = [{transform_indices = @transform_0, window_bounds = array<i64: 99>}, {transform_indices = @transform_1, window_bounds = array<i64: 1, 4, 16, 16>}, {transform_indices = @transform_2, window_bounds = array<i64: 1, 1, 16, 16>}]} {
    %c0_i32 = arith.constant 0 : i32
    %0 = arith.cmpi eq, %arg1, %c0_i32 : i32
    %1 = arith.extui %0 : i1 to i32
    %c0_i32_0 = arith.constant 0 : i32
    %2 = arith.cmpi ne, %1, %c0_i32_0 : i32
    scf.if %2 {
      %cst_15 = arith.constant 0xFF800000 : f32
      %16 = vector.broadcast %cst_15 : f32 to vector<16x16xf32>
      %c0_16 = arith.constant 0 : index
      %c0_17 = arith.constant 0 : index
      %17 = vector.load %arg5[%c0_16, %c0_17] : memref<16x16xf32, #tpu.memory_space<vmem>>, vector<16x16xf32>
      tpu.vector_store %arg5[%c0_16, %c0_17], %16 {strides = array<i32>} : memref<16x16xf32, #tpu.memory_space<vmem>>, vector<16x16xf32>,
      %cst_18 = arith.constant 0.000000e+00 : f32
      %18 = vector.broadcast %cst_18 : f32 to vector<16x16xf32>
      %c0_19 = arith.constant 0 : index
      %c0_20 = arith.constant 0 : index
      %19 = vector.load %arg6[%c0_19, %c0_20] : memref<16x16xf32, #tpu.memory_space<vmem>>, vector<16x16xf32>
      tpu.vector_store %arg6[%c0_19, %c0_20], %18 {strides = array<i32>} : memref<16x16xf32, #tpu.memory_space<vmem>>, vector<16x16xf32>,
      %cst_21 = arith.constant 0.000000e+00 : f32
      %20 = vector.broadcast %cst_21 : f32 to vector<2x22x22xf32>
      %c0_22 = arith.constant 0 : index
      %c0_23 = arith.constant 0 : index
      %c0_24 = arith.constant 0 : index
      %21 = vector.load %arg7[%c0_22, %c0_23, %c0_24] : memref<2x22x22xf32, #tpu.memory_space<vmem>>, vector<2x22x22xf32>
      tpu.vector_store %arg7[%c0_22, %c0_23, %c0_24], %20 {strides = array<i32>} : memref<2x22x22xf32, #tpu.memory_space<vmem>>, vector<2x22x22xf32>,
    } else {
    }
    %c0 = arith.constant 0 : index
    %c0_1 = arith.constant 0 : index
    %c0_2 = arith.constant 0 : index
    %c0_3 = arith.constant 0 : index
    %3 = vector.load %arg3[%c0, %c0_1, %c0_2, %c0_3] : memref<1x4x16x16xf32, #tpu.memory_space<vmem>>, vector<1x4x16x16xf32>
    %4 = vector.shape_cast %3 : vector<1x4x16x16xf32> to vector<4x16x16xf32>
    %c0_4 = arith.constant 0 : index
    %c0_5 = arith.constant 0 : index
    %5 = vector.load %arg5[%c0_4, %c0_5] : memref<16x16xf32, #tpu.memory_space<vmem>>, vector<16x16xf32>
    %cst = arith.constant dense<0xFF800000> : vector<16x16xf32>
    %6 = vector.multi_reduction <maximumf>, %4, %cst [0] : vector<4x16x16xf32> to vector<16x16xf32>
    %7 = arith.maximumf %5, %6 : vector<16x16xf32>
    %c0_6 = arith.constant 0 : index
    %c0_7 = arith.constant 0 : index
    %8 = vector.load %arg5[%c0_6, %c0_7] : memref<16x16xf32, #tpu.memory_space<vmem>>, vector<16x16xf32>
    tpu.vector_store %arg5[%c0_6, %c0_7], %7 {strides = array<i32>} : memref<16x16xf32, #tpu.memory_space<vmem>>, vector<16x16xf32>,
    %c0_8 = arith.constant 0 : index
    %c0_9 = arith.constant 0 : index
    %9 = vector.load %arg6[%c0_8, %c0_9] : memref<16x16xf32, #tpu.memory_space<vmem>>, vector<16x16xf32>
    %cst_10 = arith.constant dense<0.000000e+00> : vector<16x16xf32>
    %10 = vector.multi_reduction <add>, %4, %cst_10 [0] : vector<4x16x16xf32> to vector<16x16xf32>
    %11 = arith.addf %9, %10 : vector<16x16xf32>
    %c0_11 = arith.constant 0 : index
    %c0_12 = arith.constant 0 : index
    %12 = vector.load %arg6[%c0_11, %c0_12] : memref<16x16xf32, #tpu.memory_space<vmem>>, vector<16x16xf32>
    tpu.vector_store %arg6[%c0_11, %c0_12], %11 {strides = array<i32>} : memref<16x16xf32, #tpu.memory_space<vmem>>, vector<16x16xf32>,
    %c0_i32_13 = arith.constant 0 : i32
    %13 = arith.cmpi eq, %arg1, %c0_i32_13 : i32
    %14 = arith.extui %13 : i1 to i32
    %c0_i32_14 = arith.constant 0 : i32
    %15 = arith.cmpi ne, %14, %c0_i32_14 : i32
    scf.if %15 {
      %c0_15 = arith.constant 0 : index
      %c0_16 = arith.constant 0 : index
      %16 = vector.load %arg5[%c0_15, %c0_16] : memref<16x16xf32, #tpu.memory_space<vmem>>, vector<16x16xf32>
      %c0_17 = arith.constant 0 : index
      %c3 = arith.constant 3 : index
      %c3_18 = arith.constant 3 : index
      %17 = vector.load %arg7[%c0_17, %c3, %c3_18] : memref<2x22x22xf32, #tpu.memory_space<vmem>>, vector<1x16x16xf32>
      %18 = vector.shape_cast %17 : vector<1x16x16xf32> to vector<16x16xf32>
      %19 = vector.shape_cast %16 : vector<16x16xf32> to vector<1x16x16xf32>
      tpu.vector_store %arg7[%c0_17, %c3, %c3_18], %19 {strides = array<i32>} : memref<2x22x22xf32, #tpu.memory_space<vmem>>, vector<1x16x16xf32>,
      %c0_19 = arith.constant 0 : index
      %c0_20 = arith.constant 0 : index
      %20 = vector.load %arg6[%c0_19, %c0_20] : memref<16x16xf32, #tpu.memory_space<vmem>>, vector<16x16xf32>
      %cst_21 = arith.constant 2.500000e-01 : f32
      %21 = vector.broadcast %cst_21 : f32 to vector<16x16xf32>
      %22 = arith.mulf %20, %21 : vector<16x16xf32>
      %c1 = arith.constant 1 : index
      %c3_22 = arith.constant 3 : index
      %c3_23 = arith.constant 3 : index
      %23 = vector.load %arg7[%c1, %c3_22, %c3_23] : memref<2x22x22xf32, #tpu.memory_space<vmem>>, vector<1x16x16xf32>
      %24 = vector.shape_cast %23 : vector<1x16x16xf32> to vector<16x16xf32>
      %25 = vector.shape_cast %22 : vector<16x16xf32> to vector<1x16x16xf32>
      tpu.vector_store %arg7[%c1, %c3_22, %c3_23], %25 {strides = array<i32>} : memref<2x22x22xf32, #tpu.memory_space<vmem>>, vector<1x16x16xf32>,
      %c98 = arith.constant 98 : index
      %26 = memref.load %arg2[%c98] : memref<99xf32, #tpu.memory_space<smem>>
      %c0_24 = arith.constant 0 : index
      %c0_25 = arith.constant 0 : index
      %c0_26 = arith.constant 0 : index
      %27 = vector.load %arg7[%c0_24, %c0_25, %c0_26] : memref<2x22x22xf32, #tpu.memory_space<vmem>>, vector<1x22x16xf32>
      %28 = vector.shape_cast %27 : vector<1x22x16xf32> to vector<22x16xf32>
      %c0_27 = arith.constant 0 : index
      %29 = memref.load %arg2[%c0_27] : memref<99xf32, #tpu.memory_space<smem>>
      %30 = vector.extract_strided_slice %28 {offsets = [0, 0], sizes = [16, 16], strides = [1, 1]} : vector<22x16xf32> to vector<16x16xf32>
      %31 = vector.broadcast %29 : f32 to vector<16x16xf32>
      %32 = arith.mulf %31, %30 : vector<16x16xf32>
      %33 = vector.broadcast %26 : f32 to vector<16x16xf32>
      %34 = arith.addf %32, %33 : vector<16x16xf32>
      %c7 = arith.constant 7 : index
      %35 = memref.load %arg2[%c7] : memref<99xf32, #tpu.memory_space<smem>>
      %36 = vector.extract_strided_slice %28 {offsets = [1, 0], sizes = [16, 16], strides = [1, 1]} : vector<22x16xf32> to vector<16x16xf32>
      %37 = vector.broadcast %35 : f32 to vector<16x16xf32>
      %38 = arith.mulf %37, %36 : vector<16x16xf32>
      %39 = arith.addf %34, %38 : vector<16x16xf32>
      %c14 = arith.constant 14 : index
      %40 = memref.load %arg2[%c14] : memref<99xf32, #tpu.memory_space<smem>>
      %41 = vector.extract_strided_slice %28 {offsets = [2, 0], sizes = [16, 16], strides = [1, 1]} : vector<22x16xf32> to vector<16x16xf32>
      %42 = vector.broadcast %40 : f32 to vector<16x16xf32>
      %43 = arith.mulf %42, %41 : vector<16x16xf32>
      %44 = arith.addf %39, %43 : vector<16x16xf32>
      %c21 = arith.constant 21 : index
      %45 = memref.load %arg2[%c21] : memref<99xf32, #tpu.memory_space<smem>>
      %46 = vector.extract_strided_slice %28 {offsets = [3, 0], sizes = [16, 16], strides = [1, 1]} : vector<22x16xf32> to vector<16x16xf32>
      %47 = vector.broadcast %45 : f32 to vector<16x16xf32>
      %48 = arith.mulf %47, %46 : vector<16x16xf32>
      %49 = arith.addf %44, %48 : vector<16x16xf32>
      %c28 = arith.constant 28 : index
      %50 = memref.load %arg2[%c28] : memref<99xf32, #tpu.memory_space<smem>>
      %51 = vector.extract_strided_slice %28 {offsets = [4, 0], sizes = [16, 16], strides = [1, 1]} : vector<22x16xf32> to vector<16x16xf32>
      %52 = vector.broadcast %50 : f32 to vector<16x16xf32>
      %53 = arith.mulf %52, %51 : vector<16x16xf32>
      %54 = arith.addf %49, %53 : vector<16x16xf32>
      %c35 = arith.constant 35 : index
      %55 = memref.load %arg2[%c35] : memref<99xf32, #tpu.memory_space<smem>>
      %56 = vector.extract_strided_slice %28 {offsets = [5, 0], sizes = [16, 16], strides = [1, 1]} : vector<22x16xf32> to vector<16x16xf32>
      %57 = vector.broadcast %55 : f32 to vector<16x16xf32>
      %58 = arith.mulf %57, %56 : vector<16x16xf32>
      %59 = arith.addf %54, %58 : vector<16x16xf32>
      %c42 = arith.constant 42 : index
      %60 = memref.load %arg2[%c42] : memref<99xf32, #tpu.memory_space<smem>>
      %61 = vector.extract_strided_slice %28 {offsets = [6, 0], sizes = [16, 16], strides = [1, 1]} : vector<22x16xf32> to vector<16x16xf32>
      %62 = vector.broadcast %60 : f32 to vector<16x16xf32>
      %63 = arith.mulf %62, %61 : vector<16x16xf32>
      %64 = arith.addf %59, %63 : vector<16x16xf32>
      %c0_28 = arith.constant 0 : index
      %c0_29 = arith.constant 0 : index
      %c1_30 = arith.constant 1 : index
      %65 = vector.load %arg7[%c0_28, %c0_29, %c1_30] : memref<2x22x22xf32, #tpu.memory_space<vmem>>, vector<1x22x16xf32>
      %66 = vector.shape_cast %65 : vector<1x22x16xf32> to vector<22x16xf32>
      %c1_31 = arith.constant 1 : index
      %67 = memref.load %arg2[%c1_31] : memref<99xf32, #tpu.memory_space<smem>>
      %68 = vector.extract_strided_slice %66 {offsets = [0, 0], sizes = [16, 16], strides = [1, 1]} : vector<22x16xf32> to vector<16x16xf32>
      %69 = vector.broadcast %67 : f32 to vector<16x16xf32>
      %70 = arith.mulf %69, %68 : vector<16x16xf32>
      %71 = arith.addf %64, %70 : vector<16x16xf32>
      %c8 = arith.constant 8 : index
      %72 = memref.load %arg2[%c8] : memref<99xf32, #tpu.memory_space<smem>>
      %73 = vector.extract_strided_slice %66 {offsets = [1, 0], sizes = [16, 16], strides = [1, 1]} : vector<22x16xf32> to vector<16x16xf32>
      %74 = vector.broadcast %72 : f32 to vector<16x16xf32>
      %75 = arith.mulf %74, %73 : vector<16x16xf32>
      %76 = arith.addf %71, %75 : vector<16x16xf32>
      %c15 = arith.constant 15 : index
      %77 = memref.load %arg2[%c15] : memref<99xf32, #tpu.memory_space<smem>>
      %78 = vector.extract_strided_slice %66 {offsets = [2, 0], sizes = [16, 16], strides = [1, 1]} : vector<22x16xf32> to vector<16x16xf32>
      %79 = vector.broadcast %77 : f32 to vector<16x16xf32>
      %80 = arith.mulf %79, %78 : vector<16x16xf32>
      %81 = arith.addf %76, %80 : vector<16x16xf32>
      %c22 = arith.constant 22 : index
      %82 = memref.load %arg2[%c22] : memref<99xf32, #tpu.memory_space<smem>>
      %83 = vector.extract_strided_slice %66 {offsets = [3, 0], sizes = [16, 16], strides = [1, 1]} : vector<22x16xf32> to vector<16x16xf32>
      %84 = vector.broadcast %82 : f32 to vector<16x16xf32>
      %85 = arith.mulf %84, %83 : vector<16x16xf32>
      %86 = arith.addf %81, %85 : vector<16x16xf32>
      %c29 = arith.constant 29 : index
      %87 = memref.load %arg2[%c29] : memref<99xf32, #tpu.memory_space<smem>>
      %88 = vector.extract_strided_slice %66 {offsets = [4, 0], sizes = [16, 16], strides = [1, 1]} : vector<22x16xf32> to vector<16x16xf32>
      %89 = vector.broadcast %87 : f32 to vector<16x16xf32>
      %90 = arith.mulf %89, %88 : vector<16x16xf32>
      %91 = arith.addf %86, %90 : vector<16x16xf32>
      %c36 = arith.constant 36 : index
      %92 = memref.load %arg2[%c36] : memref<99xf32, #tpu.memory_space<smem>>
      %93 = vector.extract_strided_slice %66 {offsets = [5, 0], sizes = [16, 16], strides = [1, 1]} : vector<22x16xf32> to vector<16x16xf32>
      %94 = vector.broadcast %92 : f32 to vector<16x16xf32>
      %95 = arith.mulf %94, %93 : vector<16x16xf32>
      %96 = arith.addf %91, %95 : vector<16x16xf32>
      %c43 = arith.constant 43 : index
      %97 = memref.load %arg2[%c43] : memref<99xf32, #tpu.memory_space<smem>>
      %98 = vector.extract_strided_slice %66 {offsets = [6, 0], sizes = [16, 16], strides = [1, 1]} : vector<22x16xf32> to vector<16x16xf32>
      %99 = vector.broadcast %97 : f32 to vector<16x16xf32>
      %100 = arith.mulf %99, %98 : vector<16x16xf32>
      %101 = arith.addf %96, %100 : vector<16x16xf32>
      %c0_32 = arith.constant 0 : index
      %c0_33 = arith.constant 0 : index
      %c2 = arith.constant 2 : index
      %102 = vector.load %arg7[%c0_32, %c0_33, %c2] : memref<2x22x22xf32, #tpu.memory_space<vmem>>, vector<1x22x16xf32>
      %103 = vector.shape_cast %102 : vector<1x22x16xf32> to vector<22x16xf32>
      %c2_34 = arith.constant 2 : index
      %104 = memref.load %arg2[%c2_34] : memref<99xf32, #tpu.memory_space<smem>>
      %105 = vector.extract_strided_slice %103 {offsets = [0, 0], sizes = [16, 16], strides = [1, 1]} : vector<22x16xf32> to vector<16x16xf32>
      %106 = vector.broadcast %104 : f32 to vector<16x16xf32>
      %107 = arith.mulf %106, %105 : vector<16x16xf32>
      %108 = arith.addf %101, %107 : vector<16x16xf32>
      %c9 = arith.constant 9 : index
      %109 = memref.load %arg2[%c9] : memref<99xf32, #tpu.memory_space<smem>>
      %110 = vector.extract_strided_slice %103 {offsets = [1, 0], sizes = [16, 16], strides = [1, 1]} : vector<22x16xf32> to vector<16x16xf32>
      %111 = vector.broadcast %109 : f32 to vector<16x16xf32>
      %112 = arith.mulf %111, %110 : vector<16x16xf32>
      %113 = arith.addf %108, %112 : vector<16x16xf32>
      %c16 = arith.constant 16 : index
      %114 = memref.load %arg2[%c16] : memref<99xf32, #tpu.memory_space<smem>>
      %115 = vector.extract_strided_slice %103 {offsets = [2, 0], sizes = [16, 16], strides = [1, 1]} : vector<22x16xf32> to vector<16x16xf32>
      %116 = vector.broadcast %114 : f32 to vector<16x16xf32>
      %117 = arith.mulf %116, %115 : vector<16x16xf32>
      %118 = arith.addf %113, %117 : vector<16x16xf32>
      %c23 = arith.constant 23 : index
      %119 = memref.load %arg2[%c23] : memref<99xf32, #tpu.memory_space<smem>>
      %120 = vector.extract_strided_slice %103 {offsets = [3, 0], sizes = [16, 16], strides = [1, 1]} : vector<22x16xf32> to vector<16x16xf32>
      %121 = vector.broadcast %119 : f32 to vector<16x16xf32>
      %122 = arith.mulf %121, %120 : vector<16x16xf32>
      %123 = arith.addf %118, %122 : vector<16x16xf32>
      %c30 = arith.constant 30 : index
      %124 = memref.load %arg2[%c30] : memref<99xf32, #tpu.memory_space<smem>>
      %125 = vector.extract_strided_slice %103 {offsets = [4, 0], sizes = [16, 16], strides = [1, 1]} : vector<22x16xf32> to vector<16x16xf32>
      %126 = vector.broadcast %124 : f32 to vector<16x16xf32>
      %127 = arith.mulf %126, %125 : vector<16x16xf32>
      %128 = arith.addf %123, %127 : vector<16x16xf32>
      %c37 = arith.constant 37 : index
      %129 = memref.load %arg2[%c37] : memref<99xf32, #tpu.memory_space<smem>>
      %130 = vector.extract_strided_slice %103 {offsets = [5, 0], sizes = [16, 16], strides = [1, 1]} : vector<22x16xf32> to vector<16x16xf32>
      %131 = vector.broadcast %129 : f32 to vector<16x16xf32>
      %132 = arith.mulf %131, %130 : vector<16x16xf32>
      %133 = arith.addf %128, %132 : vector<16x16xf32>
      %c44 = arith.constant 44 : index
      %134 = memref.load %arg2[%c44] : memref<99xf32, #tpu.memory_space<smem>>
      %135 = vector.extract_strided_slice %103 {offsets = [6, 0], sizes = [16, 16], strides = [1, 1]} : vector<22x16xf32> to vector<16x16xf32>
      %136 = vector.broadcast %134 : f32 to vector<16x16xf32>
      %137 = arith.mulf %136, %135 : vector<16x16xf32>
      %138 = arith.addf %133, %137 : vector<16x16xf32>
      %c0_35 = arith.constant 0 : index
      %c0_36 = arith.constant 0 : index
      %c3_37 = arith.constant 3 : index
      %139 = vector.load %arg7[%c0_35, %c0_36, %c3_37] : memref<2x22x22xf32, #tpu.memory_space<vmem>>, vector<1x22x16xf32>
      %140 = vector.shape_cast %139 : vector<1x22x16xf32> to vector<22x16xf32>
      %c3_38 = arith.constant 3 : index
      %141 = memref.load %arg2[%c3_38] : memref<99xf32, #tpu.memory_space<smem>>
      %142 = vector.extract_strided_slice %140 {offsets = [0, 0], sizes = [16, 16], strides = [1, 1]} : vector<22x16xf32> to vector<16x16xf32>
      %143 = vector.broadcast %141 : f32 to vector<16x16xf32>
      %144 = arith.mulf %143, %142 : vector<16x16xf32>
      %145 = arith.addf %138, %144 : vector<16x16xf32>
      %c10 = arith.constant 10 : index
      %146 = memref.load %arg2[%c10] : memref<99xf32, #tpu.memory_space<smem>>
      %147 = vector.extract_strided_slice %140 {offsets = [1, 0], sizes = [16, 16], strides = [1, 1]} : vector<22x16xf32> to vector<16x16xf32>
      %148 = vector.broadcast %146 : f32 to vector<16x16xf32>
      %149 = arith.mulf %148, %147 : vector<16x16xf32>
      %150 = arith.addf %145, %149 : vector<16x16xf32>
      %c17 = arith.constant 17 : index
      %151 = memref.load %arg2[%c17] : memref<99xf32, #tpu.memory_space<smem>>
      %152 = vector.extract_strided_slice %140 {offsets = [2, 0], sizes = [16, 16], strides = [1, 1]} : vector<22x16xf32> to vector<16x16xf32>
      %153 = vector.broadcast %151 : f32 to vector<16x16xf32>
      %154 = arith.mulf %153, %152 : vector<16x16xf32>
      %155 = arith.addf %150, %154 : vector<16x16xf32>
      %c24 = arith.constant 24 : index
      %156 = memref.load %arg2[%c24] : memref<99xf32, #tpu.memory_space<smem>>
      %157 = vector.extract_strided_slice %140 {offsets = [3, 0], sizes = [16, 16], strides = [1, 1]} : vector<22x16xf32> to vector<16x16xf32>
      %158 = vector.broadcast %156 : f32 to vector<16x16xf32>
      %159 = arith.mulf %158, %157 : vector<16x16xf32>
      %160 = arith.addf %155, %159 : vector<16x16xf32>
      %c31 = arith.constant 31 : index
      %161 = memref.load %arg2[%c31] : memref<99xf32, #tpu.memory_space<smem>>
      %162 = vector.extract_strided_slice %140 {offsets = [4, 0], sizes = [16, 16], strides = [1, 1]} : vector<22x16xf32> to vector<16x16xf32>
      %163 = vector.broadcast %161 : f32 to vector<16x16xf32>
      %164 = arith.mulf %163, %162 : vector<16x16xf32>
      %165 = arith.addf %160, %164 : vector<16x16xf32>
      %c38 = arith.constant 38 : index
      %166 = memref.load %arg2[%c38] : memref<99xf32, #tpu.memory_space<smem>>
      %167 = vector.extract_strided_slice %140 {offsets = [5, 0], sizes = [16, 16], strides = [1, 1]} : vector<22x16xf32> to vector<16x16xf32>
      %168 = vector.broadcast %166 : f32 to vector<16x16xf32>
      %169 = arith.mulf %168, %167 : vector<16x16xf32>
      %170 = arith.addf %165, %169 : vector<16x16xf32>
      %c45 = arith.constant 45 : index
      %171 = memref.load %arg2[%c45] : memref<99xf32, #tpu.memory_space<smem>>
      %172 = vector.extract_strided_slice %140 {offsets = [6, 0], sizes = [16, 16], strides = [1, 1]} : vector<22x16xf32> to vector<16x16xf32>
      %173 = vector.broadcast %171 : f32 to vector<16x16xf32>
      %174 = arith.mulf %173, %172 : vector<16x16xf32>
      %175 = arith.addf %170, %174 : vector<16x16xf32>
      %c0_39 = arith.constant 0 : index
      %c0_40 = arith.constant 0 : index
      %c4 = arith.constant 4 : index
      %176 = vector.load %arg7[%c0_39, %c0_40, %c4] : memref<2x22x22xf32, #tpu.memory_space<vmem>>, vector<1x22x16xf32>
      %177 = vector.shape_cast %176 : vector<1x22x16xf32> to vector<22x16xf32>
      %c4_41 = arith.constant 4 : index
      %178 = memref.load %arg2[%c4_41] : memref<99xf32, #tpu.memory_space<smem>>
      %179 = vector.extract_strided_slice %177 {offsets = [0, 0], sizes = [16, 16], strides = [1, 1]} : vector<22x16xf32> to vector<16x16xf32>
      %180 = vector.broadcast %178 : f32 to vector<16x16xf32>
      %181 = arith.mulf %180, %179 : vector<16x16xf32>
      %182 = arith.addf %175, %181 : vector<16x16xf32>
      %c11 = arith.constant 11 : index
      %183 = memref.load %arg2[%c11] : memref<99xf32, #tpu.memory_space<smem>>
      %184 = vector.extract_strided_slice %177 {offsets = [1, 0], sizes = [16, 16], strides = [1, 1]} : vector<22x16xf32> to vector<16x16xf32>
      %185 = vector.broadcast %183 : f32 to vector<16x16xf32>
      %186 = arith.mulf %185, %184 : vector<16x16xf32>
      %187 = arith.addf %182, %186 : vector<16x16xf32>
      %c18 = arith.constant 18 : index
      %188 = memref.load %arg2[%c18] : memref<99xf32, #tpu.memory_space<smem>>
      %189 = vector.extract_strided_slice %177 {offsets = [2, 0], sizes = [16, 16], strides = [1, 1]} : vector<22x16xf32> to vector<16x16xf32>
      %190 = vector.broadcast %188 : f32 to vector<16x16xf32>
      %191 = arith.mulf %190, %189 : vector<16x16xf32>
      %192 = arith.addf %187, %191 : vector<16x16xf32>
      %c25 = arith.constant 25 : index
      %193 = memref.load %arg2[%c25] : memref<99xf32, #tpu.memory_space<smem>>
      %194 = vector.extract_strided_slice %177 {offsets = [3, 0], sizes = [16, 16], strides = [1, 1]} : vector<22x16xf32> to vector<16x16xf32>
      %195 = vector.broadcast %193 : f32 to vector<16x16xf32>
      %196 = arith.mulf %195, %194 : vector<16x16xf32>
      %197 = arith.addf %192, %196 : vector<16x16xf32>
      %c32 = arith.constant 32 : index
      %198 = memref.load %arg2[%c32] : memref<99xf32, #tpu.memory_space<smem>>
      %199 = vector.extract_strided_slice %177 {offsets = [4, 0], sizes = [16, 16], strides = [1, 1]} : vector<22x16xf32> to vector<16x16xf32>
      %200 = vector.broadcast %198 : f32 to vector<16x16xf32>
      %201 = arith.mulf %200, %199 : vector<16x16xf32>
      %202 = arith.addf %197, %201 : vector<16x16xf32>
      %c39 = arith.constant 39 : index
      %203 = memref.load %arg2[%c39] : memref<99xf32, #tpu.memory_space<smem>>
      %204 = vector.extract_strided_slice %177 {offsets = [5, 0], sizes = [16, 16], strides = [1, 1]} : vector<22x16xf32> to vector<16x16xf32>
      %205 = vector.broadcast %203 : f32 to vector<16x16xf32>
      %206 = arith.mulf %205, %204 : vector<16x16xf32>
      %207 = arith.addf %202, %206 : vector<16x16xf32>
      %c46 = arith.constant 46 : index
      %208 = memref.load %arg2[%c46] : memref<99xf32, #tpu.memory_space<smem>>
      %209 = vector.extract_strided_slice %177 {offsets = [6, 0], sizes = [16, 16], strides = [1, 1]} : vector<22x16xf32> to vector<16x16xf32>
      %210 = vector.broadcast %208 : f32 to vector<16x16xf32>
      %211 = arith.mulf %210, %209 : vector<16x16xf32>
      %212 = arith.addf %207, %211 : vector<16x16xf32>
      %c0_42 = arith.constant 0 : index
      %c0_43 = arith.constant 0 : index
      %c5 = arith.constant 5 : index
      %213 = vector.load %arg7[%c0_42, %c0_43, %c5] : memref<2x22x22xf32, #tpu.memory_space<vmem>>, vector<1x22x16xf32>
      %214 = vector.shape_cast %213 : vector<1x22x16xf32> to vector<22x16xf32>
      %c5_44 = arith.constant 5 : index
      %215 = memref.load %arg2[%c5_44] : memref<99xf32, #tpu.memory_space<smem>>
      %216 = vector.extract_strided_slice %214 {offsets = [0, 0], sizes = [16, 16], strides = [1, 1]} : vector<22x16xf32> to vector<16x16xf32>
      %217 = vector.broadcast %215 : f32 to vector<16x16xf32>
      %218 = arith.mulf %217, %216 : vector<16x16xf32>
      %219 = arith.addf %212, %218 : vector<16x16xf32>
      %c12 = arith.constant 12 : index
      %220 = memref.load %arg2[%c12] : memref<99xf32, #tpu.memory_space<smem>>
      %221 = vector.extract_strided_slice %214 {offsets = [1, 0], sizes = [16, 16], strides = [1, 1]} : vector<22x16xf32> to vector<16x16xf32>
      %222 = vector.broadcast %220 : f32 to vector<16x16xf32>
      %223 = arith.mulf %222, %221 : vector<16x16xf32>
      %224 = arith.addf %219, %223 : vector<16x16xf32>
      %c19 = arith.constant 19 : index
      %225 = memref.load %arg2[%c19] : memref<99xf32, #tpu.memory_space<smem>>
      %226 = vector.extract_strided_slice %214 {offsets = [2, 0], sizes = [16, 16], strides = [1, 1]} : vector<22x16xf32> to vector<16x16xf32>
      %227 = vector.broadcast %225 : f32 to vector<16x16xf32>
      %228 = arith.mulf %227, %226 : vector<16x16xf32>
      %229 = arith.addf %224, %228 : vector<16x16xf32>
      %c26 = arith.constant 26 : index
      %230 = memref.load %arg2[%c26] : memref<99xf32, #tpu.memory_space<smem>>
      %231 = vector.extract_strided_slice %214 {offsets = [3, 0], sizes = [16, 16], strides = [1, 1]} : vector<22x16xf32> to vector<16x16xf32>
      %232 = vector.broadcast %230 : f32 to vector<16x16xf32>
      %233 = arith.mulf %232, %231 : vector<16x16xf32>
      %234 = arith.addf %229, %233 : vector<16x16xf32>
      %c33 = arith.constant 33 : index
      %235 = memref.load %arg2[%c33] : memref<99xf32, #tpu.memory_space<smem>>
      %236 = vector.extract_strided_slice %214 {offsets = [4, 0], sizes = [16, 16], strides = [1, 1]} : vector<22x16xf32> to vector<16x16xf32>
      %237 = vector.broadcast %235 : f32 to vector<16x16xf32>
      %238 = arith.mulf %237, %236 : vector<16x16xf32>
      %239 = arith.addf %234, %238 : vector<16x16xf32>
      %c40 = arith.constant 40 : index
      %240 = memref.load %arg2[%c40] : memref<99xf32, #tpu.memory_space<smem>>
      %241 = vector.extract_strided_slice %214 {offsets = [5, 0], sizes = [16, 16], strides = [1, 1]} : vector<22x16xf32> to vector<16x16xf32>
      %242 = vector.broadcast %240 : f32 to vector<16x16xf32>
      %243 = arith.mulf %242, %241 : vector<16x16xf32>
      %244 = arith.addf %239, %243 : vector<16x16xf32>
      %c47 = arith.constant 47 : index
      %245 = memref.load %arg2[%c47] : memref<99xf32, #tpu.memory_space<smem>>
      %246 = vector.extract_strided_slice %214 {offsets = [6, 0], sizes = [16, 16], strides = [1, 1]} : vector<22x16xf32> to vector<16x16xf32>
      %247 = vector.broadcast %245 : f32 to vector<16x16xf32>
      %248 = arith.mulf %247, %246 : vector<16x16xf32>
      %249 = arith.addf %244, %248 : vector<16x16xf32>
      %c0_45 = arith.constant 0 : index
      %c0_46 = arith.constant 0 : index
      %c6 = arith.constant 6 : index
      %250 = vector.load %arg7[%c0_45, %c0_46, %c6] : memref<2x22x22xf32, #tpu.memory_space<vmem>>, vector<1x22x16xf32>
      %251 = vector.shape_cast %250 : vector<1x22x16xf32> to vector<22x16xf32>
      %c6_47 = arith.constant 6 : index
      %252 = memref.load %arg2[%c6_47] : memref<99xf32, #tpu.memory_space<smem>>
      %253 = vector.extract_strided_slice %251 {offsets = [0, 0], sizes = [16, 16], strides = [1, 1]} : vector<22x16xf32> to vector<16x16xf32>
      %254 = vector.broadcast %252 : f32 to vector<16x16xf32>
      %255 = arith.mulf %254, %253 : vector<16x16xf32>
      %256 = arith.addf %249, %255 : vector<16x16xf32>
      %c13 = arith.constant 13 : index
      %257 = memref.load %arg2[%c13] : memref<99xf32, #tpu.memory_space<smem>>
      %258 = vector.extract_strided_slice %251 {offsets = [1, 0], sizes = [16, 16], strides = [1, 1]} : vector<22x16xf32> to vector<16x16xf32>
      %259 = vector.broadcast %257 : f32 to vector<16x16xf32>
      %260 = arith.mulf %259, %258 : vector<16x16xf32>
      %261 = arith.addf %256, %260 : vector<16x16xf32>
      %c20 = arith.constant 20 : index
      %262 = memref.load %arg2[%c20] : memref<99xf32, #tpu.memory_space<smem>>
      %263 = vector.extract_strided_slice %251 {offsets = [2, 0], sizes = [16, 16], strides = [1, 1]} : vector<22x16xf32> to vector<16x16xf32>
      %264 = vector.broadcast %262 : f32 to vector<16x16xf32>
      %265 = arith.mulf %264, %263 : vector<16x16xf32>
      %266 = arith.addf %261, %265 : vector<16x16xf32>
      %c27 = arith.constant 27 : index
      %267 = memref.load %arg2[%c27] : memref<99xf32, #tpu.memory_space<smem>>
      %268 = vector.extract_strided_slice %251 {offsets = [3, 0], sizes = [16, 16], strides = [1, 1]} : vector<22x16xf32> to vector<16x16xf32>
      %269 = vector.broadcast %267 : f32 to vector<16x16xf32>
      %270 = arith.mulf %269, %268 : vector<16x16xf32>
      %271 = arith.addf %266, %270 : vector<16x16xf32>
      %c34 = arith.constant 34 : index
      %272 = memref.load %arg2[%c34] : memref<99xf32, #tpu.memory_space<smem>>
      %273 = vector.extract_strided_slice %251 {offsets = [4, 0], sizes = [16, 16], strides = [1, 1]} : vector<22x16xf32> to vector<16x16xf32>
      %274 = vector.broadcast %272 : f32 to vector<16x16xf32>
      %275 = arith.mulf %274, %273 : vector<16x16xf32>
      %276 = arith.addf %271, %275 : vector<16x16xf32>
      %c41 = arith.constant 41 : index
      %277 = memref.load %arg2[%c41] : memref<99xf32, #tpu.memory_space<smem>>
      %278 = vector.extract_strided_slice %251 {offsets = [5, 0], sizes = [16, 16], strides = [1, 1]} : vector<22x16xf32> to vector<16x16xf32>
      %279 = vector.broadcast %277 : f32 to vector<16x16xf32>
      %280 = arith.mulf %279, %278 : vector<16x16xf32>
      %281 = arith.addf %276, %280 : vector<16x16xf32>
      %c48 = arith.constant 48 : index
      %282 = memref.load %arg2[%c48] : memref<99xf32, #tpu.memory_space<smem>>
      %283 = vector.extract_strided_slice %251 {offsets = [6, 0], sizes = [16, 16], strides = [1, 1]} : vector<22x16xf32> to vector<16x16xf32>
      %284 = vector.broadcast %282 : f32 to vector<16x16xf32>
      %285 = arith.mulf %284, %283 : vector<16x16xf32>
      %286 = arith.addf %281, %285 : vector<16x16xf32>
      %c1_48 = arith.constant 1 : index
      %c0_49 = arith.constant 0 : index
      %c0_50 = arith.constant 0 : index
      %287 = vector.load %arg7[%c1_48, %c0_49, %c0_50] : memref<2x22x22xf32, #tpu.memory_space<vmem>>, vector<1x22x16xf32>
      %288 = vector.shape_cast %287 : vector<1x22x16xf32> to vector<22x16xf32>
      %c49 = arith.constant 49 : index
      %289 = memref.load %arg2[%c49] : memref<99xf32, #tpu.memory_space<smem>>
      %290 = vector.extract_strided_slice %288 {offsets = [0, 0], sizes = [16, 16], strides = [1, 1]} : vector<22x16xf32> to vector<16x16xf32>
      %291 = vector.broadcast %289 : f32 to vector<16x16xf32>
      %292 = arith.mulf %291, %290 : vector<16x16xf32>
      %293 = arith.addf %286, %292 : vector<16x16xf32>
      %c56 = arith.constant 56 : index
      %294 = memref.load %arg2[%c56] : memref<99xf32, #tpu.memory_space<smem>>
      %295 = vector.extract_strided_slice %288 {offsets = [1, 0], sizes = [16, 16], strides = [1, 1]} : vector<22x16xf32> to vector<16x16xf32>
      %296 = vector.broadcast %294 : f32 to vector<16x16xf32>
      %297 = arith.mulf %296, %295 : vector<16x16xf32>
      %298 = arith.addf %293, %297 : vector<16x16xf32>
      %c63 = arith.constant 63 : index
      %299 = memref.load %arg2[%c63] : memref<99xf32, #tpu.memory_space<smem>>
      %300 = vector.extract_strided_slice %288 {offsets = [2, 0], sizes = [16, 16], strides = [1, 1]} : vector<22x16xf32> to vector<16x16xf32>
      %301 = vector.broadcast %299 : f32 to vector<16x16xf32>
      %302 = arith.mulf %301, %300 : vector<16x16xf32>
      %303 = arith.addf %298, %302 : vector<16x16xf32>
      %c70 = arith.constant 70 : index
      %304 = memref.load %arg2[%c70] : memref<99xf32, #tpu.memory_space<smem>>
      %305 = vector.extract_strided_slice %288 {offsets = [3, 0], sizes = [16, 16], strides = [1, 1]} : vector<22x16xf32> to vector<16x16xf32>
      %306 = vector.broadcast %304 : f32 to vector<16x16xf32>
      %307 = arith.mulf %306, %305 : vector<16x16xf32>
      %308 = arith.addf %303, %307 : vector<16x16xf32>
      %c77 = arith.constant 77 : index
      %309 = memref.load %arg2[%c77] : memref<99xf32, #tpu.memory_space<smem>>
      %310 = vector.extract_strided_slice %288 {offsets = [4, 0], sizes = [16, 16], strides = [1, 1]} : vector<22x16xf32> to vector<16x16xf32>
      %311 = vector.broadcast %309 : f32 to vector<16x16xf32>
      %312 = arith.mulf %311, %310 : vector<16x16xf32>
      %313 = arith.addf %308, %312 : vector<16x16xf32>
      %c84 = arith.constant 84 : index
      %314 = memref.load %arg2[%c84] : memref<99xf32, #tpu.memory_space<smem>>
      %315 = vector.extract_strided_slice %288 {offsets = [5, 0], sizes = [16, 16], strides = [1, 1]} : vector<22x16xf32> to vector<16x16xf32>
      %316 = vector.broadcast %314 : f32 to vector<16x16xf32>
      %317 = arith.mulf %316, %315 : vector<16x16xf32>
      %318 = arith.addf %313, %317 : vector<16x16xf32>
      %c91 = arith.constant 91 : index
      %319 = memref.load %arg2[%c91] : memref<99xf32, #tpu.memory_space<smem>>
      %320 = vector.extract_strided_slice %288 {offsets = [6, 0], sizes = [16, 16], strides = [1, 1]} : vector<22x16xf32> to vector<16x16xf32>
      %321 = vector.broadcast %319 : f32 to vector<16x16xf32>
      %322 = arith.mulf %321, %320 : vector<16x16xf32>
      %323 = arith.addf %318, %322 : vector<16x16xf32>
      %c1_51 = arith.constant 1 : index
      %c0_52 = arith.constant 0 : index
      %c1_53 = arith.constant 1 : index
      %324 = vector.load %arg7[%c1_51, %c0_52, %c1_53] : memref<2x22x22xf32, #tpu.memory_space<vmem>>, vector<1x22x16xf32>
      %325 = vector.shape_cast %324 : vector<1x22x16xf32> to vector<22x16xf32>
      %c50 = arith.constant 50 : index
      %326 = memref.load %arg2[%c50] : memref<99xf32, #tpu.memory_space<smem>>
      %327 = vector.extract_strided_slice %325 {offsets = [0, 0], sizes = [16, 16], strides = [1, 1]} : vector<22x16xf32> to vector<16x16xf32>
      %328 = vector.broadcast %326 : f32 to vector<16x16xf32>
      %329 = arith.mulf %328, %327 : vector<16x16xf32>
      %330 = arith.addf %323, %329 : vector<16x16xf32>
      %c57 = arith.constant 57 : index
      %331 = memref.load %arg2[%c57] : memref<99xf32, #tpu.memory_space<smem>>
      %332 = vector.extract_strided_slice %325 {offsets = [1, 0], sizes = [16, 16], strides = [1, 1]} : vector<22x16xf32> to vector<16x16xf32>
      %333 = vector.broadcast %331 : f32 to vector<16x16xf32>
      %334 = arith.mulf %333, %332 : vector<16x16xf32>
      %335 = arith.addf %330, %334 : vector<16x16xf32>
      %c64 = arith.constant 64 : index
      %336 = memref.load %arg2[%c64] : memref<99xf32, #tpu.memory_space<smem>>
      %337 = vector.extract_strided_slice %325 {offsets = [2, 0], sizes = [16, 16], strides = [1, 1]} : vector<22x16xf32> to vector<16x16xf32>
      %338 = vector.broadcast %336 : f32 to vector<16x16xf32>
      %339 = arith.mulf %338, %337 : vector<16x16xf32>
      %340 = arith.addf %335, %339 : vector<16x16xf32>
      %c71 = arith.constant 71 : index
      %341 = memref.load %arg2[%c71] : memref<99xf32, #tpu.memory_space<smem>>
      %342 = vector.extract_strided_slice %325 {offsets = [3, 0], sizes = [16, 16], strides = [1, 1]} : vector<22x16xf32> to vector<16x16xf32>
      %343 = vector.broadcast %341 : f32 to vector<16x16xf32>
      %344 = arith.mulf %343, %342 : vector<16x16xf32>
      %345 = arith.addf %340, %344 : vector<16x16xf32>
      %c78 = arith.constant 78 : index
      %346 = memref.load %arg2[%c78] : memref<99xf32, #tpu.memory_space<smem>>
      %347 = vector.extract_strided_slice %325 {offsets = [4, 0], sizes = [16, 16], strides = [1, 1]} : vector<22x16xf32> to vector<16x16xf32>
      %348 = vector.broadcast %346 : f32 to vector<16x16xf32>
      %349 = arith.mulf %348, %347 : vector<16x16xf32>
      %350 = arith.addf %345, %349 : vector<16x16xf32>
      %c85 = arith.constant 85 : index
      %351 = memref.load %arg2[%c85] : memref<99xf32, #tpu.memory_space<smem>>
      %352 = vector.extract_strided_slice %325 {offsets = [5, 0], sizes = [16, 16], strides = [1, 1]} : vector<22x16xf32> to vector<16x16xf32>
      %353 = vector.broadcast %351 : f32 to vector<16x16xf32>
      %354 = arith.mulf %353, %352 : vector<16x16xf32>
      %355 = arith.addf %350, %354 : vector<16x16xf32>
      %c92 = arith.constant 92 : index
      %356 = memref.load %arg2[%c92] : memref<99xf32, #tpu.memory_space<smem>>
      %357 = vector.extract_strided_slice %325 {offsets = [6, 0], sizes = [16, 16], strides = [1, 1]} : vector<22x16xf32> to vector<16x16xf32>
      %358 = vector.broadcast %356 : f32 to vector<16x16xf32>
      %359 = arith.mulf %358, %357 : vector<16x16xf32>
      %360 = arith.addf %355, %359 : vector<16x16xf32>
      %c1_54 = arith.constant 1 : index
      %c0_55 = arith.constant 0 : index
      %c2_56 = arith.constant 2 : index
      %361 = vector.load %arg7[%c1_54, %c0_55, %c2_56] : memref<2x22x22xf32, #tpu.memory_space<vmem>>, vector<1x22x16xf32>
      %362 = vector.shape_cast %361 : vector<1x22x16xf32> to vector<22x16xf32>
      %c51 = arith.constant 51 : index
      %363 = memref.load %arg2[%c51] : memref<99xf32, #tpu.memory_space<smem>>
      %364 = vector.extract_strided_slice %362 {offsets = [0, 0], sizes = [16, 16], strides = [1, 1]} : vector<22x16xf32> to vector<16x16xf32>
      %365 = vector.broadcast %363 : f32 to vector<16x16xf32>
      %366 = arith.mulf %365, %364 : vector<16x16xf32>
      %367 = arith.addf %360, %366 : vector<16x16xf32>
      %c58 = arith.constant 58 : index
      %368 = memref.load %arg2[%c58] : memref<99xf32, #tpu.memory_space<smem>>
      %369 = vector.extract_strided_slice %362 {offsets = [1, 0], sizes = [16, 16], strides = [1, 1]} : vector<22x16xf32> to vector<16x16xf32>
      %370 = vector.broadcast %368 : f32 to vector<16x16xf32>
      %371 = arith.mulf %370, %369 : vector<16x16xf32>
      %372 = arith.addf %367, %371 : vector<16x16xf32>
      %c65 = arith.constant 65 : index
      %373 = memref.load %arg2[%c65] : memref<99xf32, #tpu.memory_space<smem>>
      %374 = vector.extract_strided_slice %362 {offsets = [2, 0], sizes = [16, 16], strides = [1, 1]} : vector<22x16xf32> to vector<16x16xf32>
      %375 = vector.broadcast %373 : f32 to vector<16x16xf32>
      %376 = arith.mulf %375, %374 : vector<16x16xf32>
      %377 = arith.addf %372, %376 : vector<16x16xf32>
      %c72 = arith.constant 72 : index
      %378 = memref.load %arg2[%c72] : memref<99xf32, #tpu.memory_space<smem>>
      %379 = vector.extract_strided_slice %362 {offsets = [3, 0], sizes = [16, 16], strides = [1, 1]} : vector<22x16xf32> to vector<16x16xf32>
      %380 = vector.broadcast %378 : f32 to vector<16x16xf32>
      %381 = arith.mulf %380, %379 : vector<16x16xf32>
      %382 = arith.addf %377, %381 : vector<16x16xf32>
      %c79 = arith.constant 79 : index
      %383 = memref.load %arg2[%c79] : memref<99xf32, #tpu.memory_space<smem>>
      %384 = vector.extract_strided_slice %362 {offsets = [4, 0], sizes = [16, 16], strides = [1, 1]} : vector<22x16xf32> to vector<16x16xf32>
      %385 = vector.broadcast %383 : f32 to vector<16x16xf32>
      %386 = arith.mulf %385, %384 : vector<16x16xf32>
      %387 = arith.addf %382, %386 : vector<16x16xf32>
      %c86 = arith.constant 86 : index
      %388 = memref.load %arg2[%c86] : memref<99xf32, #tpu.memory_space<smem>>
      %389 = vector.extract_strided_slice %362 {offsets = [5, 0], sizes = [16, 16], strides = [1, 1]} : vector<22x16xf32> to vector<16x16xf32>
      %390 = vector.broadcast %388 : f32 to vector<16x16xf32>
      %391 = arith.mulf %390, %389 : vector<16x16xf32>
      %392 = arith.addf %387, %391 : vector<16x16xf32>
      %c93 = arith.constant 93 : index
      %393 = memref.load %arg2[%c93] : memref<99xf32, #tpu.memory_space<smem>>
      %394 = vector.extract_strided_slice %362 {offsets = [6, 0], sizes = [16, 16], strides = [1, 1]} : vector<22x16xf32> to vector<16x16xf32>
      %395 = vector.broadcast %393 : f32 to vector<16x16xf32>
      %396 = arith.mulf %395, %394 : vector<16x16xf32>
      %397 = arith.addf %392, %396 : vector<16x16xf32>
      %c1_57 = arith.constant 1 : index
      %c0_58 = arith.constant 0 : index
      %c3_59 = arith.constant 3 : index
      %398 = vector.load %arg7[%c1_57, %c0_58, %c3_59] : memref<2x22x22xf32, #tpu.memory_space<vmem>>, vector<1x22x16xf32>
      %399 = vector.shape_cast %398 : vector<1x22x16xf32> to vector<22x16xf32>
      %c52 = arith.constant 52 : index
      %400 = memref.load %arg2[%c52] : memref<99xf32, #tpu.memory_space<smem>>
      %401 = vector.extract_strided_slice %399 {offsets = [0, 0], sizes = [16, 16], strides = [1, 1]} : vector<22x16xf32> to vector<16x16xf32>
      %402 = vector.broadcast %400 : f32 to vector<16x16xf32>
      %403 = arith.mulf %402, %401 : vector<16x16xf32>
      %404 = arith.addf %397, %403 : vector<16x16xf32>
      %c59 = arith.constant 59 : index
      %405 = memref.load %arg2[%c59] : memref<99xf32, #tpu.memory_space<smem>>
      %406 = vector.extract_strided_slice %399 {offsets = [1, 0], sizes = [16, 16], strides = [1, 1]} : vector<22x16xf32> to vector<16x16xf32>
      %407 = vector.broadcast %405 : f32 to vector<16x16xf32>
      %408 = arith.mulf %407, %406 : vector<16x16xf32>
      %409 = arith.addf %404, %408 : vector<16x16xf32>
      %c66 = arith.constant 66 : index
      %410 = memref.load %arg2[%c66] : memref<99xf32, #tpu.memory_space<smem>>
      %411 = vector.extract_strided_slice %399 {offsets = [2, 0], sizes = [16, 16], strides = [1, 1]} : vector<22x16xf32> to vector<16x16xf32>
      %412 = vector.broadcast %410 : f32 to vector<16x16xf32>
      %413 = arith.mulf %412, %411 : vector<16x16xf32>
      %414 = arith.addf %409, %413 : vector<16x16xf32>
      %c73 = arith.constant 73 : index
      %415 = memref.load %arg2[%c73] : memref<99xf32, #tpu.memory_space<smem>>
      %416 = vector.extract_strided_slice %399 {offsets = [3, 0], sizes = [16, 16], strides = [1, 1]} : vector<22x16xf32> to vector<16x16xf32>
      %417 = vector.broadcast %415 : f32 to vector<16x16xf32>
      %418 = arith.mulf %417, %416 : vector<16x16xf32>
      %419 = arith.addf %414, %418 : vector<16x16xf32>
      %c80 = arith.constant 80 : index
      %420 = memref.load %arg2[%c80] : memref<99xf32, #tpu.memory_space<smem>>
      %421 = vector.extract_strided_slice %399 {offsets = [4, 0], sizes = [16, 16], strides = [1, 1]} : vector<22x16xf32> to vector<16x16xf32>
      %422 = vector.broadcast %420 : f32 to vector<16x16xf32>
      %423 = arith.mulf %422, %421 : vector<16x16xf32>
      %424 = arith.addf %419, %423 : vector<16x16xf32>
      %c87 = arith.constant 87 : index
      %425 = memref.load %arg2[%c87] : memref<99xf32, #tpu.memory_space<smem>>
      %426 = vector.extract_strided_slice %399 {offsets = [5, 0], sizes = [16, 16], strides = [1, 1]} : vector<22x16xf32> to vector<16x16xf32>
      %427 = vector.broadcast %425 : f32 to vector<16x16xf32>
      %428 = arith.mulf %427, %426 : vector<16x16xf32>
      %429 = arith.addf %424, %428 : vector<16x16xf32>
      %c94 = arith.constant 94 : index
      %430 = memref.load %arg2[%c94] : memref<99xf32, #tpu.memory_space<smem>>
      %431 = vector.extract_strided_slice %399 {offsets = [6, 0], sizes = [16, 16], strides = [1, 1]} : vector<22x16xf32> to vector<16x16xf32>
      %432 = vector.broadcast %430 : f32 to vector<16x16xf32>
      %433 = arith.mulf %432, %431 : vector<16x16xf32>
      %434 = arith.addf %429, %433 : vector<16x16xf32>
      %c1_60 = arith.constant 1 : index
      %c0_61 = arith.constant 0 : index
      %c4_62 = arith.constant 4 : index
      %435 = vector.load %arg7[%c1_60, %c0_61, %c4_62] : memref<2x22x22xf32, #tpu.memory_space<vmem>>, vector<1x22x16xf32>
      %436 = vector.shape_cast %435 : vector<1x22x16xf32> to vector<22x16xf32>
      %c53 = arith.constant 53 : index
      %437 = memref.load %arg2[%c53] : memref<99xf32, #tpu.memory_space<smem>>
      %438 = vector.extract_strided_slice %436 {offsets = [0, 0], sizes = [16, 16], strides = [1, 1]} : vector<22x16xf32> to vector<16x16xf32>
      %439 = vector.broadcast %437 : f32 to vector<16x16xf32>
      %440 = arith.mulf %439, %438 : vector<16x16xf32>
      %441 = arith.addf %434, %440 : vector<16x16xf32>
      %c60 = arith.constant 60 : index
      %442 = memref.load %arg2[%c60] : memref<99xf32, #tpu.memory_space<smem>>
      %443 = vector.extract_strided_slice %436 {offsets = [1, 0], sizes = [16, 16], strides = [1, 1]} : vector<22x16xf32> to vector<16x16xf32>
      %444 = vector.broadcast %442 : f32 to vector<16x16xf32>
      %445 = arith.mulf %444, %443 : vector<16x16xf32>
      %446 = arith.addf %441, %445 : vector<16x16xf32>
      %c67 = arith.constant 67 : index
      %447 = memref.load %arg2[%c67] : memref<99xf32, #tpu.memory_space<smem>>
      %448 = vector.extract_strided_slice %436 {offsets = [2, 0], sizes = [16, 16], strides = [1, 1]} : vector<22x16xf32> to vector<16x16xf32>
      %449 = vector.broadcast %447 : f32 to vector<16x16xf32>
      %450 = arith.mulf %449, %448 : vector<16x16xf32>
      %451 = arith.addf %446, %450 : vector<16x16xf32>
      %c74 = arith.constant 74 : index
      %452 = memref.load %arg2[%c74] : memref<99xf32, #tpu.memory_space<smem>>
      %453 = vector.extract_strided_slice %436 {offsets = [3, 0], sizes = [16, 16], strides = [1, 1]} : vector<22x16xf32> to vector<16x16xf32>
      %454 = vector.broadcast %452 : f32 to vector<16x16xf32>
      %455 = arith.mulf %454, %453 : vector<16x16xf32>
      %456 = arith.addf %451, %455 : vector<16x16xf32>
      %c81 = arith.constant 81 : index
      %457 = memref.load %arg2[%c81] : memref<99xf32, #tpu.memory_space<smem>>
      %458 = vector.extract_strided_slice %436 {offsets = [4, 0], sizes = [16, 16], strides = [1, 1]} : vector<22x16xf32> to vector<16x16xf32>
      %459 = vector.broadcast %457 : f32 to vector<16x16xf32>
      %460 = arith.mulf %459, %458 : vector<16x16xf32>
      %461 = arith.addf %456, %460 : vector<16x16xf32>
      %c88 = arith.constant 88 : index
      %462 = memref.load %arg2[%c88] : memref<99xf32, #tpu.memory_space<smem>>
      %463 = vector.extract_strided_slice %436 {offsets = [5, 0], sizes = [16, 16], strides = [1, 1]} : vector<22x16xf32> to vector<16x16xf32>
      %464 = vector.broadcast %462 : f32 to vector<16x16xf32>
      %465 = arith.mulf %464, %463 : vector<16x16xf32>
      %466 = arith.addf %461, %465 : vector<16x16xf32>
      %c95 = arith.constant 95 : index
      %467 = memref.load %arg2[%c95] : memref<99xf32, #tpu.memory_space<smem>>
      %468 = vector.extract_strided_slice %436 {offsets = [6, 0], sizes = [16, 16], strides = [1, 1]} : vector<22x16xf32> to vector<16x16xf32>
      %469 = vector.broadcast %467 : f32 to vector<16x16xf32>
      %470 = arith.mulf %469, %468 : vector<16x16xf32>
      %471 = arith.addf %466, %470 : vector<16x16xf32>
      %c1_63 = arith.constant 1 : index
      %c0_64 = arith.constant 0 : index
      %c5_65 = arith.constant 5 : index
      %472 = vector.load %arg7[%c1_63, %c0_64, %c5_65] : memref<2x22x22xf32, #tpu.memory_space<vmem>>, vector<1x22x16xf32>
      %473 = vector.shape_cast %472 : vector<1x22x16xf32> to vector<22x16xf32>
      %c54 = arith.constant 54 : index
      %474 = memref.load %arg2[%c54] : memref<99xf32, #tpu.memory_space<smem>>
      %475 = vector.extract_strided_slice %473 {offsets = [0, 0], sizes = [16, 16], strides = [1, 1]} : vector<22x16xf32> to vector<16x16xf32>
      %476 = vector.broadcast %474 : f32 to vector<16x16xf32>
      %477 = arith.mulf %476, %475 : vector<16x16xf32>
      %478 = arith.addf %471, %477 : vector<16x16xf32>
      %c61 = arith.constant 61 : index
      %479 = memref.load %arg2[%c61] : memref<99xf32, #tpu.memory_space<smem>>
      %480 = vector.extract_strided_slice %473 {offsets = [1, 0], sizes = [16, 16], strides = [1, 1]} : vector<22x16xf32> to vector<16x16xf32>
      %481 = vector.broadcast %479 : f32 to vector<16x16xf32>
      %482 = arith.mulf %481, %480 : vector<16x16xf32>
      %483 = arith.addf %478, %482 : vector<16x16xf32>
      %c68 = arith.constant 68 : index
      %484 = memref.load %arg2[%c68] : memref<99xf32, #tpu.memory_space<smem>>
      %485 = vector.extract_strided_slice %473 {offsets = [2, 0], sizes = [16, 16], strides = [1, 1]} : vector<22x16xf32> to vector<16x16xf32>
      %486 = vector.broadcast %484 : f32 to vector<16x16xf32>
      %487 = arith.mulf %486, %485 : vector<16x16xf32>
      %488 = arith.addf %483, %487 : vector<16x16xf32>
      %c75 = arith.constant 75 : index
      %489 = memref.load %arg2[%c75] : memref<99xf32, #tpu.memory_space<smem>>
      %490 = vector.extract_strided_slice %473 {offsets = [3, 0], sizes = [16, 16], strides = [1, 1]} : vector<22x16xf32> to vector<16x16xf32>
      %491 = vector.broadcast %489 : f32 to vector<16x16xf32>
      %492 = arith.mulf %491, %490 : vector<16x16xf32>
      %493 = arith.addf %488, %492 : vector<16x16xf32>
      %c82 = arith.constant 82 : index
      %494 = memref.load %arg2[%c82] : memref<99xf32, #tpu.memory_space<smem>>
      %495 = vector.extract_strided_slice %473 {offsets = [4, 0], sizes = [16, 16], strides = [1, 1]} : vector<22x16xf32> to vector<16x16xf32>
      %496 = vector.broadcast %494 : f32 to vector<16x16xf32>
      %497 = arith.mulf %496, %495 : vector<16x16xf32>
      %498 = arith.addf %493, %497 : vector<16x16xf32>
      %c89 = arith.constant 89 : index
      %499 = memref.load %arg2[%c89] : memref<99xf32, #tpu.memory_space<smem>>
      %500 = vector.extract_strided_slice %473 {offsets = [5, 0], sizes = [16, 16], strides = [1, 1]} : vector<22x16xf32> to vector<16x16xf32>
      %501 = vector.broadcast %499 : f32 to vector<16x16xf32>
      %502 = arith.mulf %501, %500 : vector<16x16xf32>
      %503 = arith.addf %498, %502 : vector<16x16xf32>
      %c96 = arith.constant 96 : index
      %504 = memref.load %arg2[%c96] : memref<99xf32, #tpu.memory_space<smem>>
      %505 = vector.extract_strided_slice %473 {offsets = [6, 0], sizes = [16, 16], strides = [1, 1]} : vector<22x16xf32> to vector<16x16xf32>
      %506 = vector.broadcast %504 : f32 to vector<16x16xf32>
      %507 = arith.mulf %506, %505 : vector<16x16xf32>
      %508 = arith.addf %503, %507 : vector<16x16xf32>
      %c1_66 = arith.constant 1 : index
      %c0_67 = arith.constant 0 : index
      %c6_68 = arith.constant 6 : index
      %509 = vector.load %arg7[%c1_66, %c0_67, %c6_68] : memref<2x22x22xf32, #tpu.memory_space<vmem>>, vector<1x22x16xf32>
      %510 = vector.shape_cast %509 : vector<1x22x16xf32> to vector<22x16xf32>
      %c55 = arith.constant 55 : index
      %511 = memref.load %arg2[%c55] : memref<99xf32, #tpu.memory_space<smem>>
      %512 = vector.extract_strided_slice %510 {offsets = [0, 0], sizes = [16, 16], strides = [1, 1]} : vector<22x16xf32> to vector<16x16xf32>
      %513 = vector.broadcast %511 : f32 to vector<16x16xf32>
      %514 = arith.mulf %513, %512 : vector<16x16xf32>
      %515 = arith.addf %508, %514 : vector<16x16xf32>
      %c62 = arith.constant 62 : index
      %516 = memref.load %arg2[%c62] : memref<99xf32, #tpu.memory_space<smem>>
      %517 = vector.extract_strided_slice %510 {offsets = [1, 0], sizes = [16, 16], strides = [1, 1]} : vector<22x16xf32> to vector<16x16xf32>
      %518 = vector.broadcast %516 : f32 to vector<16x16xf32>
      %519 = arith.mulf %518, %517 : vector<16x16xf32>
      %520 = arith.addf %515, %519 : vector<16x16xf32>
      %c69 = arith.constant 69 : index
      %521 = memref.load %arg2[%c69] : memref<99xf32, #tpu.memory_space<smem>>
      %522 = vector.extract_strided_slice %510 {offsets = [2, 0], sizes = [16, 16], strides = [1, 1]} : vector<22x16xf32> to vector<16x16xf32>
      %523 = vector.broadcast %521 : f32 to vector<16x16xf32>
      %524 = arith.mulf %523, %522 : vector<16x16xf32>
      %525 = arith.addf %520, %524 : vector<16x16xf32>
      %c76 = arith.constant 76 : index
      %526 = memref.load %arg2[%c76] : memref<99xf32, #tpu.memory_space<smem>>
      %527 = vector.extract_strided_slice %510 {offsets = [3, 0], sizes = [16, 16], strides = [1, 1]} : vector<22x16xf32> to vector<16x16xf32>
      %528 = vector.broadcast %526 : f32 to vector<16x16xf32>
      %529 = arith.mulf %528, %527 : vector<16x16xf32>
      %530 = arith.addf %525, %529 : vector<16x16xf32>
      %c83 = arith.constant 83 : index
      %531 = memref.load %arg2[%c83] : memref<99xf32, #tpu.memory_space<smem>>
      %532 = vector.extract_strided_slice %510 {offsets = [4, 0], sizes = [16, 16], strides = [1, 1]} : vector<22x16xf32> to vector<16x16xf32>
      %533 = vector.broadcast %531 : f32 to vector<16x16xf32>
      %534 = arith.mulf %533, %532 : vector<16x16xf32>
      %535 = arith.addf %530, %534 : vector<16x16xf32>
      %c90 = arith.constant 90 : index
      %536 = memref.load %arg2[%c90] : memref<99xf32, #tpu.memory_space<smem>>
      %537 = vector.extract_strided_slice %510 {offsets = [5, 0], sizes = [16, 16], strides = [1, 1]} : vector<22x16xf32> to vector<16x16xf32>
      %538 = vector.broadcast %536 : f32 to vector<16x16xf32>
      %539 = arith.mulf %538, %537 : vector<16x16xf32>
      %540 = arith.addf %535, %539 : vector<16x16xf32>
      %c97 = arith.constant 97 : index
      %541 = memref.load %arg2[%c97] : memref<99xf32, #tpu.memory_space<smem>>
      %542 = vector.extract_strided_slice %510 {offsets = [6, 0], sizes = [16, 16], strides = [1, 1]} : vector<22x16xf32> to vector<16x16xf32>
      %543 = vector.broadcast %541 : f32 to vector<16x16xf32>
      %544 = arith.mulf %543, %542 : vector<16x16xf32>
      %545 = arith.addf %540, %544 : vector<16x16xf32>
      %546 = arith.negf %545 : vector<16x16xf32>
      %547 = math.exp %546 : vector<16x16xf32>
      %cst_69 = arith.constant 1.000000e+00 : f32
      %548 = vector.broadcast %cst_69 : f32 to vector<16x16xf32>
      %549 = arith.addf %548, %547 : vector<16x16xf32>
      %550 = arith.divf %548, %549 : vector<16x16xf32>
      %c0_70 = arith.constant 0 : index
      %c0_71 = arith.constant 0 : index
      %c0_72 = arith.constant 0 : index
      %c0_73 = arith.constant 0 : index
      %551 = vector.load %arg4[%c0_70, %c0_71, %c0_72, %c0_73] : memref<1x1x16x16xf32, #tpu.memory_space<vmem>>, vector<1x1x16x16xf32>
      %552 = vector.shape_cast %551 : vector<1x1x16x16xf32> to vector<16x16xf32>
      %553 = vector.shape_cast %550 : vector<16x16xf32> to vector<1x1x16x16xf32>
      tpu.vector_store %arg4[%c0_70, %c0_71, %c0_72, %c0_73], %553 {strides = array<i32>} : memref<1x1x16x16xf32, #tpu.memory_space<vmem>>, vector<1x1x16x16xf32>,
    } else {
    }
    return
  }
  func.func @transform_0(%arg0: i32, %arg1: i32) -> i32 {
    %c0_i32 = arith.constant 0 : i32
    %c0_i32_0 = arith.constant 0 : i32
    return %c0_i32 : i32
  }
  func.func @transform_1(%arg0: i32, %arg1: i32) -> (i32, i32, i32, i32) {
    %c0_i32 = arith.constant 0 : i32
    %c0_i32_0 = arith.constant 0 : i32
    %c0_i32_1 = arith.constant 0 : i32
    return %arg0, %arg1, %c0_i32, %c0_i32_0 : i32, i32, i32, i32
  }
  func.func @transform_2(%arg0: i32, %arg1: i32) -> (i32, i32, i32, i32) {
    %c0_i32 = arith.constant 0 : i32
    %c0_i32_0 = arith.constant 0 : i32
    %c0_i32_1 = arith.constant 0 : i32
    %c0_i32_2 = arith.constant 0 : i32
    return %arg0, %c0_i32, %c0_i32_0, %c0_i32_1 : i32, i32, i32, i32
  }
}

</mosaic_0001>

<bundles_post_ra>
// kernel: spatial_attention.1
= control target key start
LH: loop header
LB: loop body
LE: loop exit
PB: predicated region body
PF: predicated region fallthrough
CT: control target
= control target key end

     0   :  { %7 = vsyncpa [#allocation8], 0  ;;  %s3794_s0 = inlined_call_operand.vmem [shape: f32[99], index: 0, kind: input, shape index: {}]   ;;  %s3795_s1 = inlined_call_operand.hbm [shape: f32[2,4,16,16], index: 1, kind: input, shape index: {}]   ;;  %s3796_s2 = inlined_call_operand.hbm [shape: f32[2,1,16,16], index: 2, kind: output, shape index: {}]  }
   0x1   :  { %8 = vsyncpa [#allocation6], 0 }
   0x2   :  { %10 = vsyncpa [#allocation6 + $0x1], 0 }
   0x3   :  { %11 = vsyncpa [#allocation7], 0 }
   0x4   :  { %13 = vsyncpa [#allocation7 + $0x1], 0  ;;  %s2736_s9 = smov 0   ;;  %s2738_s10 = smov 0  }
   0x5   :  { %s2740_s11 = smov 0   ;;  %s2742_s12 = smov 0  }
   0x6   :  { %s2744_s13 = smov 0   ;;  %s2746_s14 = smov 0  }
   0x7 LB: > { %s2355_s15 = sadd.s32 4294967295, %s2705_s14   ;;  %s2356_s16 = sadd.s32 4294967294, %s2705_s14   ;;  %s2705_s14 = sphi %s2746_s14, %s19_s14   ;;  %s2701_s13 = sphi %s2744_s13, %s3808_s13   ;;  %s2697_s12 = sphi %s2742_s12, %s3807_s12   ;;  %s2693_s11 = sphi %s2740_s11, %s3806_s11   ;;  %s2689_s10 = sphi %s2738_s10, %s3805_s10   ;;  %s2685_s9 = sphi %s2736_s9, %s3804_s9  }
   0x8   : > { %s61_s17 = sadd.s32 1, %s2693_s11  ;;  %p68_p0 = scmp.ne.s32.totalorder %s2693_s11, %s2689_s10 }
   0x9   : > { %p69_p1 = scmp.eq.s32.totalorder %s2705_s14, 0  ;;  %p74_p2 = scmp.ne.s32.totalorder %s2689_s10, %s2685_s9 }
   0xa   : > { %p2774_p3 = scmp.eq.s32.totalorder %s2355_s15, 0  ;;  %p98_p4 = scmp.eq.s32.totalorder %s2355_s15, 1 }
   0xb   : > { %p2778_p5 = por %p69_p1, %p68_p0  ;;  %p104_p6 = scmp.eq.s32.totalorder %s2356_s16, 1 }
   0xc   : > { %p2784_p7 = por %p2774_p3, %p74_p2  ;;  %p2788_p8 = por %p98_p4, %p68_p0 }
   0xd   : > { %p2792_p9 = por %p104_p6, %p74_p2  ;;  %p2357_p10 = scmp.ge.s32.totalorder %s2705_s14, 1 }
   0xe   : > { %p111_p11 = scmp.lt.s32.totalorder %s2705_s14, 3  ;;  %s123_s25 = sshll.u32 %s3794_s0, 4  ;;  %s124_s25 = int_to_ptr.vmem [resolvable:$true] %s123_s25 }
   0xf   : > { %p2359_p13 = scmp.ge.s32.totalorder %s2705_s14, 2  ;;  %p2495_p0 = scmp.lt.s32.totalorder %s2705_s14, 2 }
  0x10   : > { %p2801_p12 = pnand %p2357_p10, %p111_p11  ;;  %s31_s28 = sadd.s32 1, %s2701_s13 }
  0x11   : > { %p2811_p2 = pnand %p2495_p0, %p2778_p5  ;;  %p33_p6 = scmp.ge.s32.totalorder %s31_s28, 2 }
  0x12   : > { %p2482_p1 = pneg %p2801_p12  ;;  %s134_s29 = sand.u32 1, %s2693_s11  }
  0x13   : > { %s2707_s30 = smov [#allocation5]   ;;  %s3810_s28 = smov (%p33_p6, %s31_s28), 0 }
  0x14   : > { %p2483_p4 = pnand %p2482_p1, %p2774_p3  ;;  %s2360_s3 = sshll.u32 %s134_s29, 6 }
  0x15   : > { %s56_s4 = ssub.s32 %s2701_s13, %s3810_s28  ;;  %s2472_s5 = sshll.u32 %s2701_s13, 6 }
  0x16   : > { %2485 = dma.vmem_to_smem (!%p2483_p4), %s124_s25, 16, %s2707_s30, [#allocation8]  }
  0x17   : > { %p59_p10 = scmp.eq.s32.totalorder %s56_s4, 0  ;;  %s146_s8 = scalar_lea.hbm %s3795_s1, %s2472_s5 }
  0x18   : > { %s138_s15 = scalar_lea.vmem [#allocation9], %s2360_s3  ;;  %s147_s23 = sshll.u32 %s146_s8, 4  ;;  %s148_s23 = int_to_ptr.hbm [resolvable:$true] %s147_s23 }
  0x19   : > { %s149_s16 = sshll.u32 %s138_s15, 4  ;;  %s135_s24 = scalar_lea.sflag [#allocation6], %s134_s29  ;;  %s150_s16 = int_to_ptr.vmem [resolvable:$true] %s149_s16 }
  0x1a   : > { %s2830_s19 = scalar_select %p59_p10, %s2693_s11, %s61_s17  }
  0x1b   : > { %s2708_s25 = smov 128   ;;  %s2709_s30 = smov 8  }
  0x1c   : > { %2489 = dma.hbm_to_vmem [thread:$0]  (!%p2811_p2), %s148_s23, 1024, %s150_s16, %s135_s24, %s2708_s25, %s2708_s25, %s2709_s30  }
  0x1d   : > { %161 = sbr.rel (%p2801_p12) target bundleno = 776 (0x308), region = 28 }
  0x22   : > { %2672 = dma.done.wait (%p2774_p3), [#allocation8], 16  }
  0x23   : > { %2674 = vsyncadd (%p2774_p3), [#allocation8], 4294967280  ;;  %s2841_s17 = sand.u32 1, %s2689_s10  }
  0x24   : > { %s2365_s29 = sshll.u32 %s2841_s17, 6  ;;  %s169_s3 = scalar_lea.sflag [#allocation6], %s2841_s17 }
  0x25   : > { %s172_s4 = scalar_lea.vmem [#allocation9], %s2365_s29 }
  0x26   : > { %2676 = dma.done.wait (%p2784_p7), %s169_s3, 1024  }
  0x27   : > { %2678 = vsyncadd (%p2784_p7), %s169_s3, 4294966272 }
  0x28   : > { %178 = sfence }
  0x29   : > { %vm200_vm0 = vcmask 130048   ;;  %v213_v0 = vld [vmem:[%s172_s4] sm:$0xff]  ;;  %v215_v1 = vld [vmem:[%s172_s4 + $0x10] sm:$0xff]  ;;  %v2710_v3 = vmov -inf   ;;  %v214_v12 = vld [vmem:[%s172_s4 + $0x8] sm:$0xff]  ;;  %v2711_v30 = vmov 0.0  }
  0x2a   : > { %v217_v2 = vld [vmem:[%s172_s4 + $0x20] sm:$0xff]  ;;  %201 = vst.msk [vmem:[#allocation2] sm:$0xff] %vm200_vm0, %v2710_v3  ;;  %v219_v4 = vld [vmem:[%s172_s4 + $0x30] sm:$0xff]  ;;  %v224_v5 = vsel %vm200_vm0, %v213_v0, -inf  ;;  %v225_v6 = vsel %vm200_vm0, %v215_v1, -inf  ;;  %v244_v8 = vsel %vm200_vm0, %v213_v0, 0.0 }
  0x2b   : > { %v226_v7 = vsel %vm200_vm0, %v217_v2, -inf  ;;  %v228_v10 = vsel %vm200_vm0, %v219_v4, -inf  ;;  %v245_v11 = vsel %vm200_vm0, %v215_v1, 0.0  ;;  %202 = vst.msk [vmem:[#allocation2 + $0x8] sm:$0xff] %vm200_vm0, %v2710_v3  ;;  %v216_v13 = vld [vmem:[%s172_s4 + $0x18] sm:$0xff]  ;;  %v218_v14 = vld [vmem:[%s172_s4 + $0x28] sm:$0xff] }
  0x2c   : > { %v227_v9 = vmax.f32 %v224_v5, %v226_v7  ;;  %v229_v15 = vmax.f32 %v225_v6, %v228_v10  ;;  %v220_v16 = vld [vmem:[%s172_s4 + $0x38] sm:$0xff]  ;;  %v231_v17 = vsel %vm200_vm0, %v214_v12, -inf  ;;  %v232_v18 = vsel %vm200_vm0, %v216_v13, -inf  ;;  %203 = vst.msk [vmem:[#allocation3] sm:$0xff] %vm200_vm0, %v2711_v30  ;;  %s2712_s18 = smov 3   ;;  %s2381_s20 = sld [smem:[#allocation5 + $0x2]] }
  0x2d   : > { %v233_v19 = vsel %vm200_vm0, %v218_v14, -inf  ;;  %v235_v21 = vsel %vm200_vm0, %v220_v16, -inf  ;;  %v251_v22 = vsel %vm200_vm0, %v214_v12, 0.0  ;;  %v252_v23 = vsel %vm200_vm0, %v216_v13, 0.0  ;;  %204 = vst.msk [vmem:[#allocation3 + $0x8] sm:$0xff] %vm200_vm0, %v2711_v30  ;;  %s2374_s26 = sld [smem:[#allocation5 + $0x1]] }
  0x2e   : > { %v234_v20 = vmax.f32 %v231_v17, %v233_v19  ;;  %v230_v24 = vmax.f32 %v227_v9, %v229_v15  ;;  %v236_v25 = vmax.f32 %v232_v18, %v235_v21  ;;  %v253_v26 = vadd.f32 %v252_v23, %v251_v22  ;;  %s2874_s27 = sld [smem:[#allocation5 + $0x3]]  ;;  %s2713_s6 = smov 126  }
  0x2f   : > { %v246_v27 = vadd.f32 %v245_v11, %v244_v8  ;;  %v247_v28 = vsel %vm200_vm0, %v217_v2, 0.0  ;;  %vm205_vm1 = vcmask 179200   ;;  %v249_v33 = vsel %vm200_vm0, %v219_v4, 0.0  ;;  %s2375_s5 = sld [smem:[#allocation5 + $0x8]]  ;;  %s2714_s7 = smov 127  }
  0x30   : > { %v237_v29 = vmax.f32 %v234_v20, %v236_v25  ;;  %206 = vst.msk [vmem:[#allocation4] sm:$0xff] %vm205_vm1, %v2711_v30  ;;  %v254_v44 = vsel %vm200_vm0, %v218_v14, 0.0  ;;  %v256_v46 = vsel %vm200_vm0, %v220_v16, 0.0  ;;  %vm208_vm2 = vcmask 177152   ;;  %s2883_s8 = sld [smem:[#allocation5 + $0x4]]  ;;  %s2715_s16 = smov 125  }
  0x31   : > { %v221_v31 = vld [vmem:[#allocation2] sm:$0xff]  ;;  %v248_v32 = vadd.f32 %v247_v28, %v246_v27  ;;  %207 = vst.msk [vmem:[#allocation4 + $0x8] sm:$0xff] %vm205_vm1, %v2711_v30  ;;  %v255_v45 = vadd.f32 %v254_v44, %v253_v26  ;;  %vm275_vm3 = vcmask 154648   ;;  %s2376_s15 = sld [smem:[#allocation5 + $0xf]]  ;;  %vm312_vm4 = vcmask 1046528   ;;  %s2716_s25 = smov 124  }
  0x32   : > { %v238_v34 = vmax.f32 %v221_v31, %v230_v24  ;;  %v222_v35 = vld [vmem:[#allocation2 + $0x8] sm:$0xff]  ;;  %210 = vst.msk [vmem:[#allocation4 + $0x18] sm:$0xff] %vm205_vm1, %v2711_v30  ;;  %v553_v53 = vstv %s2381_s20  ;;  %s2377_s23 = sld [smem:[#allocation5 + $0x16]]  ;;  %vm330_vm5 = vcmask 1045504   ;;  %vm348_vm6 = vcmask 1044480  }
  0x33   : > { %v239_v36 = vmax.f32 %v222_v35, %v237_v29  ;;  %v250_v37 = vadd.f32 %v249_v33, %v248_v32  ;;  %v242_v38 = vld [vmem:[#allocation3] sm:$0xff]  ;;  %211 = vst.msk [vmem:[#allocation4 + $0x20] sm:$0xff] %vm205_vm1, %v2711_v30  ;;  %v257_v47 = vadd.f32 %v256_v46, %v255_v45  ;;  %v413_v54 = vstv %s2374_s26  ;;  %s2378_s24 = sld [smem:[#allocation5 + $0x1d]] }
  0x34   : > { %240 = vst.msk [vmem:[#allocation2] sm:$0xff] %vm200_vm0, %v238_v34  ;;  %v243_v48 = vld [vmem:[#allocation3 + $0x8] sm:$0xff]  ;;  %v693_v60 = vstv %s2874_s27  ;;  %s2379_s30 = sld [smem:[#allocation5 + $0x24]]  ;;  %vm366_vm7 = vcmask 1043456   ;;  %vm384_vm8 = vcmask 1042432   ;;  %vm402_vm9 = vcmask 1041408  }
  0x35   : > { %241 = vst.msk [vmem:[#allocation2 + $0x8] sm:$0xff] %vm200_vm0, %v239_v36  ;;  %v258_v39 = vadd.f32 %v250_v37, %v242_v38  ;;  %v259_v49 = vadd.f32 %v257_v47, %v243_v48  ;;  %v427_v0 = vstv %s2375_s5  ;;  %s2380_s29 = sld [smem:[#allocation5 + $0x2b]] }
  0x36   : > { %209 = vst.msk [vmem:[#allocation4 + $0x10] sm:$0x3f] %vm208_vm2, %v2711_v30  ;;  %v833_v3 = vstv %s2883_s8  ;;  %s2382_s3 = sld [smem:[#allocation5 + $0x9]] }
  0x37   : > { %260 = vst.msk [vmem:[#allocation3] sm:$0xff] %vm200_vm0, %v258_v39  ;;  %v448_v9 = vstv %s2376_s15  ;;  %s2383_s4 = sld [smem:[#allocation5 + $0x10]] }
  0x38   : > { %261 = vst.msk [vmem:[#allocation3 + $0x8] sm:$0xff] %vm200_vm0, %v259_v49  ;;  %v469_v18 = vstv %s2377_s23  ;;  %s2385_s20 = sld [smem:[#allocation5 + $0x1e]] }
  0x39   : > { %212 = vst.msk [vmem:[#allocation4 + $0x28] sm:$0x3f] %vm208_vm2, %v2711_v30  ;;  %v490_v19 = vstv %s2378_s24  ;;  %s2386_s26 = sld [smem:[#allocation5 + $0x25]] }
  0x3a   : > { %v511_v33 = vstv %s2379_s30  ;;  %s2387_s27 = sld [smem:[#allocation5 + $0x2c]] }
  0x3b   : > { %v265_v40 = vld [vmem:[#allocation2] sm:$0xff]  ;;  %v532_v45 = vstv %s2380_s29  ;;  %s2390_s5 = sld [smem:[#allocation5 + $0x11]] }
  0x3c   : > { %269 = vrot.lane.b32.xlu0 %v265_v40, %s2712_s18  ;;  %v266_v41 = vld [vmem:[#allocation2 + $0x8] sm:$0xff]  ;;  %v567_v46 = vstv %s2382_s3  ;;  %s2389_s8 = sld [smem:[#allocation5 + $0xa]] }
  0x3d   : > { %s2391_s15 = sld [smem:[#allocation5 + $0x18]] }
  0x3e   : > { %v278_v42 = vld [vmem:[#allocation3] sm:$0xff]  ;;  %s2393_s23 = sld [smem:[#allocation5 + $0x26]] }
  0x3f   : > { %v280_v43 = vmul.f32 0.25, %v278_v42  ;;  %v279_v50 = vld [vmem:[#allocation3 + $0x8] sm:$0xff]  ;;  %s2392_s24 = sld [smem:[#allocation5 + $0x1f]] }
  0x40   : > { %v281_v51 = vmul.f32 0.25, %v279_v50  ;;  %s2394_s30 = sld [smem:[#allocation5 + $0x2d]] }
  0x41   : > { %284 = vrot.lane.b32.xlu1 %v280_v43, %s2712_s18  ;;  %s2396_s29 = sld [smem:[#allocation5 + $0xb]] }
  0x42   : > { %s2368_s3 = sld [smem:[#allocation5 + $0x7]] }
  0x44   : > { %271 = vrot.lane.b32.xlu0 %v266_v41, %s2712_s18 }
  0x49   : > { %286 = vrot.lane.b32.xlu1 %v281_v51, %s2712_s18  ;;  %s2384_s18 = sld [smem:[#allocation5 + $0x17]] }
  0xae   : > { %v270_v52 = vpop.permute.xlu0 %269 }
  0xaf   : > { %276 = vst.msk [vmem:[#allocation4 + $0x3] sm:$0xff] %vm275_vm3, %v270_v52 }
  0xb6   : > { %v2876_v55 = vld [vmem:[#allocation4] sm:$0xff]  ;;  %v272_v56 = vpop.permute.xlu0 %271 }
  0xb7   : > { %277 = vst.msk [vmem:[#allocation4 + $0xb] sm:$0xff] %vm275_vm3, %v272_v56  ;;  %v554_v57 = vmul.f32 %v553_v53, %v2876_v55  ;;  %v414_v58 = vmul.f32 %v413_v54, %v2876_v55  ;;  %v428_v2 = vmul.f32 %v427_v0, %v2876_v55  ;;  %v834_v7 = vmul.f32 %v833_v3, %v2876_v55 }
  0xb8   : > { %v694_v8 = vmul.f32 %v693_v60, %v2876_v55  ;;  %v470_v24 = vmul.f32 %v469_v18, %v2876_v55  ;;  %v491_v25 = vmul.f32 %v490_v19, %v2876_v55  ;;  %v449_v26 = vmul.f32 %v448_v9, %v2876_v55 }
  0xb9   : > { %558 = vrot.lane.b32.xlu0 %v554_v57, %s2713_s6  ;;  %418 = vrot.lane.b32.xlu2 %v414_v58, %s2714_s7  ;;  %v434_v6 = vrot.slane %v428_v2, 1  ;;  %v533_v52 = vmul.f32 %v532_v45, %v2876_v55 }
  0xba   : > { %v476_v29 = vrot.slane %v470_v24, 3  ;;  %v497_v30 = vrot.slane %v491_v25, 4  ;;  %v455_v31 = vrot.slane %v449_v26, 2  ;;  %v651_v25 = vstv %s2386_s26  ;;  %s2370_s26 = sld [smem:[#allocation5 + $0x15]] }
  0xbb   : > { %v539_v58 = vrot.slane %v533_v52, 6  ;;  %v672_v26 = vstv %s2387_s27  ;;  %s3058_s27 = sld [smem:[#allocation5 + $0x62]] }
  0xbe   : > { %v2885_v59 = vld [vmem:[#allocation4 + $0x8] sm:$0xff]  ;;  %v2897_v5 = vld [vmem:[#allocation4 + $0x10] sm:$0x3f] }
  0xbf   : > { %v415_v61 = vmul.f32 %v413_v54, %v2885_v59  ;;  %v695_v62 = vmul.f32 %v693_v60, %v2885_v59  ;;  %v555_v63 = vmul.f32 %v553_v53, %v2885_v59  ;;  %v429_v1 = vmul.f32 %v427_v0, %v2885_v59 }
  0xc0   : > { %v430_v11 = vmul.f32 %v427_v0, %v2897_v5  ;;  %v450_v12 = vmul.f32 %v448_v9, %v2885_v59  ;;  %v451_v13 = vmul.f32 %v448_v9, %v2897_v5  ;;  %v835_v17 = vmul.f32 %v833_v3, %v2885_v59 }
  0xc1   : > { %700 = vrot.lane.b32.xlu0 %v695_v62, %s2715_s16  ;;  %560 = vrot.lane.b32.xlu1 %v555_v63, %s2713_s6  ;;  %v435_v4 = vrot.slane %v429_v1, 1  ;;  %v471_v22 = vmul.f32 %v469_v18, %v2885_v59  ;;  %v492_v23 = vmul.f32 %v490_v19, %v2885_v59  ;;  %v493_v32 = vmul.f32 %v490_v19, %v2897_v5 }
  0xc2   : > { %420 = vrot.lane.b32.xlu2 %v415_v61, %s2714_s7  ;;  %v437_v14 = vrot.slane %v430_v11, 1  ;;  %v456_v15 = vrot.slane %v450_v12, 2  ;;  %v458_v16 = vrot.slane %v451_v13, 2  ;;  %v513_v36 = vmul.f32 %v511_v33, %v2885_v59 }
  0xc3   : > { %v436_v10 = vsel %vm312_vm4, %v434_v6, %v435_v4  ;;  %v477_v27 = vrot.slane %v471_v22, 3  ;;  %v498_v28 = vrot.slane %v492_v23, 4  ;;  %v514_v37 = vmul.f32 %v511_v33, %v2897_v5 }
  0xc4   : > { %v438_v20 = vsel %vm312_vm4, %v435_v4, %v437_v14  ;;  %v459_v21 = vsel %vm330_vm5, %v456_v15, %v458_v16  ;;  %v457_v38 = vsel %vm330_vm5, %v455_v31, %v456_v15  ;;  %v472_v39 = vmul.f32 %v469_v18, %v2897_v5 }
  0xc5   : > { %v478_v34 = vsel %vm348_vm6, %v476_v29, %v477_v27  ;;  %v499_v35 = vsel %vm366_vm7, %v497_v30, %v498_v28  ;;  %v500_v40 = vrot.slane %v493_v32, 4  ;;  %v519_v41 = vrot.slane %v513_v36, 5 }
  0xc6   : > { %v521_v42 = vrot.slane %v514_v37, 5  ;;  %v479_v43 = vrot.slane %v472_v39, 3  ;;  %v534_v48 = vmul.f32 %v532_v45, %v2885_v59  ;;  %v569_v49 = vmul.f32 %v567_v46, %v2885_v59 }
  0xc7   : > { %v501_v44 = vsel %vm366_vm7, %v498_v28, %v500_v40  ;;  %v570_v50 = vmul.f32 %v567_v46, %v2897_v5  ;;  %v512_v53 = vmul.f32 %v511_v33, %v2876_v55  ;;  %v588_v61 = vstv %s2383_s4  ;;  %s3042_s4 = sld [smem:[#allocation5]] }
  0xc8   : > { %v522_v47 = vsel %vm384_vm8, %v519_v41, %v521_v42  ;;  %v480_v51 = vsel %vm348_vm6, %v477_v27, %v479_v43  ;;  %v540_v54 = vrot.slane %v534_v48, 6  ;;  %v575_v56 = vrot.slane %v569_v49, 1 }
  0xc9   : > { %838 = vrot.lane.b32.xlu1 %v834_v7, %s2716_s25  ;;  %439 = vrot.lane.b32.xlu0 %v436_v10, %s2714_s7  ;;  %v577_v57 = vrot.slane %v570_v50, 1  ;;  %v518_v60 = vrot.slane %v512_v53, 5  ;;  %v609_v62 = vstv %s2384_s18  ;;  %v2943_v1 = vmul.f32 %v588_v61, %v2885_v59  ;;  %s2397_s18 = sld [smem:[#allocation5 + $0x12]] }
  0xca   : > { %698 = vrot.lane.b32.xlu2 %v694_v8, %s2715_s16  ;;  %v541_v63 = vsel %vm402_vm9, %v539_v58, %v540_v54  ;;  %v611_v2 = vmul.f32 %v609_v62, %v2885_v59  ;;  %v535_v4 = vmul.f32 %v532_v45, %v2897_v5  ;;  %v589_v6 = vmul.f32 %v588_v61, %v2876_v55 }
  0xcb   : > { %v578_v0 = vsel %vm312_vm4, %v575_v56, %v577_v57  ;;  %v520_v3 = vsel %vm384_vm8, %v518_v60, %v519_v41  ;;  %v610_v7 = vmul.f32 %v609_v62, %v2876_v55  ;;  %v596_v8 = vrot.slane %v2943_v1, 2 }
  0xcc   : > { %v617_v9 = vrot.slane %v611_v2, 3  ;;  %v542_v10 = vrot.slane %v535_v4, 6  ;;  %v595_v11 = vrot.slane %v589_v6, 2  ;;  %v612_v13 = vmul.f32 %v609_v62, %v2897_v5 }
  0xcd   : > { %v616_v12 = vrot.slane %v610_v7, 3  ;;  %v630_v14 = vstv %s2385_s20  ;;  %v2970_v29 = vmul.f32 %v651_v25, %v2885_v59  ;;  %v674_v30 = vmul.f32 %v672_v26, %v2885_v59  ;;  %s3045_s20 = sld [smem:[#allocation5 + $0xe]] }
  0xce   : > { %v597_v15 = vsel %vm330_vm5, %v595_v11, %v596_v8  ;;  %v633_v18 = vmul.f32 %v630_v14, %v2897_v5  ;;  %v543_v19 = vsel %vm402_vm9, %v540_v54, %v542_v10  ;;  %v591_v32 = vmul.f32 %v588_v61, %v2897_v5 }
  0xcf   : > { %v618_v16 = vsel %vm348_vm6, %v616_v12, %v617_v9  ;;  %v652_v33 = vmul.f32 %v651_v25, %v2876_v55  ;;  %v659_v36 = vrot.slane %v2970_v29, 5  ;;  %v680_v37 = vrot.slane %v674_v30, 6 }
  0xd0   : > { %v640_v23 = vrot.slane %v633_v18, 4  ;;  %v728_v41 = vstv %s2390_s5  ;;  %v631_v48 = vmul.f32 %v630_v14, %v2876_v55  ;;  %v707_v53 = vstv %s2389_s8  ;;  %s3062_s5 = sld [smem:[#allocation5 + $0x1c]] }
  0xd1   : > { %441 = vrot.lane.b32.xlu1 %v438_v20, %s2714_s7  ;;  %462 = vrot.lane.b32.xlu0 %v459_v21, %s2714_s7  ;;  %v568_v20 = vmul.f32 %v567_v46, %v2876_v55  ;;  %v619_v21 = vrot.slane %v612_v13, 3  ;;  %v658_v39 = vrot.slane %v652_v33, 5  ;;  %v730_v45 = vmul.f32 %v728_v41, %v2885_v59  ;;  %s3070_s8 = sld [smem:[#allocation5 + $0x19]] }
  0xd2   : > { %840 = vrot.lane.b32.xlu2 %v835_v17, %s2716_s25  ;;  %v2958_v17 = vmul.f32 %v630_v14, %v2885_v59  ;;  %v637_v54 = vrot.slane %v631_v48, 4  ;;  %v749_v57 = vstv %s2391_s15  ;;  %v708_v1 = vmul.f32 %v707_v53, %v2876_v55  ;;  %s3074_s15 = sld [smem:[#allocation5 + $0x20]] }
  0xd3   : > { %v574_v24 = vrot.slane %v568_v20, 1  ;;  %v620_v27 = vsel %vm348_vm6, %v617_v9, %v619_v21  ;;  %v660_v42 = vsel %vm384_vm8, %v658_v39, %v659_v36  ;;  %v2997_v61 = vmul.f32 %v749_v57, %v2885_v59 }
  0xd4   : > { %v638_v22 = vrot.slane %v2958_v17, 4  ;;  %v752_v62 = vmul.f32 %v749_v57, %v2897_v5  ;;  %v714_v7 = vrot.slane %v708_v1, 1  ;;  %v791_v9 = vstv %s2393_s23  ;;  %s3091_s23 = sld [smem:[#allocation5 + $0x23]] }
  0xd5   : > { %v576_v31 = vsel %vm312_vm4, %v574_v24, %v575_v56  ;;  %v709_v56 = vmul.f32 %v707_v53, %v2885_v59  ;;  %v3011_v12 = vmul.f32 %v791_v9, %v2885_v59  ;;  %v710_v14 = vmul.f32 %v707_v53, %v2897_v5 }
  0xd6   : > { %v641_v28 = vsel %vm366_vm7, %v638_v22, %v640_v23  ;;  %v759_v4 = vrot.slane %v752_v62, 3  ;;  %v3023_v23 = vstv %s2394_s30  ;;  %v750_v30 = vmul.f32 %v749_v57, %v2876_v55  ;;  %s3129_s30 = sld [smem:[#allocation5 + $0x2a]] }
  0xd7   : > { %v715_v2 = vrot.slane %v709_v56, 1  ;;  %v799_v18 = vrot.slane %v3011_v12, 5  ;;  %v868_v57 = vstv %s2397_s18  ;;  %s2404_s18 = sld [smem:[#allocation5 + $0x13]] }
  0xd8   : > { %v871_v62 = vmul.f32 %v868_v57, %v2897_v5 }
  0xd9   : > { %481 = vrot.lane.b32.xlu1 %v478_v34, %s2714_s7  ;;  %502 = vrot.lane.b32.xlu0 %v499_v35, %s2714_s7  ;;  %v673_v34 = vmul.f32 %v672_v26, %v2876_v55  ;;  %v285_v35 = vpop.permute.xlu1 %284  ;;  %v716_v10 = vsel %vm312_vm4, %v714_v7, %v715_v2 }
  0xda   : > { %460 = vrot.lane.b32.xlu2 %v457_v38, %s2714_s7  ;;  %291 = vst.msk [vmem:[#allocation4 + $0x1b] sm:$0xff] %vm275_vm3, %v285_v35  ;;  %v598_v38 = vrot.slane %v591_v32, 2 }
  0xdb   : > { %v679_v40 = vrot.slane %v673_v34, 6 }
  0xdc   : > { %v599_v46 = vsel %vm330_vm5, %v596_v8, %v598_v38  ;;  %v731_v8 = vmul.f32 %v728_v41, %v2897_v5  ;;  %v847_v38 = vstv %s2396_s29  ;;  %s3153_s29 = sld [smem:[#allocation5 + $0x2e]] }
  0xdd   : > { %v681_v43 = vsel %vm402_vm9, %v679_v40, %v680_v37 }
  0xde   : > { %v738_v17 = vrot.slane %v731_v8, 2  ;;  %v359_v8 = vstv %s3062_s5  ;;  %s2407_s5 = sld [smem:[#allocation5 + $0x28]] }
  0xe1   : > { %504 = vrot.lane.b32.xlu1 %v501_v44, %s2714_s7  ;;  %525 = vrot.lane.b32.xlu0 %v522_v47, %s2714_s7  ;;  %v675_v44 = vmul.f32 %v672_v26, %v2897_v5  ;;  %v729_v47 = vmul.f32 %v728_v41, %v2876_v55  ;;  %v287_v49 = vpop.permute.xlu1 %286  ;;  %v3029_v26 = vmul.f32 %v3023_v23, %v2885_v59 }
  0xe2   : > { %483 = vrot.lane.b32.xlu2 %v480_v51, %s2714_s7  ;;  %v736_v51 = vrot.slane %v730_v45, 2  ;;  %292 = vst.msk [vmem:[#allocation4 + $0x23] sm:$0xff] %vm275_vm3, %v287_v49  ;;  %v3052_v41 = vmul.f32 %v847_v38, %v2885_v59 }
  0xe3   : > { %v682_v50 = vrot.slane %v675_v44, 6  ;;  %v735_v52 = vrot.slane %v729_v47, 2  ;;  %v820_v33 = vrot.slane %v3029_v26, 6  ;;  %v848_v44 = vmul.f32 %v847_v38, %v2876_v55 }
  0xe4   : > { %v739_v21 = vsel %vm330_vm5, %v736_v51, %v738_v17  ;;  %v855_v48 = vrot.slane %v3052_v41, 1  ;;  %v878_v17 = vrot.slane %v871_v62, 2  ;;  %v869_v26 = vmul.f32 %v868_v57, %v2876_v55 }
  0xe5   : > { %v683_v58 = vsel %vm402_vm9, %v680_v37, %v682_v50  ;;  %v737_v60 = vsel %vm330_vm5, %v735_v52, %v736_v51  ;;  %v794_v37 = vmul.f32 %v791_v9, %v2897_v5  ;;  %v298_v50 = vstv %s3042_s4  ;;  %s2403_s4 = sld [smem:[#allocation5 + $0xc]] }
  0xe6   : > { %v854_v53 = vrot.slane %v848_v44, 1  ;;  %v299_v1 = vmul.f32 %v298_v50, %v2876_v55  ;;  %v362_v62 = vmul.f32 %v359_v8, %v2897_v5 }
  0xe7   : > { %v801_v45 = vrot.slane %v794_v37, 5 }
  0xe9   : > { %544 = vrot.lane.b32.xlu1 %v541_v63, %s2714_s7  ;;  %581 = vrot.lane.b32.xlu0 %v578_v0, %s2713_s6  ;;  %v639_v63 = vsel %vm366_vm7, %v637_v54, %v638_v22  ;;  %v654_v0 = vmul.f32 %v651_v25, %v2897_v5  ;;  %v770_v22 = vstv %s2392_s24  ;;  %v802_v56 = vsel %vm384_vm8, %v799_v18, %v801_v45  ;;  %s3111_s24 = sld [smem:[#allocation5 + $0x27]] }
  0xea   : > { %523 = vrot.lane.b32.xlu2 %v520_v3, %s2714_s7  ;;  %v757_v3 = vrot.slane %v2997_v61, 3  ;;  %v772_v25 = vmul.f32 %v770_v22, %v2885_v59  ;;  %v771_v29 = vmul.f32 %v770_v22, %v2876_v55  ;;  %v3079_v61 = vmul.f32 %v868_v57, %v2885_v59 }
  0xeb   : > { %v661_v6 = vrot.slane %v654_v0, 5  ;;  %v341_v0 = vstv %s2370_s26  ;;  %v377_v45 = vstv %s3091_s23  ;;  %s2717_s26 = smov 123   ;;  %s2410_s23 = sld [smem:[#allocation5 + $0xd]] }
  0xec   : > { %v760_v11 = vsel %vm348_vm6, %v757_v3, %v759_v4  ;;  %v778_v32 = vrot.slane %v772_v25, 4  ;;  %v777_v35 = vrot.slane %v771_v29, 4  ;;  %v889_v29 = vstv %s3070_s8  ;;  %s2408_s8 = sld [smem:[#allocation5 + $0x2f]] }
  0xed   : > { %v662_v13 = vsel %vm384_vm8, %v659_v36, %v661_v6  ;;  %v756_v36 = vrot.slane %v750_v30, 3  ;;  %v910_v30 = vstv %s3074_s15  ;;  %s3253_s15 = sld [smem:[#allocation5 + $0x6]] }
  0xee   : > { %v779_v39 = vsel %vm366_vm7, %v777_v35, %v778_v32  ;;  %v3118_v35 = vmul.f32 %v889_v29, %v2885_v59  ;;  %v911_v44 = vmul.f32 %v910_v30, %v2876_v55 }
  0xf1   : > { %600 = vrot.lane.b32.xlu1 %v597_v15, %s2713_s6  ;;  %621 = vrot.lane.b32.xlu0 %v618_v16, %s2713_s6  ;;  %v792_v15 = vmul.f32 %v791_v9, %v2876_v55  ;;  %v300_v9 = vmul.f32 %v298_v50, %v2885_v59 }
  0xf2   : > { %546 = vrot.lane.b32.xlu2 %v543_v19, %s2714_s7  ;;  %v717_v19 = vrot.slane %v710_v14, 1 }
  0xf3   : > { %v798_v20 = vrot.slane %v792_v15, 5  ;;  %v876_v15 = vrot.slane %v3079_v61, 2 }
  0xf5   : > { %v800_v24 = vsel %vm384_vm8, %v798_v20, %v799_v18  ;;  %v342_v20 = vmul.f32 %v341_v0, %v2876_v55 }
  0xf9   : > { %623 = vrot.lane.b32.xlu1 %v620_v27, %s2713_s6  ;;  %644 = vrot.lane.b32.xlu0 %v641_v28, %s2713_s6  ;;  %v815_v27 = vmul.f32 %v3023_v23, %v2897_v5  ;;  %v718_v28 = vsel %vm312_vm4, %v715_v2, %v717_v19 }
  0xfa   : > { %579 = vrot.lane.b32.xlu2 %v576_v31, %s2713_s6 }
  0xfb   : > { %v822_v34 = vrot.slane %v815_v27, 6 }
  0xfd   : > { %v823_v40 = vsel %vm402_vm9, %v820_v33, %v822_v34  ;;  %v879_v34 = vsel %vm330_vm5, %v876_v15, %v878_v17 }
 0x101   : > { %663 = vrot.lane.b32.xlu1 %v660_v42, %s2713_s6  ;;  %684 = vrot.lane.b32.xlu0 %v681_v43, %s2713_s6  ;;  %v758_v42 = vsel %vm348_vm6, %v756_v36, %v757_v3  ;;  %v773_v43 = vmul.f32 %v770_v22, %v2897_v5  ;;  %v301_v3 = vstv %s3058_s27  ;;  %v3121_v36 = vmul.f32 %v910_v30, %v2885_v59  ;;  %s2406_s27 = sld [smem:[#allocation5 + $0x21]] }
 0x102   : > { %602 = vrot.lane.b32.xlu2 %v599_v46, %s2713_s6  ;;  %v305_v46 = vstv %s2368_s3  ;;  %v302_v18 = vadd.f32 %v301_v3, %v299_v1  ;;  %v303_v27 = vadd.f32 %v301_v3, %v300_v9  ;;  %v917_v1 = vrot.slane %v911_v44, 4  ;;  %s3180_s3 = sld [smem:[#allocation5 + $0x5]] }
 0x103   : > { %v780_v49 = vrot.slane %v773_v43, 4  ;;  %v307_v51 = vmul.f32 %v305_v46, %v2885_v59  ;;  %v308_v52 = vmul.f32 %v305_v46, %v2897_v5  ;;  %v306_v54 = vmul.f32 %v305_v46, %v2876_v55 }
 0x104   : > { %v890_v43 = vmul.f32 %v889_v29, %v2876_v55  ;;  %v349_v46 = vrot.slane %v342_v20, 3  ;;  %v875_v3 = vrot.slane %v869_v26, 2  ;;  %v952_v44 = vstv %s3153_s29  ;;  %s2718_s29 = smov 122  }
 0x105   : > { %v781_v2 = vsel %vm366_vm7, %v778_v32, %v780_v49  ;;  %v314_v4 = vrot.slane %v307_v51, 1  ;;  %v316_v7 = vrot.slane %v308_v52, 1  ;;  %v313_v12 = vrot.slane %v306_v54, 1 }
 0x106   : > { %v360_v51 = vmul.f32 %v359_v8, %v2876_v55  ;;  %v918_v54 = vrot.slane %v3121_v36, 4  ;;  %v877_v17 = vsel %vm330_vm5, %v875_v3, %v876_v15  ;;  %v954_v26 = vmul.f32 %v952_v44, %v2885_v59 }
 0x107   : > { %v315_v22 = vsel %vm312_vm4, %v313_v12, %v314_v4  ;;  %v317_v25 = vsel %vm312_vm4, %v314_v4, %v316_v7  ;;  %v913_v4 = vmul.f32 %v910_v30, %v2897_v5 }
 0x108   : > { %v320_v37 = vadd.f32 %v315_v22, %v302_v18  ;;  %v919_v9 = vsel %vm366_vm7, %v917_v1, %v918_v54  ;;  %v892_v18 = vmul.f32 %v889_v29, %v2897_v5  ;;  %v367_v22 = vrot.slane %v360_v51, 4 }
 0x109   : > { %686 = vrot.lane.b32.xlu1 %v683_v58, %s2713_s6  ;;  %740 = vrot.lane.b32.xlu0 %v737_v60, %s2715_s16  ;;  %v856_v58 = vsel %vm312_vm4, %v854_v53, %v855_v48  ;;  %v850_v60 = vmul.f32 %v847_v38, %v2897_v5  ;;  %v897_v53 = vrot.slane %v3118_v35, 3  ;;  %v920_v29 = vrot.slane %v913_v4, 4 }
 0x10a   : > { %642 = vrot.lane.b32.xlu2 %v639_v63, %s2713_s6  ;;  %v323_v63 = vstv %s3045_s20  ;;  %v960_v4 = vrot.slane %v954_v26, 6  ;;  %s2405_s20 = sld [smem:[#allocation5 + $0x1a]] }
 0x10b   : > { %v325_v6 = vmul.f32 %v323_v63, %v2885_v59  ;;  %v857_v14 = vrot.slane %v850_v60, 1  ;;  %v324_v19 = vmul.f32 %v323_v63, %v2876_v55  ;;  %v361_v60 = vmul.f32 %v359_v8, %v2885_v59 }
 0x10d   : > { %v858_v32 = vsel %vm312_vm4, %v855_v48, %v857_v14  ;;  %v331_v38 = vrot.slane %v324_v19, 2  ;;  %v321_v48 = vadd.f32 %v317_v25, %v303_v27  ;;  %v368_v12 = vrot.slane %v361_v60, 4 }
 0x10e   : > { %v379_v14 = vmul.f32 %v377_v45, %v2885_v59  ;;  %v395_v19 = vstv %s3129_s30  ;;  %v953_v60 = vmul.f32 %v952_v44, %v2876_v55  ;;  %s2412_s30 = sld [smem:[#allocation5 + $0x1b]] }
 0x10f   : > { %v397_v36 = vmul.f32 %v395_v19, %v2885_v59 }
 0x110   : > { %v386_v35 = vrot.slane %v379_v14, 5 }
 0x111   : > { %719 = vrot.lane.b32.xlu1 %v716_v10, %s2715_s16  ;;  %763 = vrot.lane.b32.xlu0 %v760_v11, %s2715_s16  ;;  %v813_v11 = vmul.f32 %v3023_v23, %v2876_v55  ;;  %v332_v23 = vrot.slane %v325_v6, 2  ;;  %v931_v6 = vstv %s3111_s24  ;;  %v404_v51 = vrot.slane %v397_v36, 6  ;;  %s2411_s24 = sld [smem:[#allocation5 + $0x14]] }
 0x112   : > { %665 = vrot.lane.b32.xlu2 %v662_v13, %s2713_s6  ;;  %v934_v8 = vmul.f32 %v931_v6, %v2897_v5  ;;  %v932_v1 = vmul.f32 %v931_v6, %v2876_v55 }
 0x113   : > { %v3019_v16 = vpop.permute.xlu2 %418 }
 0x114   : > { %v938_v14 = vrot.slane %v932_v1, 5 }
 0x119   : > { %742 = vrot.lane.b32.xlu1 %v739_v21, %s2715_s16  ;;  %803 = vrot.lane.b32.xlu0 %v800_v24, %s2715_s16  ;;  %v3104_v21 = vmul.f32 %v341_v0, %v2885_v59  ;;  %v326_v24 = vmul.f32 %v323_v63, %v2897_v5 }
 0x11a   : > { %721 = vrot.lane.b32.xlu2 %v718_v28, %s2715_s16  ;;  %v819_v28 = vrot.slane %v813_v11, 6  ;;  %v3158_v11 = vmul.f32 %v931_v6, %v2885_v59 }
 0x11b   : > { %v334_v41 = vrot.slane %v326_v24, 2  ;;  %v380_v24 = vmul.f32 %v377_v45, %v2897_v5 }
 0x11c   : > { %v3039_v31 = vpop.permute.xlu2 %420  ;;  %v939_v30 = vrot.slane %v3158_v11, 5  ;;  %v959_v11 = vrot.slane %v953_v60, 6 }
 0x11d   : > { %v335_v57 = vsel %vm330_vm5, %v332_v23, %v334_v41  ;;  %v388_v41 = vrot.slane %v380_v24, 5 }
 0x11e   : > { %v961_v6 = vsel %vm402_vm9, %v959_v11, %v960_v4 }
 0x121   : > { %782 = vrot.lane.b32.xlu1 %v779_v39, %s2715_s16  ;;  %826 = vrot.lane.b32.xlu0 %v823_v40, %s2715_s16  ;;  %v350_v39 = vrot.slane %v3104_v21, 3  ;;  %v821_v40 = vsel %vm402_vm9, %v819_v28, %v820_v33  ;;  %v333_v33 = vsel %vm330_vm5, %v331_v38, %v332_v23  ;;  %v378_v21 = vmul.f32 %v377_v45, %v2876_v55 }
 0x122   : > { %761 = vrot.lane.b32.xlu2 %v758_v42, %s2715_s16  ;;  %v344_v42 = vmul.f32 %v341_v0, %v2897_v5  ;;  %v896_v0 = vrot.slane %v890_v43, 3  ;;  %v370_v23 = vrot.slane %v362_v62, 4 }
 0x124   : > { %v3064_v47 = vpop.permute.xlu2 %698  ;;  %v352_v63 = vrot.slane %v344_v42, 3  ;;  %v898_v7 = vsel %vm348_vm6, %v896_v0, %v897_v53  ;;  %v398_v42 = vmul.f32 %v395_v19, %v2897_v5  ;;  %v371_v43 = vsel %vm366_vm7, %v368_v12, %v370_v23 }
 0x126   : > { %v353_v25 = vsel %vm348_vm6, %v350_v39, %v352_v63  ;;  %v406_v62 = vrot.slane %v398_v42, 6  ;;  %v389_v63 = vsel %vm384_vm8, %v386_v35, %v388_v41 }
 0x129   : > { %805 = vrot.lane.b32.xlu1 %v802_v56, %s2715_s16  ;;  %859 = vrot.lane.b32.xlu0 %v856_v58, %s2716_s25  ;;  %v338_v56 = vadd.f32 %v333_v33, %v320_v37  ;;  %v351_v58 = vsel %vm348_vm6, %v349_v46, %v350_v39  ;;  %v899_v37 = vrot.slane %v892_v18, 3  ;;  %v385_v39 = vrot.slane %v378_v21, 5 }
 0x12a   : > { %784 = vrot.lane.b32.xlu2 %v781_v2, %s2715_s16  ;;  %v339_v2 = vadd.f32 %v335_v57, %v321_v48  ;;  %v921_v46 = vsel %vm366_vm7, %v918_v54, %v920_v29  ;;  %v940_v21 = vsel %vm384_vm8, %v938_v14, %v939_v30 }
 0x12b   : > { %v3094_v10 = vpop.permute.xlu0 %558  ;;  %v356_v20 = vadd.f32 %v351_v58, %v338_v56  ;;  %v387_v33 = vsel %vm384_vm8, %v385_v39, %v386_v35  ;;  %v900_v56 = vsel %vm348_vm6, %v897_v53, %v899_v37 }
 0x12c   : > { %v3098_v13 = vpop.permute.xlu2 %840  ;;  %v357_v61 = vadd.f32 %v353_v25, %v339_v2 }
 0x12e   : > { %v375_v45 = vadd.f32 %v371_v43, %v357_v61 }
 0x130   : > { %v393_v2 = vadd.f32 %v389_v63, %v375_v45 }
 0x131   : > { %861 = vrot.lane.b32.xlu1 %v858_v32, %s2716_s25  ;;  %882 = vrot.lane.b32.xlu0 %v879_v34, %s2716_s25  ;;  %v941_v32 = vrot.slane %v934_v8, 5  ;;  %v369_v34 = vsel %vm366_vm7, %v367_v22, %v368_v12  ;;  %v407_v8 = vsel %vm402_vm9, %v404_v51, %v406_v62  ;;  %v955_v22 = vmul.f32 %v952_v44, %v2897_v5 }
 0x132   : > { %824 = vrot.lane.b32.xlu2 %v821_v40, %s2715_s16  ;;  %v374_v38 = vadd.f32 %v369_v34, %v356_v20  ;;  %v396_v40 = vmul.f32 %v395_v19, %v2876_v55  ;;  %v411_v18 = vadd.f32 %v407_v8, %v393_v2 }
 0x133   : > { %v3136_v49 = vpop.permute.xlu1 %560  ;;  %v3138_v50 = vpop.permute.xlu0 %700  ;;  %v942_v48 = vsel %vm384_vm8, %v939_v30, %v941_v32  ;;  %v962_v37 = vrot.slane %v955_v22, 6 }
 0x134   : > { %v3143_v52 = vpop.permute.xlu2 %460  ;;  %v392_v58 = vadd.f32 %v387_v33, %v374_v38  ;;  %v403_v54 = vrot.slane %v396_v40, 6  ;;  %v425_v24 = vadd.f32 %v3039_v31, %v411_v18  ;;  %v1008_v38 = vstv %s2404_s18  ;;  %s2415_s18 = sld [smem:[#allocation5 + $0x30]] }
 0x135   : > { %v1010_v39 = vmul.f32 %v1008_v38, %v2885_v59  ;;  %v1029_v40 = vstv %s2405_s20  ;;  %v1009_v44 = vmul.f32 %v1008_v38, %v2876_v55  ;;  %s2424_s20 = sld [smem:[#allocation5 + $0x39]] }
 0x136   : > { %v405_v53 = vsel %vm402_vm9, %v403_v54, %v404_v51  ;;  %v1031_v42 = vmul.f32 %v1029_v40, %v2885_v59  ;;  %v1030_v45 = vmul.f32 %v1029_v40, %v2876_v55 }
 0x137   : > { %v1016_v51 = vrot.slane %v1010_v39, 2  ;;  %v1015_v54 = vrot.slane %v1009_v44, 2 }
 0x138   : > { %v1036_v62 = vrot.slane %v1030_v45, 3 }
 0x139   : > { %901 = vrot.lane.b32.xlu1 %v898_v7, %s2716_s25  ;;  %922 = vrot.lane.b32.xlu0 %v919_v9, %s2716_s25  ;;  %v973_v7 = vstv %s3180_s3  ;;  %v410_v9 = vadd.f32 %v405_v53, %v392_v58  ;;  %v1017_v1 = vsel %vm330_vm5, %v1015_v54, %v1016_v51  ;;  %v1011_v53 = vmul.f32 %v1008_v38, %v2897_v5  ;;  %s2413_s3 = sld [smem:[#allocation5 + $0x22]] }
 0x13a   : > { %880 = vrot.lane.b32.xlu2 %v877_v17, %s2716_s25  ;;  %v974_v12 = vmul.f32 %v973_v7, %v2876_v55  ;;  %v987_v17 = vstv %s2403_s4  ;;  %v975_v30 = vmul.f32 %v973_v7, %v2885_v59  ;;  %s2414_s4 = sld [smem:[#allocation5 + $0x29]] }
 0x13b   : > { %v3173_v27 = vpop.permute.xlu1 %838  ;;  %v3175_v28 = vpop.permute.xlu0 %439  ;;  %v989_v19 = vmul.f32 %v987_v17, %v2885_v59  ;;  %v990_v20 = vmul.f32 %v987_v17, %v2897_v5  ;;  %v424_v23 = vadd.f32 %v3019_v16, %v410_v9 }
 0x13c   : > { %v3177_v15 = vpop.permute.xlu2 %483 }
 0x13d   : > { %v445_v29 = vadd.f32 %v3175_v28, %v424_v23  ;;  %v995_v35 = vrot.slane %v989_v19, 1  ;;  %v997_v36 = vrot.slane %v990_v20, 1  ;;  %v963_v28 = vsel %vm402_vm9, %v960_v4, %v962_v37 }
 0x13e   : > { %v1018_v20 = vrot.slane %v1011_v53, 2  ;;  %v1071_v23 = vstv %s2407_s5  ;;  %v3274_v53 = vld [vmem:[#allocation4] sm:$0xff]  ;;  %s2425_s5 = sld [smem:[#allocation5 + $0x40]] }
 0x13f   : > { %v466_v16 = vadd.f32 %v3143_v52, %v445_v29  ;;  %v998_v41 = vsel %vm312_vm4, %v995_v35, %v997_v36 }
 0x141   : > { %924 = vrot.lane.b32.xlu1 %v921_v46, %s2716_s25  ;;  %945 = vrot.lane.b32.xlu0 %v942_v48, %s2716_s25  ;;  %v988_v48 = vmul.f32 %v987_v17, %v2876_v55 }
 0x142   : > { %903 = vrot.lane.b32.xlu2 %v900_v56, %s2716_s25  ;;  %v1037_v56 = vrot.slane %v1031_v42, 3 }
 0x143   : > { %v442_v57 = vpop.permute.xlu1 %441  ;;  %v463_v0 = vpop.permute.xlu0 %462  ;;  %v994_v63 = vrot.slane %v988_v48, 1 }
 0x144   : > { %v3199_v3 = vpop.permute.xlu2 %523  ;;  %v446_v32 = vadd.f32 %v442_v57, %v425_v24  ;;  %v1032_v57 = vmul.f32 %v1029_v40, %v2897_v5  ;;  %v1038_v2 = vsel %vm348_vm6, %v1036_v62, %v1037_v56  ;;  %v1092_v24 = vstv %s2408_s8  ;;  %s2426_s8 = sld [smem:[#allocation5 + $0x47]] }
 0x145   : > { %v996_v7 = vsel %vm312_vm4, %v994_v63, %v995_v35  ;;  %v1094_v29 = vmul.f32 %v1092_v24, %v2885_v59  ;;  %v1093_v36 = vmul.f32 %v1092_v24, %v2876_v55  ;;  %v1113_v62 = vstv %s3253_s15  ;;  %v3264_v63 = vld [vmem:[#allocation4 + $0x8] sm:$0xff]  ;;  %s2427_s15 = sld [smem:[#allocation5 + $0x4e]] }
 0x146   : > { %v467_v31 = vadd.f32 %v463_v0, %v446_v32  ;;  %v1050_v0 = vstv %s2406_s27  ;;  %v1039_v18 = vrot.slane %v1032_v57, 3  ;;  %v1019_v32 = vsel %vm330_vm5, %v1016_v51, %v1018_v20  ;;  %s3305_s27 = sld [smem:[#allocation5 + $0x32]] }
 0x147   : > { %v1052_v4 = vmul.f32 %v1050_v0, %v2885_v59  ;;  %v1099_v42 = vrot.slane %v1093_v36, 6  ;;  %v1115_v57 = vmul.f32 %v3264_v63, %v1113_v62 }
 0x148   : > { %v488_v26 = vadd.f32 %v3177_v15, %v467_v31  ;;  %v1053_v15 = vmul.f32 %v1050_v0, %v2897_v5 }
 0x149   : > { %964 = vrot.lane.b32.xlu1 %v961_v6, %s2716_s25  ;;  %978 = vrot.lane.b32.xlu0 %v974_v12, %s2717_s26  ;;  %v1058_v6 = vrot.slane %v1052_v4, 4 }
 0x14a   : > { %943 = vrot.lane.b32.xlu2 %v940_v21, %s2716_s25  ;;  %v1060_v19 = vrot.slane %v1053_v15, 4 }
 0x14b   : > { %v482_v25 = vpop.permute.xlu1 %481  ;;  %v503_v61 = vpop.permute.xlu0 %502 }
 0x14c   : > { %v547_v34 = vpop.permute.xlu2 %546  ;;  %v487_v43 = vadd.f32 %v482_v25, %v466_v16  ;;  %v1040_v25 = vsel %vm348_vm6, %v1037_v56, %v1039_v18  ;;  %v1100_v16 = vrot.slane %v1094_v29, 6 }
 0x14e   : > { %v508_v58 = vadd.f32 %v503_v61, %v487_v43  ;;  %v1073_v61 = vmul.f32 %v1071_v23, %v2885_v59  ;;  %v1101_v45 = vsel %vm402_vm9, %v1099_v42, %v1100_v16 }
 0x150   : > { %v529_v9 = vadd.f32 %v3199_v3, %v508_v58  ;;  %v1061_v3 = vsel %vm366_vm7, %v1058_v6, %v1060_v19  ;;  %v1079_v40 = vrot.slane %v1073_v61, 5 }
 0x151   : > { %980 = vrot.lane.b32.xlu1 %v975_v30, %s2717_s26  ;;  %1001 = vrot.lane.b32.xlu0 %v998_v41, %s2717_s26  ;;  %v1051_v30 = vmul.f32 %v1050_v0, %v2876_v55  ;;  %v1127_v0 = vstv %s2410_s23  ;;  %s2428_s23 = sld [smem:[#allocation5 + $0x55]] }
 0x152   : > { %966 = vrot.lane.b32.xlu2 %v963_v28, %s2716_s25  ;;  %v1129_v4 = vmul.f32 %v3264_v63, %v1127_v0 }
 0x153   : > { %v505_v46 = vpop.permute.xlu1 %504  ;;  %v526_v52 = vpop.permute.xlu0 %525  ;;  %v1057_v28 = vrot.slane %v1051_v30, 4 }
 0x154   : > { %v580_v33 = vpop.permute.xlu2 %579  ;;  %v509_v60 = vadd.f32 %v505_v46, %v488_v26  ;;  %v1135_v18 = vrot.slane %v1129_v4, 1 }
 0x155   : > { %v1059_v46 = vsel %vm366_vm7, %v1057_v28, %v1058_v6 }
 0x156   : > { %v530_v11 = vadd.f32 %v526_v52, %v509_v60  ;;  %v1074_v52 = vmul.f32 %v1071_v23, %v2897_v5 }
 0x158   : > { %v551_v21 = vadd.f32 %v547_v34, %v530_v11  ;;  %v1081_v60 = vrot.slane %v1074_v52, 5 }
 0x159   : > { %1020 = vrot.lane.b32.xlu1 %v1017_v1, %s2717_s26  ;;  %1041 = vrot.lane.b32.xlu0 %v1038_v2, %s2717_s26  ;;  %v1148_v1 = vstv %s2411_s24  ;;  %s2429_s24 = sld [smem:[#allocation5 + $0x5c]] }
 0x15a   : > { %999 = vrot.lane.b32.xlu2 %v996_v7, %s2717_s26  ;;  %v565_v34 = vadd.f32 %v3136_v49, %v551_v21  ;;  %v1150_v15 = vmul.f32 %v3264_v63, %v1148_v1  ;;  %v1082_v7 = vsel %vm384_vm8, %v1079_v40, %v1081_v60  ;;  %v1149_v11 = vmul.f32 %v3274_v53, %v1148_v1 }
 0x15b   : > { %v545_v8 = vpop.permute.xlu1 %544  ;;  %v582_v12 = vpop.permute.xlu0 %581 }
 0x15c   : > { %v550_v14 = vadd.f32 %v545_v8, %v529_v9  ;;  %v603_v17 = vpop.permute.xlu2 %602  ;;  %v586_v31 = vadd.f32 %v582_v12, %v565_v34  ;;  %v1128_v9 = vmul.f32 %v3274_v53, %v1127_v0  ;;  %v1156_v6 = vrot.slane %v1150_v15, 2 }
 0x15d   : > { %v1155_v21 = vrot.slane %v1149_v11, 2 }
 0x15e   : > { %v564_v22 = vadd.f32 %v3094_v10, %v550_v14  ;;  %v1072_v10 = vmul.f32 %v1071_v23, %v2876_v55  ;;  %v1095_v55 = vmul.f32 %v1092_v24, %v2897_v5  ;;  %v607_v48 = vadd.f32 %v603_v17, %v586_v31  ;;  %v2570_v23 = vld [vmem:[#allocation4 + $0x10] sm:$0x3f] }
 0x15f   : > { %v1134_v20 = vrot.slane %v1128_v9, 1  ;;  %v1151_v24 = vmul.f32 %v2570_v23, %v1148_v1  ;;  %v1157_v61 = vsel %vm330_vm5, %v1155_v21, %v1156_v6  ;;  %v1130_v34 = vmul.f32 %v2570_v23, %v1127_v0 }
 0x160   : > { %v585_v35 = vadd.f32 %v580_v33, %v564_v22  ;;  %v1078_v49 = vrot.slane %v1072_v10, 5  ;;  %v1102_v58 = vrot.slane %v1095_v55, 6  ;;  %v1114_v22 = vmul.f32 %v3274_v53, %v1113_v62 }
 0x161   : > { %1043 = vrot.lane.b32.xlu1 %v1040_v25, %s2717_s26  ;;  %1064 = vrot.lane.b32.xlu0 %v1061_v3, %s2717_s26  ;;  %v1169_v25 = vstv %s2412_s30  ;;  %v1136_v3 = vsel %vm312_vm4, %v1134_v20, %v1135_v18  ;;  %v1158_v36 = vrot.slane %v1151_v24, 2  ;;  %v1190_v31 = vstv %s2413_s3  ;;  %s3355_s30 = sld [smem:[#allocation5 + $0x33]] }
 0x162   : > { %1022 = vrot.lane.b32.xlu2 %v1019_v32, %s2717_s26  ;;  %v1080_v44 = vsel %vm384_vm8, %v1078_v49, %v1079_v40  ;;  %v1103_v5 = vsel %vm402_vm9, %v1100_v16, %v1102_v58  ;;  %v1171_v29 = vmul.f32 %v3264_v63, %v1169_v25  ;;  %v1172_v32 = vmul.f32 %v2570_v23, %v1169_v25  ;;  %s2431_s3 = sld [smem:[#allocation5 + $0x3a]] }
 0x163   : > { %v601_v37 = vpop.permute.xlu1 %600  ;;  %v622_v38 = vpop.permute.xlu0 %621  ;;  %v1159_v16 = vsel %vm330_vm5, %v1156_v6, %v1158_v36  ;;  %v1192_v28 = vmul.f32 %v3264_v63, %v1190_v31  ;;  %v1232_v62 = vstv %s2415_s18  ;;  %v3309_v6 = vld [vmem:[#allocation4 + $0x20] sm:$0xff]  ;;  %v1378_v20 = vstv %s2424_s20  ;;  %s2433_s18 = sld [smem:[#allocation5 + $0x48]] }
 0x164   : > { %v606_v59 = vadd.f32 %v601_v37, %v585_v35  ;;  %v643_v39 = vpop.permute.xlu2 %642  ;;  %v1177_v30 = vrot.slane %v1171_v29, 3  ;;  %v1234_v0 = vmul.f32 %v3264_v63, %v1232_v62  ;;  %v1235_v4 = vmul.f32 %v2570_v23, %v1232_v62  ;;  %s2434_s20 = sld [smem:[#allocation5 + $0x4f]] }
 0x166   : > { %v627_v41 = vadd.f32 %v622_v38, %v606_v59  ;;  %v1179_v59 = vrot.slane %v1172_v32, 3 }
 0x168   : > { %v648_v43 = vadd.f32 %v643_v39, %v627_v41  ;;  %v1137_v39 = vrot.slane %v1130_v34, 1  ;;  %v1211_v41 = vstv %s2414_s4  ;;  %v1180_v42 = vsel %vm348_vm6, %v1177_v30, %v1179_v59  ;;  %s2432_s4 = sld [smem:[#allocation5 + $0x41]] }
 0x169   : > { %1083 = vrot.lane.b32.xlu1 %v1080_v44, %s2717_s26  ;;  %1104 = vrot.lane.b32.xlu0 %v1101_v45, %s2717_s26  ;;  %v1191_v45 = vmul.f32 %v3274_v53, %v1190_v31  ;;  %v1212_v55 = vmul.f32 %v3274_v53, %v1211_v41  ;;  %v1233_v34 = vmul.f32 %v3274_v53, %v1232_v62  ;;  %v1399_v59 = vstv %s2425_s5  ;;  %s2436_s5 = sld [smem:[#allocation5 + $0x5d]] }
 0x16a   : > { %1062 = vrot.lane.b32.xlu2 %v1059_v46, %s2717_s26  ;;  %v1138_v44 = vsel %vm312_vm4, %v1135_v18, %v1137_v39  ;;  %v3307_v18 = vld [vmem:[#allocation4 + $0x18] sm:$0xff] }
 0x16b   : > { %v624_v26 = vpop.permute.xlu1 %623  ;;  %v645_v33 = vpop.permute.xlu0 %644  ;;  %v1197_v60 = vrot.slane %v1191_v45, 4 }
 0x16c   : > { %v628_v51 = vadd.f32 %v624_v26, %v607_v48  ;;  %v666_v56 = vpop.permute.xlu2 %665  ;;  %v1170_v48 = vmul.f32 %v3274_v53, %v1169_v25  ;;  %v1379_v25 = vmul.f32 %v1378_v20, %v3307_v18  ;;  %v1401_v53 = vmul.f32 %v1399_v59, %v3309_v6 }
 0x16e   : > { %v649_v54 = vadd.f32 %v645_v33, %v628_v51  ;;  %v1198_v51 = vrot.slane %v1192_v28, 4 }
 0x170   : > { %v670_v2 = vadd.f32 %v666_v56, %v649_v54  ;;  %v1218_v54 = vrot.slane %v1212_v55, 5  ;;  %v1420_v55 = vstv %s2426_s8  ;;  %s2438_s8 = sld [smem:[#allocation5 + $0x3b]] }
 0x171   : > { %1106 = vrot.lane.b32.xlu1 %v1103_v5, %s2717_s26  ;;  %1120 = vrot.lane.b32.xlu0 %v1115_v57, %s2718_s29  ;;  %v1214_v57 = vmul.f32 %v2570_v23, %v1211_v41 }
 0x172   : > { %1085 = vrot.lane.b32.xlu2 %v1082_v7, %s2717_s26  ;;  %v1193_v7 = vmul.f32 %v2570_v23, %v1190_v31 }
 0x173   : > { %v664_v8 = vpop.permute.xlu1 %663  ;;  %v685_v12 = vpop.permute.xlu0 %684 }
 0x174   : > { %v669_v14 = vadd.f32 %v664_v8, %v648_v43  ;;  %v722_v17 = vpop.permute.xlu2 %721  ;;  %v1213_v43 = vmul.f32 %v3264_v63, %v1211_v41  ;;  %v1221_v8 = vrot.slane %v1214_v57, 5 }
 0x176   : > { %v690_v19 = vadd.f32 %v685_v12, %v669_v14  ;;  %v1219_v56 = vrot.slane %v1213_v43, 5  ;;  %v1240_v14 = vrot.slane %v1234_v0, 6 }
 0x178   : > { %v1220_v5 = vsel %vm384_vm8, %v1218_v54, %v1219_v56  ;;  %v1421_v54 = vmul.f32 %v1420_v55, %v3307_v18 }
 0x179   : > { %1139 = vrot.lane.b32.xlu1 %v1136_v3, %s2718_s29  ;;  %1160 = vrot.lane.b32.xlu0 %v1157_v61, %s2718_s29  ;;  %v1380_v3 = vmul.f32 %v1378_v20, %v3309_v6 }
 0x17a   : > { %1118 = vrot.lane.b32.xlu2 %v1114_v22, %s2718_s29  ;;  %v1222_v22 = vsel %vm384_vm8, %v1219_v56, %v1221_v8 }
 0x17b   : > { %v687_v35 = vpop.permute.xlu1 %686  ;;  %v741_v10 = vpop.permute.xlu0 %740 }
 0x17c   : > { %v691_v37 = vadd.f32 %v687_v35, %v670_v2  ;;  %v762_v38 = vpop.permute.xlu2 %761  ;;  %v1199_v2 = vsel %vm366_vm7, %v1197_v60, %v1198_v51  ;;  %v3320_v35 = vld [vmem:[#allocation4 + $0x28] sm:$0x3f] }
 0x17d   : > { %v1381_v31 = vmul.f32 %v1378_v20, %v3320_v35 }
 0x17e   : > { %v705_v40 = vadd.f32 %v3138_v50, %v691_v37  ;;  %v704_v50 = vadd.f32 %v3064_v47, %v690_v19  ;;  %v1176_v47 = vrot.slane %v1170_v48, 3  ;;  %v1200_v19 = vrot.slane %v1193_v7, 4 }
 0x17f   : > { %v1364_v37 = vstv %s3305_s27  ;;  %v1388_v45 = vrot.slane %v1381_v31, 1  ;;  %s2435_s27 = sld [smem:[#allocation5 + $0x56]] }
 0x180   : > { %v726_v49 = vadd.f32 %v722_v17, %v705_v40  ;;  %v1178_v15 = vsel %vm348_vm6, %v1176_v47, %v1177_v30  ;;  %v1242_v17 = vrot.slane %v1235_v4, 6  ;;  %v1201_v61 = vsel %vm366_vm7, %v1198_v51, %v1200_v19 }
 0x181   : > { %1162 = vrot.lane.b32.xlu1 %v1159_v16, %s2718_s29  ;;  %1183 = vrot.lane.b32.xlu0 %v1180_v42, %s2718_s29  ;;  %v1386_v30 = vrot.slane %v1380_v3, 1  ;;  %v1365_v40 = vmul.f32 %v1364_v37, %v3307_v18  ;;  %v1239_v16 = vrot.slane %v1233_v34, 6  ;;  %v1402_v42 = vmul.f32 %v1399_v59, %v3320_v35 }
 0x182   : > { %1141 = vrot.lane.b32.xlu2 %v1138_v44, %s2718_s29  ;;  %v1243_v24 = vsel %vm402_vm9, %v1240_v14, %v1242_v17  ;;  %v1441_v51 = vstv %s2427_s15  ;;  %v1366_v60 = vmul.f32 %v1364_v37, %v3309_v6  ;;  %s2439_s15 = sld [smem:[#allocation5 + $0x42]] }
 0x183   : > { %v720_v46 = vpop.permute.xlu1 %719  ;;  %v764_v52 = vpop.permute.xlu0 %763  ;;  %v1241_v28 = vsel %vm402_vm9, %v1239_v16, %v1240_v14  ;;  %v1389_v62 = vsel %vm312_vm4, %v1386_v30, %v1388_v45  ;;  %v1442_v57 = vmul.f32 %v1441_v51, %v3307_v18  ;;  %v1443_v0 = vmul.f32 %v1441_v51, %v3309_v6 }
 0x184   : > { %v725_v26 = vadd.f32 %v720_v46, %v704_v50  ;;  %v785_v33 = vpop.permute.xlu2 %784  ;;  %v1462_v14 = vstv %s2428_s23  ;;  %v1444_v20 = vmul.f32 %v1441_v51, %v3320_v35  ;;  %v1504_v45 = vstv %s3355_s30  ;;  %s2440_s23 = sld [smem:[#allocation5 + $0x49]] }
 0x185   : > { %v1448_v8 = vrot.slane %v1442_v57, 4  ;;  %s2442_s30 = sld [smem:[#allocation5 + $0x57]] }
 0x186   : > { %v746_v58 = vadd.f32 %v741_v10, %v725_v26  ;;  %v1407_v26 = vrot.slane %v1401_v53, 2 }
 0x188   : > { %v767_v1 = vadd.f32 %v762_v38, %v746_v58  ;;  %v1385_v38 = vrot.slane %v1379_v25, 1  ;;  %v1423_v25 = vmul.f32 %v1420_v55, %v3320_v35 }
 0x189   : > { %1202 = vrot.lane.b32.xlu1 %v1199_v2, %s2718_s29  ;;  %1223 = vrot.lane.b32.xlu0 %v1220_v5, %s2718_s29 }
 0x18a   : > { %1181 = vrot.lane.b32.xlu2 %v1178_v15, %s2718_s29  ;;  %v1427_v15 = vrot.slane %v1421_v54, 3 }
 0x18b   : > { %v743_v9 = vpop.permute.xlu1 %742  ;;  %v804_v11 = vpop.permute.xlu0 %803 }
 0x18c   : > { %v747_v12 = vadd.f32 %v743_v9, %v726_v49  ;;  %v825_v63 = vpop.permute.xlu2 %824  ;;  %v1387_v49 = vsel %vm312_vm4, %v1385_v38, %v1386_v30  ;;  %v1430_v38 = vrot.slane %v1423_v25, 3 }
 0x18e   : > { %v768_v21 = vadd.f32 %v764_v52, %v747_v12  ;;  %v1449_v12 = vrot.slane %v1443_v0, 4 }
 0x190   : > { %v789_v23 = vadd.f32 %v785_v33, %v768_v21  ;;  %v1409_v33 = vrot.slane %v1402_v42, 2 }
 0x191   : > { %1225 = vrot.lane.b32.xlu1 %v1222_v22, %s2718_s29  ;;  %1246 = vrot.lane.b32.xlu0 %v1243_v24, %s2718_s29  ;;  %v1464_v22 = vmul.f32 %v1462_v14, %v3309_v6 }
 0x192   : > { %1204 = vrot.lane.b32.xlu2 %v1201_v61, %s2718_s29  ;;  %v1410_v47 = vsel %vm330_vm5, %v1407_v26, %v1409_v33 }
 0x193   : > { %v783_v29 = vpop.permute.xlu1 %782  ;;  %v827_v32 = vpop.permute.xlu0 %826 }
 0x194   : > { %v788_v10 = vadd.f32 %v783_v29, %v767_v1  ;;  %v881_v36 = vpop.permute.xlu2 %880  ;;  %v1400_v1 = vmul.f32 %v1399_v59, %v3307_v18  ;;  %v1483_v29 = vstv %s2429_s24  ;;  %s2441_s24 = sld [smem:[#allocation5 + $0x50]] }
 0x195   : > { %v1484_v59 = vmul.f32 %v1483_v29, %v3307_v18  ;;  %v1485_v31 = vmul.f32 %v1483_v29, %v3309_v6 }
 0x196   : > { %v809_v39 = vadd.f32 %v804_v11, %v788_v10  ;;  %v1451_v10 = vrot.slane %v1444_v20, 4 }
 0x198   : > { %v830_v41 = vadd.f32 %v825_v63, %v809_v39  ;;  %v1406_v63 = vrot.slane %v1400_v1, 2  ;;  %v1539_v1 = vstv %s2432_s4  ;;  %s3442_s4 = sld [smem:[#allocation5 + $0x5e]] }
 0x199   : > { %1369 = vrot.lane.b32.xlu1 %v1365_v40, %s2714_s7  ;;  %1390 = vrot.lane.b32.xlu0 %v1387_v49, %s2714_s7  ;;  %v1452_v40 = vsel %vm366_vm7, %v1449_v12, %v1451_v10  ;;  %v1463_v49 = vmul.f32 %v1462_v14, %v3307_v18 }
 0x19a   : > { %v844_v43 = vadd.f32 %v3173_v27, %v830_v41  ;;  %1244 = vrot.lane.b32.xlu2 %v1241_v28, %s2718_s29  ;;  %v1422_v27 = vmul.f32 %v1420_v55, %v3309_v6  ;;  %v1408_v24 = vsel %vm330_vm5, %v1406_v63, %v1407_v26 }
 0x19b   : > { %v806_v44 = vpop.permute.xlu1 %805  ;;  %v860_v50 = vpop.permute.xlu0 %859  ;;  %v1469_v55 = vrot.slane %v1463_v49, 5 }
 0x19c   : > { %v810_v46 = vadd.f32 %v806_v44, %v789_v23  ;;  %v904_v52 = vpop.permute.xlu2 %903  ;;  %v865_v48 = vadd.f32 %v860_v50, %v844_v43  ;;  %v1428_v7 = vrot.slane %v1422_v27, 3  ;;  %v1465_v23 = vmul.f32 %v1462_v14, %v3320_v35 }
 0x19d   : > { %v1490_v44 = vrot.slane %v1484_v59, 6  ;;  %v1491_v50 = vrot.slane %v1485_v31, 6  ;;  %v1542_v59 = vmul.f32 %v1539_v1, %v3320_v35 }
 0x19e   : > { %v831_v56 = vadd.f32 %v827_v32, %v810_v46  ;;  %v886_v58 = vadd.f32 %v881_v36, %v865_v48  ;;  %v1429_v19 = vsel %vm348_vm6, %v1427_v15, %v1428_v7  ;;  %v1470_v36 = vrot.slane %v1464_v22, 5 }
 0x19f   : > { %v1472_v37 = vrot.slane %v1465_v23, 5  ;;  %v1431_v41 = vsel %vm348_vm6, %v1428_v7, %v1430_v38  ;;  %v1518_v46 = vstv %s2431_s3  ;;  %v1505_v48 = vmul.f32 %v1504_v45, %v3307_v18  ;;  %s2417_s3 = sld [smem:[#allocation5 + $0x38]] }
 0x1a0   : > { %v845_v2 = vadd.f32 %v3098_v13, %v831_v56  ;;  %v1450_v13 = vsel %vm366_vm7, %v1448_v8, %v1449_v12  ;;  %v1492_v33 = vsel %vm402_vm9, %v1490_v44, %v1491_v50  ;;  %v1520_v51 = vmul.f32 %v1518_v46, %v3309_v6 }
 0x1a1   : > { %1392 = vrot.lane.b32.xlu1 %v1389_v62, %s2714_s7  ;;  %1413 = vrot.lane.b32.xlu0 %v1410_v47, %s2714_s7  ;;  %v1473_v16 = vsel %vm384_vm8, %v1470_v36, %v1472_v37  ;;  %v1521_v56 = vmul.f32 %v1518_v46, %v3320_v35  ;;  %v1506_v15 = vmul.f32 %v1504_v45, %v3309_v6 }
 0x1a2   : > { %1371 = vrot.lane.b32.xlu2 %v1366_v60, %s2714_s7  ;;  %v1486_v60 = vmul.f32 %v1483_v29, %v3320_v35  ;;  %v1526_v57 = vrot.slane %v1520_v51, 1  ;;  %v1540_v7 = vmul.f32 %v1539_v1, %v3307_v18 }
 0x1a3   : > { %v862_v5 = vpop.permute.xlu1 %861  ;;  %v883_v4 = vpop.permute.xlu0 %882  ;;  %v1528_v0 = vrot.slane %v1521_v56, 1 }
 0x1a4   : > { %v866_v9 = vadd.f32 %v862_v5, %v845_v2  ;;  %v944_v11 = vpop.permute.xlu2 %943  ;;  %v1493_v2 = vrot.slane %v1486_v60, 6  ;;  %v1560_v5 = vstv %s2433_s18  ;;  %s3445_s18 = sld [smem:[#allocation5 + $0x31]] }
 0x1a5   : > { %v1529_v8 = vsel %vm312_vm4, %v1526_v57, %v1528_v0  ;;  %v1561_v12 = vmul.f32 %v1560_v5, %v3307_v18  ;;  %v1562_v63 = vmul.f32 %v1560_v5, %v3309_v6 }
 0x1a6   : > { %v887_v17 = vadd.f32 %v883_v4, %v866_v9  ;;  %v1541_v9 = vmul.f32 %v1539_v1, %v3309_v6  ;;  %v1494_v14 = vsel %vm402_vm9, %v1491_v50, %v1493_v2 }
 0x1a7   : > { %v1568_v25 = vrot.slane %v1562_v63, 3 }
 0x1a8   : > { %v908_v21 = vadd.f32 %v904_v52, %v887_v17  ;;  %v1519_v17 = vmul.f32 %v1518_v46, %v3307_v18 }
 0x1a9   : > { %1432 = vrot.lane.b32.xlu1 %v1429_v19, %s2714_s7  ;;  %1453 = vrot.lane.b32.xlu0 %v1450_v13, %s2714_s7  ;;  %v1547_v13 = vrot.slane %v1541_v9, 2 }
 0x1aa   : > { %1411 = vrot.lane.b32.xlu2 %v1408_v24, %s2714_s7  ;;  %v1567_v24 = vrot.slane %v1561_v12, 3 }
 0x1ab   : > { %v902_v3 = vpop.permute.xlu1 %901  ;;  %v923_v61 = vpop.permute.xlu0 %922 }
 0x1ac   : > { %v907_v32 = vadd.f32 %v902_v3, %v886_v58  ;;  %v967_v34 = vpop.permute.xlu2 %966  ;;  %v1471_v58 = vsel %vm384_vm8, %v1469_v55, %v1470_v36  ;;  %v1525_v3 = vrot.slane %v1519_v17, 1  ;;  %v1569_v36 = vsel %vm348_vm6, %v1567_v24, %v1568_v25 }
 0x1ae   : > { %v928_v30 = vadd.f32 %v923_v61, %v907_v32  ;;  %v1581_v61 = vstv %s2434_s20  ;;  %s3462_s20 = sld [smem:[#allocation5 + $0x46]] }
 0x1af   : > { %v1583_v37 = vmul.f32 %v1581_v61, %v3309_v6  ;;  %v1584_v38 = vmul.f32 %v1581_v61, %v3320_v35  ;;  %v1582_v51 = vmul.f32 %v1581_v61, %v3307_v18 }
 0x1b0   : > { %v949_v39 = vadd.f32 %v944_v11, %v928_v30  ;;  %v1527_v30 = vsel %vm312_vm4, %v1525_v3, %v1526_v57 }
 0x1b1   : > { %1455 = vrot.lane.b32.xlu1 %v1452_v40, %s2714_s7  ;;  %1476 = vrot.lane.b32.xlu0 %v1473_v16, %s2714_s7  ;;  %v1589_v49 = vrot.slane %v1583_v37, 4  ;;  %v1588_v0 = vrot.slane %v1582_v51, 4 }
 0x1b2   : > { %1434 = vrot.lane.b32.xlu2 %v1431_v41, %s2714_s7 }
 0x1b3   : > { %v925_v53 = vpop.permute.xlu1 %924  ;;  %v946_v42 = vpop.permute.xlu0 %945 }
 0x1b4   : > { %v929_v28 = vadd.f32 %v925_v53, %v908_v21  ;;  %v1000_v43 = vpop.permute.xlu2 %999  ;;  %v1546_v21 = vrot.slane %v1540_v7, 2  ;;  %v1591_v53 = vrot.slane %v1584_v38, 4  ;;  %v1590_v7 = vsel %vm366_vm7, %v1588_v0, %v1589_v49 }
 0x1b6   : > { %v950_v52 = vadd.f32 %v946_v42, %v929_v28  ;;  %v1548_v32 = vsel %vm330_vm5, %v1546_v21, %v1547_v13  ;;  %v1602_v42 = vstv %s2435_s27  ;;  %v1549_v28 = vrot.slane %v1542_v59, 2  ;;  %s3465_s27 = sld [smem:[#allocation5 + $0x3c]] }
 0x1b7   : > { %v1603_v45 = vmul.f32 %v1602_v42, %v3307_v18  ;;  %v1604_v55 = vmul.f32 %v1602_v42, %v3309_v6  ;;  %v1605_v9 = vmul.f32 %v1602_v42, %v3320_v35  ;;  %v1679_v21 = vstv %s2439_s15  ;;  %s3500_s15 = sld [smem:[#allocation5 + $0x5b]] }
 0x1b8   : > { %v971_v26 = vadd.f32 %v967_v34, %v950_v52  ;;  %v1563_v34 = vmul.f32 %v1560_v5, %v3320_v35  ;;  %v1592_v52 = vsel %vm366_vm7, %v1589_v49, %v1591_v53  ;;  %v1680_v61 = vmul.f32 %v1679_v21, %v3307_v18 }
 0x1b9   : > { %1495 = vrot.lane.b32.xlu1 %v1492_v33, %s2714_s7  ;;  %1509 = vrot.lane.b32.xlu0 %v1505_v48, %s2713_s6  ;;  %v1550_v33 = vsel %vm330_vm5, %v1547_v13, %v1549_v28  ;;  %v1609_v60 = vrot.slane %v1603_v45, 5 }
 0x1ba   : > { %1474 = vrot.lane.b32.xlu2 %v1471_v58, %s2714_s7  ;;  %v1570_v16 = vrot.slane %v1563_v34, 3  ;;  %v1686_v59 = vrot.slane %v1680_v61, 2  ;;  %v1256_v61 = vstv %s3445_s18  ;;  %s2453_s18 = sld [smem:[#allocation5 + $0x44]] }
 0x1bb   : > { %v965_v54 = vpop.permute.xlu1 %964  ;;  %v979_v27 = vpop.permute.xlu0 %978 }
 0x1bc   : > { %v970_v62 = vadd.f32 %v965_v54, %v949_v39  ;;  %v1023_v47 = vpop.permute.xlu2 %1022  ;;  %v1571_v50 = vsel %vm348_vm6, %v1568_v25, %v1570_v16 }
 0x1be   : > { %v984_v4 = vadd.f32 %v979_v27, %v970_v62  ;;  %v1610_v62 = vrot.slane %v1604_v55, 5 }
 0x1c0   : > { %v1005_v11 = vadd.f32 %v1000_v43, %v984_v4  ;;  %v1623_v43 = vstv %s2436_s5  ;;  %v1611_v5 = vsel %vm384_vm8, %v1609_v60, %v1610_v62  ;;  %s3474_s5 = sld [smem:[#allocation5 + $0x35]] }
 0x1c1   : > { %1511 = vrot.lane.b32.xlu1 %v1506_v15, %s2713_s6  ;;  %1532 = vrot.lane.b32.xlu0 %v1529_v8, %s2713_s6  ;;  %v1624_v48 = vmul.f32 %v1623_v43, %v3307_v18  ;;  %v1626_v15 = vmul.f32 %v1623_v43, %v3320_v35 }
 0x1c2   : > { %1497 = vrot.lane.b32.xlu2 %v1494_v14, %s2714_s7  ;;  %s3408_s7 = sld [smem:[#allocation5 + $0x34]] }
 0x1c3   : > { %v981_v19 = vpop.permute.xlu1 %980  ;;  %v1002_v20 = vpop.permute.xlu0 %1001  ;;  %v1633_v14 = vrot.slane %v1626_v15, 6 }
 0x1c4   : > { %v985_v22 = vadd.f32 %v981_v19, %v971_v26  ;;  %v1063_v23 = vpop.permute.xlu2 %1062  ;;  %v1625_v26 = vmul.f32 %v1623_v43, %v3309_v6  ;;  %v1658_v19 = vstv %s2438_s8  ;;  %s3489_s8 = sld [smem:[#allocation5 + $0x54]] }
 0x1c5   : > { %v1660_v24 = vmul.f32 %v1658_v19, %v3309_v6 }
 0x1c6   : > { %v1006_v29 = vadd.f32 %v1002_v20, %v985_v22  ;;  %v1631_v57 = vrot.slane %v1625_v26, 6  ;;  %v1612_v20 = vrot.slane %v1605_v9, 5 }
 0x1c7   : > { %v1666_v37 = vrot.slane %v1660_v24, 1 }
 0x1c8   : > { %v1027_v10 = vadd.f32 %v1023_v47, %v1006_v29  ;;  %v1630_v47 = vrot.slane %v1624_v48, 6  ;;  %v1644_v17 = vstv %s3408_s7  ;;  %v1634_v3 = vsel %vm402_vm9, %v1631_v57, %v1633_v14  ;;  %s3477_s7 = sld [smem:[#allocation5 + $0x4d]] }
 0x1c9   : > { %1551 = vrot.lane.b32.xlu1 %v1548_v32, %s2713_s6  ;;  %1572 = vrot.lane.b32.xlu0 %v1569_v36, %s2713_s6  ;;  %v1646_v22 = vmul.f32 %v1644_v17, %v3309_v6  ;;  %v1681_v29 = vmul.f32 %v1679_v21, %v3309_v6  ;;  %v1613_v32 = vsel %vm384_vm8, %v1610_v62, %v1612_v20  ;;  %v1721_v48 = vstv %s2441_s24  ;;  %s3559_s24 = sld [smem:[#allocation5 + $0x4a]] }
 0x1ca   : > { %1530 = vrot.lane.b32.xlu2 %v1527_v30, %s2713_s6  ;;  %v1632_v4 = vsel %vm402_vm9, %v1630_v47, %v1631_v57  ;;  %v1645_v43 = vmul.f32 %v1644_v17, %v3307_v18  ;;  %v1722_v60 = vmul.f32 %v1721_v48, %v3307_v18  ;;  %v3450_v47 = vmul.f32 %v1721_v48, %v3309_v6 }
 0x1cb   : > { %v1021_v39 = vpop.permute.xlu1 %1020  ;;  %v1042_v40 = vpop.permute.xlu0 %1041  ;;  %v1763_v17 = vstv %s3442_s4  ;;  %s2452_s4 = sld [smem:[#allocation5 + $0x3d]] }
 0x1cc   : > { %v1026_v31 = vadd.f32 %v1021_v39, %v1005_v11  ;;  %v1086_v41 = vpop.permute.xlu2 %1085  ;;  %v1687_v39 = vrot.slane %v1681_v29, 2  ;;  %v1728_v9 = vrot.slane %v1722_v60, 4  ;;  %v3481_v29 = vmul.f32 %v1763_v17, %v3309_v6 }
 0x1ce   : > { %v1047_v44 = vadd.f32 %v1042_v40, %v1026_v31  ;;  %v1700_v40 = vstv %s2440_s23  ;;  %v1682_v31 = vmul.f32 %v1679_v21, %v3320_v35  ;;  %v1688_v28 = vsel %vm330_vm5, %v1686_v59, %v1687_v39  ;;  %s3509_s23 = sld [smem:[#allocation5 + $0x43]] }
 0x1cf   : > { %v1703_v49 = vmul.f32 %v1700_v40, %v3320_v35  ;;  %v1701_v57 = vmul.f32 %v1700_v40, %v3307_v18  ;;  %v1313_v60 = vstv %s3477_s7  ;;  %s2457_s7 = sld [smem:[#allocation5 + $0x60]] }
 0x1d0   : > { %v1068_v46 = vadd.f32 %v1063_v23, %v1047_v44  ;;  %v1659_v23 = vmul.f32 %v1658_v19, %v3307_v18  ;;  %v1661_v44 = vmul.f32 %v1658_v19, %v3320_v35  ;;  %v1689_v55 = vrot.slane %v1682_v31, 2 }
 0x1d1   : > { %1574 = vrot.lane.b32.xlu1 %v1571_v50, %s2713_s6  ;;  %1595 = vrot.lane.b32.xlu0 %v1592_v52, %s2713_s6  ;;  %v1710_v52 = vrot.slane %v1703_v49, 3 }
 0x1d2   : > { %1553 = vrot.lane.b32.xlu2 %v1550_v33, %s2713_s6  ;;  %v1665_v36 = vrot.slane %v1659_v23, 1  ;;  %v1668_v51 = vrot.slane %v1661_v44, 1  ;;  %v1707_v23 = vrot.slane %v1701_v57, 3 }
 0x1d3   : > { %v1044_v56 = vpop.permute.xlu1 %1043  ;;  %v1065_v58 = vpop.permute.xlu0 %1064 }
 0x1d4   : > { %v1048_v54 = vadd.f32 %v1044_v56, %v1027_v10  ;;  %v1119_v27 = vpop.permute.xlu2 %1118  ;;  %v1667_v42 = vsel %vm312_vm4, %v1665_v36, %v1666_v37  ;;  %v1742_v56 = vstv %s2442_s30  ;;  %s3569_s30 = sld [smem:[#allocation5 + $0x51]] }
 0x1d6   : > { %v1069_v1 = vadd.f32 %v1065_v58, %v1048_v54  ;;  %v1262_v54 = vstv %s2417_s3  ;;  %s2450_s3 = sld [smem:[#allocation5 + $0x5f]] }
 0x1d7   : > { %v1263_v15 = vmul.f32 %v1262_v54, %v3307_v18 }
 0x1d8   : > { %v1090_v2 = vadd.f32 %v1086_v41, %v1069_v1  ;;  %v3431_v41 = vmul.f32 %v1700_v40, %v3309_v6  ;;  %v1743_v1 = vmul.f32 %v1742_v56, %v3307_v18 }
 0x1d9   : > { %1614 = vrot.lane.b32.xlu1 %v1611_v5, %s2713_s6  ;;  %1635 = vrot.lane.b32.xlu0 %v1632_v4, %s2713_s6  ;;  %v1669_v4 = vsel %vm312_vm4, %v1666_v37, %v1668_v51  ;;  %v1269_v24 = vrot.slane %v1263_v15, 1  ;;  %v1724_v37 = vmul.f32 %v1721_v48, %v3320_v35  ;;  %v3538_v15 = vmul.f32 %v1313_v60, %v3309_v6 }
 0x1da   : > { %1593 = vrot.lane.b32.xlu2 %v1590_v7, %s2713_s6  ;;  %v3460_v7 = vmul.f32 %v1262_v54, %v3309_v6  ;;  %v1749_v21 = vrot.slane %v1743_v1, 5 }
 0x1db   : > { %v1084_v11 = vpop.permute.xlu1 %1083  ;;  %v1105_v8 = vpop.permute.xlu0 %1104 }
 0x1dc   : > { %v1089_v12 = vadd.f32 %v1084_v11, %v1068_v46  ;;  %v1142_v63 = vpop.permute.xlu2 %1141  ;;  %v1708_v46 = vrot.slane %v3431_v41, 3  ;;  %v1771_v41 = vrot.slane %v3481_v29, 6 }
 0x1de   : > { %v1110_v13 = vadd.f32 %v1105_v8, %v1089_v12  ;;  %v1711_v62 = vsel %vm348_vm6, %v1708_v46, %v1710_v52  ;;  %v1729_v12 = vrot.slane %v3450_v47, 4  ;;  %v1709_v40 = vsel %vm348_vm6, %v1707_v23, %v1708_v46 }
 0x1df   : > { %v1764_v47 = vmul.f32 %v1763_v17, %v3307_v18 }
 0x1e0   : > { %v1124_v25 = vadd.f32 %v1119_v27, %v1110_v13  ;;  %v1690_v27 = vsel %vm330_vm5, %v1687_v39, %v1689_v55  ;;  %v1265_v39 = vmul.f32 %v1262_v54, %v3320_v35 }
 0x1e1   : > { %1637 = vrot.lane.b32.xlu1 %v1634_v3, %s2713_s6  ;;  %1651 = vrot.lane.b32.xlu0 %v1646_v22, %s2715_s16  ;;  %v1745_v22 = vmul.f32 %v1742_v56, %v3320_v35 }
 0x1e2   : > { %1616 = vrot.lane.b32.xlu2 %v1613_v32, %s2713_s6  ;;  %s2418_s6 = sld [smem:[#allocation5 + $0x3f]]  ;;  %v1766_v32 = vmul.f32 %v1763_v17, %v3320_v35 }
 0x1e3   : > { %v1107_v34 = vpop.permute.xlu1 %1106  ;;  %v1121_v10 = vpop.permute.xlu0 %1120  ;;  %v1752_v59 = vrot.slane %v1745_v22, 5 }
 0x1e4   : > { %v1111_v38 = vadd.f32 %v1107_v34, %v1090_v2  ;;  %v1182_v30 = vpop.permute.xlu2 %1181  ;;  %v1744_v2 = vmul.f32 %v1742_v56, %v3309_v6  ;;  %v1730_v34 = vsel %vm366_vm7, %v1728_v9, %v1729_v12  ;;  %v1773_v49 = vrot.slane %v1766_v32, 6 }
 0x1e6   : > { %v1125_v16 = vadd.f32 %v1121_v10, %v1111_v38  ;;  %v1750_v13 = vrot.slane %v1744_v2, 5 }
 0x1e8   : > { %v1146_v53 = vadd.f32 %v1142_v63, %v1125_v16  ;;  %v1279_v5 = vstv %s2418_s6  ;;  %v1257_v16 = vmul.f32 %v1256_v61, %v3307_v18  ;;  %v1753_v48 = vsel %vm384_vm8, %v1750_v13, %v1752_v59  ;;  %s3633_s6 = sld [smem:[#allocation5 + $0x36]] }
 0x1e9   : > { %1670 = vrot.lane.b32.xlu1 %v1667_v42, %s2715_s16  ;;  %1691 = vrot.lane.b32.xlu0 %v1688_v28, %s2715_s16  ;;  %v1280_v63 = vmul.f32 %v1279_v5, %v3307_v18  ;;  %v3470_v14 = vmul.f32 %v1279_v5, %v3309_v6  ;;  %v1798_v42 = vstv %s3465_s27  ;;  %v3507_v55 = vmul.f32 %v1279_v5, %v3320_v35  ;;  %s2455_s27 = sld [smem:[#allocation5 + $0x52]] }
 0x1ea   : > { %1649 = vrot.lane.b32.xlu2 %v1645_v43, %s2715_s16  ;;  %v1799_v56 = vmul.f32 %v1798_v42, %v3307_v18 }
 0x1eb   : > { %v1140_v50 = vpop.permute.xlu1 %1139  ;;  %v1161_v45 = vpop.permute.xlu0 %1160  ;;  %v1286_v10 = vrot.slane %v1280_v63, 2  ;;  %v1287_v36 = vrot.slane %v3470_v14, 2 }
 0x1ec   : > { %v1145_v26 = vadd.f32 %v1140_v50, %v1124_v25  ;;  %v1205_v33 = vpop.permute.xlu2 %1204  ;;  %v1270_v25 = vrot.slane %v3460_v7, 1  ;;  %v1731_v50 = vrot.slane %v1724_v37, 4  ;;  %v1330_v7 = vstv %s3489_s8  ;;  %s2459_s8 = sld [smem:[#allocation5 + $0x3e]] }
 0x1ed   : > { %v1288_v43 = vsel %vm330_vm5, %v1286_v10, %v1287_v36  ;;  %v1331_v23 = vmul.f32 %v1330_v7, %v3307_v18  ;;  %v1321_v10 = vrot.slane %v3538_v15, 4  ;;  %v1840_v15 = vstv %s3559_s24  ;;  %s2462_s24 = sld [smem:[#allocation5 + $0x53]] }
 0x1ee   : > { %v1166_v58 = vadd.f32 %v1161_v45, %v1145_v26  ;;  %v1271_v31 = vsel %vm312_vm4, %v1269_v24, %v1270_v25  ;;  %v1258_v45 = vmul.f32 %v1256_v61, %v3309_v6  ;;  %v1272_v26 = vrot.slane %v1265_v39, 1 }
 0x1ef   : > { %v1732_v57 = vsel %vm366_vm7, %v1729_v12, %v1731_v50  ;;  %v3551_v24 = vmul.f32 %v1330_v7, %v3309_v6  ;;  %v1801_v39 = vmul.f32 %v1798_v42, %v3320_v35 }
 0x1f0   : > { %v1187_v0 = vadd.f32 %v1182_v30, %v1166_v58  ;;  %v1751_v30 = vsel %vm384_vm8, %v1749_v21, %v1750_v13  ;;  %v3520_v58 = vmul.f32 %v1798_v42, %v3309_v6  ;;  %v1273_v9 = vsel %vm312_vm4, %v1270_v25, %v1272_v26 }
 0x1f1   : > { %1693 = vrot.lane.b32.xlu1 %v1690_v27, %s2715_s16  ;;  %1714 = vrot.lane.b32.xlu0 %v1711_v62, %s2715_s16  ;;  %v1774_v27 = vsel %vm402_vm9, %v1771_v41, %v1773_v49  ;;  %v3554_v25 = vstv %s3509_s23  ;;  %v1808_v26 = vrot.slane %v1801_v39, 1  ;;  %s2461_s23 = sld [smem:[#allocation5 + $0x4c]] }
 0x1f2   : > { %1672 = vrot.lane.b32.xlu2 %v1669_v4, %s2715_s16  ;;  %v1314_v4 = vmul.f32 %v1313_v60, %v3307_v18  ;;  %v1806_v12 = vrot.slane %v3520_v58, 1 }
 0x1f3   : > { %v1163_v11 = vpop.permute.xlu1 %1162  ;;  %v1184_v8 = vpop.permute.xlu0 %1183 }
 0x1f4   : > { %v1167_v19 = vadd.f32 %v1163_v11, %v1146_v53  ;;  %v1245_v20 = vpop.permute.xlu2 %1244  ;;  %v1296_v53 = vstv %s3462_s20  ;;  %s2454_s20 = sld [smem:[#allocation5 + $0x4b]] }
 0x1f5   : > { %v3516_v51 = vmul.f32 %v1296_v53, %v3309_v6  ;;  %v3527_v62 = vmul.f32 %v1296_v53, %v3320_v35  ;;  %v1297_v2 = vmul.f32 %v1296_v53, %v3307_v18  ;;  %v1337_v53 = vrot.slane %v1331_v23, 5 }
 0x1f6   : > { %v1188_v3 = vadd.f32 %v1184_v8, %v1167_v19  ;;  %v1805_v8 = vrot.slane %v1799_v56, 1  ;;  %v1770_v19 = vrot.slane %v1764_v47, 6 }
 0x1f7   : > { %v1304_v11 = vrot.slane %v3516_v51, 3  ;;  %v1306_v17 = vrot.slane %v3527_v62, 3  ;;  %v1303_v22 = vrot.slane %v1297_v2, 3  ;;  %v1333_v51 = vmul.f32 %v1330_v7, %v3320_v35 }
 0x1f8   : > { %v1209_v38 = vadd.f32 %v1205_v33, %v1188_v3  ;;  %v1784_v33 = vstv %s3474_s5  ;;  %v1807_v37 = vsel %vm312_vm4, %v1805_v8, %v1806_v12  ;;  %v1772_v42 = vsel %vm402_vm9, %v1770_v19, %v1771_v41  ;;  %s2456_s5 = sld [smem:[#allocation5 + $0x59]] }
 0x1f9   : > { %1733 = vrot.lane.b32.xlu1 %v1730_v34, %s2715_s16  ;;  %1754 = vrot.lane.b32.xlu0 %v1751_v30, %s2715_s16  ;;  %v1785_v1 = vmul.f32 %v1784_v33, %v3307_v18  ;;  %v1320_v34 = vrot.slane %v1314_v4, 4  ;;  %v1305_v49 = vsel %vm348_vm6, %v1303_v22, %v1304_v11  ;;  %v1786_v14 = vmul.f32 %v1784_v33, %v3309_v6 }
 0x1fa   : > { %1712 = vrot.lane.b32.xlu2 %v1709_v40, %s2715_s16 }
 0x1fb   : > { %v1203_v28 = vpop.permute.xlu1 %1202  ;;  %v1224_v44 = vpop.permute.xlu0 %1223 }
 0x1fc   : > { %v1208_v46 = vadd.f32 %v1203_v28, %v1187_v0  ;;  %v3511_v52 = vpop.permute.xlu2 %1371  ;;  %v1289_v0 = vrot.slane %v3507_v55, 2  ;;  %v1338_v28 = vrot.slane %v3551_v24, 5 }
 0x1fe   : > { %v1229_v54 = vadd.f32 %v1224_v44, %v1208_v46  ;;  %v1316_v44 = vmul.f32 %v1313_v60, %v3320_v35  ;;  %v1290_v60 = vsel %vm330_vm5, %v1287_v36, %v1289_v0  ;;  %v1861_v36 = vstv %s3569_s30  ;;  %s2463_s30 = sld [smem:[#allocation5 + $0x5a]] }
 0x1ff   : > { %v1862_v22 = vmul.f32 %v1861_v36, %v3307_v18  ;;  %v1863_v23 = vmul.f32 %v1861_v36, %v3309_v6 }
 0x200   : > { %v1250_v5 = vadd.f32 %v1245_v20, %v1229_v54  ;;  %v1347_v20 = vstv %s3500_s15  ;;  %v1339_v54 = vsel %vm384_vm8, %v1337_v53, %v1338_v28  ;;  %v1323_v47 = vrot.slane %v1316_v44, 4  ;;  %s2460_s15 = sld [smem:[#allocation5 + $0x45]] }
 0x201   : > { %1756 = vrot.lane.b32.xlu1 %v1753_v48, %s2715_s16  ;;  %1777 = vrot.lane.b32.xlu0 %v1774_v27, %s2715_s16  ;;  %v1348_v30 = vmul.f32 %v1347_v20, %v3307_v18  ;;  %v3566_v59 = vmul.f32 %v1347_v20, %v3309_v6 }
 0x202   : > { %v1259_v63 = vadd.f32 %v1257_v16, %v1250_v5  ;;  %1735 = vrot.lane.b32.xlu2 %v1732_v57, %s2715_s16  ;;  %v3573_v16 = vmul.f32 %v3554_v25, %v3309_v6  ;;  %v1350_v57 = vmul.f32 %v1347_v20, %v3320_v35  ;;  %v1841_v20 = vmul.f32 %v1840_v15, %v3307_v18 }
 0x203   : > { %v1226_v21 = vpop.permute.xlu1 %1225  ;;  %v1247_v13 = vpop.permute.xlu0 %1246  ;;  %v1354_v46 = vrot.slane %v1348_v30, 6  ;;  %v1355_v48 = vrot.slane %v3566_v59, 6 }
 0x204   : > { %v1276_v3 = vadd.f32 %v1271_v31, %v1259_v63  ;;  %v1230_v61 = vadd.f32 %v1226_v21, %v1209_v38  ;;  %v3556_v32 = vpop.permute.xlu2 %1411  ;;  %v1822_v31 = vmul.f32 %v3554_v25, %v3320_v35  ;;  %v1827_v41 = vrot.slane %v3573_v16, 2 }
 0x205   : > { %v1356_v7 = vsel %vm402_vm9, %v1354_v46, %v1355_v48  ;;  %v1809_v63 = vsel %vm312_vm4, %v1806_v12, %v1808_v26  ;;  %v1357_v19 = vrot.slane %v1350_v57, 6  ;;  %v1842_v21 = vmul.f32 %v1840_v15, %v3309_v6 }
 0x206   : > { %v1293_v38 = vadd.f32 %v1288_v43, %v1276_v3  ;;  %v1251_v40 = vadd.f32 %v1247_v13, %v1230_v61  ;;  %v1322_v43 = vsel %vm366_vm7, %v1320_v34, %v1321_v10  ;;  %v1820_v12 = vmul.f32 %v3554_v25, %v3307_v18 }
 0x207   : > { %v1358_v61 = vsel %vm402_vm9, %v1355_v48, %v1357_v19  ;;  %v1848_v30 = vrot.slane %v1842_v21, 3 }
 0x208   : > { %v1260_v50 = vadd.f32 %v1258_v45, %v1251_v40  ;;  %v1310_v55 = vadd.f32 %v1305_v49, %v1293_v38  ;;  %v1829_v45 = vrot.slane %v1822_v31, 2  ;;  %v1868_v38 = vrot.slane %v1862_v22, 4 }
 0x209   : > { %1789 = vrot.lane.b32.xlu1 %v1785_v1, %s2716_s25  ;;  %1810 = vrot.lane.b32.xlu0 %v1807_v37, %s2716_s25  ;;  %v1307_v1 = vsel %vm348_vm6, %v1304_v11, %v1306_v17  ;;  %v1324_v17 = vsel %vm366_vm7, %v1321_v10, %v1323_v47  ;;  %v1847_v37 = vrot.slane %v1841_v20, 3  ;;  %v1869_v40 = vrot.slane %v1863_v23, 4  ;;  %v3649_v20 = vld [vmem:[#allocation4 + $0x20] sm:$0xff] }
 0x20a   : > { %v1277_v56 = vadd.f32 %v1273_v9, %v1260_v50  ;;  %1775 = vrot.lane.b32.xlu2 %v1772_v42, %s2715_s16  ;;  %v1327_v29 = vadd.f32 %v1322_v43, %v1310_v55  ;;  %v1340_v9 = vrot.slane %v1333_v51, 5  ;;  %s3602_s16 = sld [smem:[#allocation5 + $0x58]]  ;;  %v1830_v11 = vsel %vm330_vm5, %v1827_v41, %v1829_v45 }
 0x20b   : > { %v1370_v27 = vpop.permute.xlu1 %1369  ;;  %v1391_v62 = vpop.permute.xlu0 %1390  ;;  %v1826_v31 = vrot.slane %v1820_v12, 2  ;;  %v1849_v53 = vsel %vm348_vm6, %v1847_v37, %v1848_v30  ;;  %v1870_v50 = vsel %vm366_vm7, %v1868_v38, %v1869_v40  ;;  %v1843_v55 = vmul.f32 %v1840_v15, %v3320_v35 }
 0x20c   : > { %v1294_v2 = vadd.f32 %v1290_v60, %v1277_v56  ;;  %v1344_v5 = vadd.f32 %v1339_v54, %v1327_v29  ;;  %v1435_v4 = vpop.permute.xlu2 %1434  ;;  %v1341_v58 = vsel %vm384_vm8, %v1338_v28, %v1340_v9  ;;  %v1864_v28 = vmul.f32 %v1861_v36, %v3320_v35 }
 0x20d   : > { %v1850_v54 = vrot.slane %v1843_v55, 3 }
 0x20e   : > { %v1311_v0 = vadd.f32 %v1307_v1, %v1294_v2  ;;  %v1361_v8 = vadd.f32 %v1356_v7, %v1344_v5  ;;  %v1871_v26 = vrot.slane %v1864_v28, 4 }
 0x20f   : > { %v1851_v5 = vsel %vm348_vm6, %v1848_v30, %v1850_v54  ;;  %v1980_v30 = vstv %s2454_s20 }
 0x210   : > { %v1375_v33 = vadd.f32 %v1370_v27, %v1361_v8  ;;  %v1328_v13 = vadd.f32 %v1324_v17, %v1311_v0  ;;  %v1882_v49 = vstv %s3602_s16  ;;  %v1903_v27 = vstv %s2450_s3  ;;  %v3645_v17 = vld [vmem:[#allocation4 + $0x18] sm:$0xff]  ;;  %s2473_s16 = sshll.u32 %s2697_s12, 4 }
 0x211   : > { %1812 = vrot.lane.b32.xlu1 %v1809_v63, %s2716_s25  ;;  %1833 = vrot.lane.b32.xlu0 %v1830_v11, %s2716_s25  ;;  %v1884_v42 = vmul.f32 %v1882_v49, %v3309_v6  ;;  %v1885_v43 = vmul.f32 %v1882_v49, %v3320_v35  ;;  %v1904_v57 = vmul.f32 %v1903_v27, %v3307_v18  ;;  %v1924_v8 = vstv %s3633_s6 }
 0x212   : > { %v1396_v24 = vadd.f32 %v1391_v62, %v1375_v33  ;;  %1791 = vrot.lane.b32.xlu2 %v1786_v14, %s2716_s25  ;;  %v1345_v3 = vadd.f32 %v1341_v58, %v1328_v13  ;;  %v1905_v1 = vmul.f32 %v1903_v27, %v3309_v6  ;;  %v1938_v63 = vstv %s2452_s4  ;;  %s2255_s4 = scalar_lea.hbm %s3796_s2, %s2473_s16 }
 0x213   : > { %v1393_v34 = vpop.permute.xlu1 %1392  ;;  %v1414_v10 = vpop.permute.xlu0 %1413  ;;  %v1890_v29 = vrot.slane %v1884_v42, 5  ;;  %v1892_v45 = vrot.slane %v1885_v43, 5  ;;  %v1910_v36 = vrot.slane %v1904_v57, 6  ;;  %v1925_v19 = vmul.f32 %v3645_v17, %v1924_v8  ;;  %s2258_s20 = sshll.u32 %s2255_s4, 4  ;;  %s2259_s20 = int_to_ptr.hbm [resolvable:$true] %s2258_s20 }
 0x214   : > { %v1362_v59 = vadd.f32 %v1358_v61, %v1345_v3  ;;  %v1475_v39 = vpop.permute.xlu2 %1474  ;;  %v1417_v16 = vadd.f32 %v3556_v32, %v1396_v24  ;;  %v1828_v32 = vsel %vm330_vm5, %v1826_v31, %v1827_v41  ;;  %v1872_v41 = vsel %vm366_vm7, %v1869_v40, %v1871_v26 }
 0x215   : > { %v1893_v47 = vsel %vm384_vm8, %v1890_v29, %v1892_v45  ;;  %v1911_v0 = vrot.slane %v1905_v1, 6  ;;  %v1940_v21 = vmul.f32 %v3649_v20, %v1938_v63  ;;  %v1941_v33 = vmul.f32 %v1938_v63, %v3320_v35 }
 0x216   : > { %v1376_v25 = vadd.f32 %v3511_v52, %v1362_v59  ;;  %v1906_v23 = vmul.f32 %v1903_v27, %v3320_v35  ;;  %v1982_v31 = vmul.f32 %v3649_v20, %v1980_v30 }
 0x217   : > { %v1946_v61 = vrot.slane %v1940_v21, 1 }
 0x218   : > { %v1397_v44 = vadd.f32 %v1393_v34, %v1376_v25  ;;  %v1948_v34 = vrot.slane %v1941_v33, 1  ;;  %v1913_v37 = vrot.slane %v1906_v23, 6 }
 0x219   : > { %1852 = vrot.lane.b32.xlu1 %v1849_v53, %s2716_s25  ;;  %1873 = vrot.lane.b32.xlu0 %v1870_v50, %s2716_s25  ;;  %v1939_v53 = vmul.f32 %v3645_v17, %v1938_v63 }
 0x21a   : > { %v1418_v52 = vadd.f32 %v1414_v10, %v1397_v44  ;;  %1831 = vrot.lane.b32.xlu2 %v1828_v32, %s2716_s25  ;;  %v1959_v10 = vstv %s2453_s18  ;;  %v1949_v35 = vsel %vm312_vm4, %v1946_v61, %v1948_v34  ;;  %v1914_v25 = vsel %vm402_vm9, %v1911_v0, %v1913_v37 }
 0x21b   : > { %v1433_v46 = vpop.permute.xlu1 %1432  ;;  %v1454_v48 = vpop.permute.xlu0 %1453  ;;  %v1960_v38 = vmul.f32 %v3645_v17, %v1959_v10  ;;  %v1961_v40 = vmul.f32 %v3649_v20, %v1959_v10 }
 0x21c   : > { %v1438_v51 = vadd.f32 %v1433_v46, %v1417_v16  ;;  %v1498_v56 = vpop.permute.xlu2 %1497  ;;  %v1439_v60 = vadd.f32 %v1435_v4, %v1418_v52  ;;  %v1883_v4 = vmul.f32 %v1882_v49, %v3307_v18  ;;  %v1912_v18 = vsel %vm402_vm9, %v1910_v36, %v1911_v0 }
 0x21d   : > { %v1981_v16 = vmul.f32 %v3645_v17, %v1980_v30  ;;  %v1966_v50 = vrot.slane %v1960_v38, 2  ;;  %v1967_v42 = vrot.slane %v1961_v40, 2  ;;  %v1988_v52 = vrot.slane %v1982_v31, 3 }
 0x21e   : > { %v1459_v62 = vadd.f32 %v1454_v48, %v1438_v51  ;;  %v1889_v6 = vrot.slane %v1883_v4, 5  ;;  %v1945_v46 = vrot.slane %v1939_v53, 1  ;;  %v2001_v48 = vstv %s2455_s27  ;;  %s2244_s27 = scalar_lea.sflag [#allocation7], %s2841_s17 }
 0x21f   : > { %v1987_v55 = vrot.slane %v1981_v16, 3  ;;  %v1968_v51 = vsel %vm330_vm5, %v1966_v50, %v1967_v42  ;;  %v2002_v33 = vmul.f32 %v3645_v17, %v2001_v48  ;;  %v2099_v50 = vstv %s2460_s15  ;;  %s2639_s15 = scalar_lea.hbm %s3796_s2, 32 }
 0x220   : > { %v1480_v2 = vadd.f32 %v1475_v39, %v1459_v62  ;;  %v1891_v22 = vsel %vm384_vm8, %v1889_v6, %v1890_v29  ;;  %v1926_v39 = vmul.f32 %v3649_v20, %v1924_v8  ;;  %v1947_v62 = vsel %vm312_vm4, %v1945_v46, %v1946_v61 }
 0x221   : > { %1875 = vrot.lane.b32.xlu1 %v1872_v41, %s2716_s25  ;;  %1896 = vrot.lane.b32.xlu0 %v1893_v47, %s2716_s25  ;;  %v1989_v45 = vsel %vm348_vm6, %v1987_v55, %v1988_v52  ;;  %v2008_v34 = vrot.slane %v2002_v33, 4  ;;  %v2100_v46 = vmul.f32 %v3645_v17, %v2099_v50 }
 0x222   : > { %1854 = vrot.lane.b32.xlu2 %v1851_v5, %s2716_s25 }
 0x223   : > { %v1456_v15 = vpop.permute.xlu1 %1455  ;;  %v1477_v7 = vpop.permute.xlu0 %1476 }
 0x224   : > { %v1460_v14 = vadd.f32 %v1456_v15, %v1439_v60  ;;  %v1531_v9 = vpop.permute.xlu2 %1530  ;;  %v2003_v60 = vmul.f32 %v3649_v20, %v2001_v48 }
 0x226   : > { %v1481_v11 = vadd.f32 %v1477_v7, %v1460_v14  ;;  %v2009_v4 = vrot.slane %v2003_v60, 4  ;;  %v2022_v7 = vstv %s2456_s5  ;;  %s2633_s5 = sshra.s32 %s2259_s20, 4  ;;  %s2634_s5 = int_to_ptr.hbm [resolvable:$true] %s2633_s5 }
 0x227   : > { %v2023_v8 = vmul.f32 %v3645_v17, %v2022_v7  ;;  %v2024_v6 = vmul.f32 %v3649_v20, %v2022_v7  ;;  %p2640_p11 = scmp.lt.s32.totalorder %s2634_s5, %s3796_s2 }
 0x228   : > { %v1502_v13 = vadd.f32 %v1498_v56, %v1481_v11  ;;  %v3670_v56 = vld [vmem:[#allocation4 + $0x28] sm:$0x3f]  ;;  %v2010_v38 = vsel %vm366_vm7, %v2008_v34, %v2009_v4 }
 0x229   : > { %1915 = vrot.lane.b32.xlu1 %v1912_v18, %s2716_s25  ;;  %1929 = vrot.lane.b32.xlu0 %v1925_v19, %s2717_s26  ;;  %v1983_v29 = vmul.f32 %v3670_v56, %v1980_v30  ;;  %v2004_v54 = vmul.f32 %v3670_v56, %v2001_v48  ;;  %v1962_v41 = vmul.f32 %v3670_v56, %v1959_v10  ;;  %v2029_v23 = vrot.slane %v2023_v8, 5 }
 0x22a   : > { %1894 = vrot.lane.b32.xlu2 %v1891_v22, %s2716_s25  ;;  %v2025_v40 = vmul.f32 %v3670_v56, %v2022_v7  ;;  %v2101_v48 = vmul.f32 %v3649_v20, %v2099_v50 }
 0x22b   : > { %v1496_v58 = vpop.permute.xlu1 %1495  ;;  %v1510_v12 = vpop.permute.xlu0 %1509  ;;  %v1990_v1 = vrot.slane %v1983_v29, 3  ;;  %v2011_v15 = vrot.slane %v2004_v54, 4  ;;  %v1969_v14 = vrot.slane %v1962_v41, 2  ;;  %v2120_v54 = vstv %s2461_s23 }
 0x22c   : > { %v1501_v24 = vadd.f32 %v1496_v58, %v1480_v2  ;;  %v1554_v3 = vpop.permute.xlu2 %1553 }
 0x22d   : > { %v1991_v0 = vsel %vm348_vm6, %v1988_v52, %v1990_v1  ;;  %v2012_v63 = vsel %vm366_vm7, %v2009_v4, %v2011_v15  ;;  %v1970_v21 = vsel %vm330_vm5, %v1967_v42, %v1969_v14  ;;  %v2122_v4 = vmul.f32 %v3649_v20, %v2120_v54 }
 0x22e   : > { %v1515_v59 = vadd.f32 %v1510_v12, %v1501_v24  ;;  %v2030_v24 = vrot.slane %v2024_v6, 5  ;;  %v2123_v14 = vmul.f32 %v3670_v56, %v2120_v54 }
 0x230   : > { %v1536_v49 = vadd.f32 %v1531_v9, %v1515_v59  ;;  %v2043_v9 = vstv %s2457_s7  ;;  %v2031_v30 = vsel %vm384_vm8, %v2029_v23, %v2030_v24  ;;  %s2635_s7 = scalar_lea.hbm %s2634_s5, 16 }
 0x231   : > { %1931 = vrot.lane.b32.xlu1 %v1926_v39, %s2717_s26  ;;  %1952 = vrot.lane.b32.xlu0 %v1949_v35, %s2717_s26  ;;  %v2044_v11 = vmul.f32 %v3645_v17, %v2043_v9  ;;  %v2045_v19 = vmul.f32 %v3649_v20, %v2043_v9  ;;  %v2046_v37 = vmul.f32 %v3670_v56, %v2043_v9  ;;  %p2636_p3 = scmp.ne.s32.totalorder %s2634_s5, %s2635_s7  ;;  %p2641_p12 = scmp.lt.s32.totalorder %s2639_s15, %s2635_s7 }
 0x232   : > { %1917 = vrot.lane.b32.xlu2 %v1914_v25, %s2716_s25  ;;  %s3692_s25 = sld [smem:[#allocation5 + $0x37]] }
 0x233   : > { %v1512_v28 = vpop.permute.xlu1 %1511  ;;  %v1533_v44 = vpop.permute.xlu0 %1532  ;;  %v2051_v61 = vrot.slane %v2045_v19, 6  ;;  %v2053_v31 = vrot.slane %v2046_v37, 6  ;;  %v2128_v19 = vrot.slane %v2122_v4, 3  ;;  %v2121_v37 = vmul.f32 %v3645_v17, %v2120_v54  ;;  %p2637_p5 = pnand %p2636_p3, %p2788_p8  ;;  %p2642_p0 = por %p2641_p12, %p2640_p11 }
 0x234   : > { %v1516_v43 = vadd.f32 %v1512_v28, %v1502_v13  ;;  %v1594_v32 = vpop.permute.xlu2 %1593  ;;  %v2078_v28 = vstv %s2459_s8 }
 0x235   : > { %v2079_v55 = vmul.f32 %v3645_v17, %v2078_v28  ;;  %v2080_v52 = vmul.f32 %v3649_v20, %v2078_v28  ;;  %p2638_p7 = pneg %p2637_p5 }
 0x236   : > { %v1537_v26 = vadd.f32 %v1533_v44, %v1516_v43  ;;  %v2032_v44 = vrot.slane %v2025_v40, 5  ;;  %v2054_v43 = vsel %vm402_vm9, %v2051_v61, %v2053_v31 }
 0x237   : > { %v2085_v60 = vrot.slane %v2079_v55, 1  ;;  %v2086_v41 = vrot.slane %v2080_v52, 1  ;;  %p2643_p1 = pnand %p2642_p0, %p2638_p7 }
 0x238   : > { %v1558_v27 = vadd.f32 %v1554_v3, %v1537_v26  ;;  %v2050_v3 = vrot.slane %v2044_v11, 6  ;;  %v2064_v53 = vstv %s3692_s25 }
 0x239   : > { %1971 = vrot.lane.b32.xlu1 %v1968_v51, %s2717_s26  ;;  %1992 = vrot.lane.b32.xlu0 %v1989_v45, %s2717_s26  ;;  %v2033_v51 = vsel %vm384_vm8, %v2030_v24, %v2032_v44  ;;  %v2087_v15 = vsel %vm312_vm4, %v2085_v60, %v2086_v41 }
 0x23a   : > { %1950 = vrot.lane.b32.xlu2 %v1947_v62, %s2717_s26  ;;  %v2052_v59 = vsel %vm402_vm9, %v2050_v3, %v2051_v61 }
 0x23b   : > { %v1552_v47 = vpop.permute.xlu1 %1551  ;;  %v1573_v57 = vpop.permute.xlu0 %1572 }
 0x23c   : > { %v1557_v2 = vadd.f32 %v1552_v47, %v1536_v49  ;;  %v1617_v5 = vpop.permute.xlu2 %1616  ;;  %v2106_v47 = vrot.slane %v2100_v46, 2 }
 0x23e   : > { %v1578_v36 = vadd.f32 %v1573_v57, %v1557_v2  ;;  %v2107_v57 = vrot.slane %v2101_v48, 2  ;;  %v2065_v2 = vmul.f32 %v3645_v17, %v2064_v53 }
 0x240   : > { %v1599_v18 = vadd.f32 %v1594_v32, %v1578_v36  ;;  %v2066_v32 = vmul.f32 %v3649_v20, %v2064_v53  ;;  %v2108_v7 = vsel %vm330_vm5, %v2106_v47, %v2107_v57  ;;  %v2081_v36 = vmul.f32 %v3670_v56, %v2078_v28 }
 0x241   : > { %1994 = vrot.lane.b32.xlu1 %v1991_v0, %s2717_s26  ;;  %2015 = vrot.lane.b32.xlu0 %v2012_v63, %s2717_s26 }
 0x242   : > { %1973 = vrot.lane.b32.xlu2 %v1970_v21, %s2717_s26  ;;  %v2141_v21 = vstv %s2462_s24  ;;  %v2088_v33 = vrot.slane %v2081_v36, 1 }
 0x243   : > { %v1575_v13 = vpop.permute.xlu1 %1574  ;;  %v1596_v22 = vpop.permute.xlu0 %1595  ;;  %v2144_v52 = vmul.f32 %v3670_v56, %v2141_v21 }
 0x244   : > { %v1579_v58 = vadd.f32 %v1575_v13, %v1558_v27  ;;  %v1650_v12 = vpop.permute.xlu2 %1649  ;;  %v2162_v13 = vstv %s2463_s30 }
 0x245   : > { %v2163_v3 = vmul.f32 %v3645_v17, %v2162_v13  ;;  %v2164_v61 = vmul.f32 %v3649_v20, %v2162_v13  ;;  %v2165_v44 = vmul.f32 %v3670_v56, %v2162_v13  ;;  %v2151_v60 = vrot.slane %v2144_v52, 4 }
 0x246   : > { %v1600_v10 = vadd.f32 %v1596_v22, %v1579_v58  ;;  %v2142_v58 = vmul.f32 %v3645_v17, %v2141_v21 }
 0x247   : > { %v2170_v31 = vrot.slane %v2164_v61, 5 }
 0x248   : > { %v1621_v39 = vadd.f32 %v1617_v5, %v1600_v10  ;;  %v2102_v5 = vmul.f32 %v3670_v56, %v2099_v50  ;;  %v2089_v10 = vsel %vm312_vm4, %v2086_v41, %v2088_v33 }
 0x249   : > { %2034 = vrot.lane.b32.xlu1 %v2031_v30, %s2717_s26  ;;  %2055 = vrot.lane.b32.xlu0 %v2052_v59, %s2717_s26 }
 0x24a   : > { %2013 = vrot.lane.b32.xlu2 %v2010_v38, %s2717_s26  ;;  %v2109_v6 = vrot.slane %v2102_v5, 2 }
 0x24b   : > { %v1615_v35 = vpop.permute.xlu1 %1614  ;;  %v1636_v16 = vpop.permute.xlu0 %1635 }
 0x24c   : > { %v1620_v49 = vadd.f32 %v1615_v35, %v1599_v18  ;;  %v1673_v25 = vpop.permute.xlu2 %1672  ;;  %v2130_v18 = vrot.slane %v2123_v14, 3  ;;  %v2110_v23 = vsel %vm330_vm5, %v2107_v57, %v2109_v6 }
 0x24e   : > { %v1641_v42 = vadd.f32 %v1636_v16, %v1620_v49  ;;  %v2131_v24 = vsel %vm348_vm6, %v2128_v19, %v2130_v18  ;;  %v2169_v16 = vrot.slane %v2163_v3, 5  ;;  %v2127_v49 = vrot.slane %v2121_v37, 3 }
 0x250   : > { %v1655_v26 = vadd.f32 %v1650_v12, %v1641_v42  ;;  %v2143_v12 = vmul.f32 %v3649_v20, %v2141_v21  ;;  %v2171_v50 = vsel %vm384_vm8, %v2169_v16, %v2170_v31  ;;  %v2129_v55 = vsel %vm348_vm6, %v2127_v49, %v2128_v19 }
 0x251   : > { %2057 = vrot.lane.b32.xlu1 %v2054_v43, %s2717_s26  ;;  %2071 = vrot.lane.b32.xlu0 %v2066_v32, %s2718_s29 }
 0x252   : > { %2036 = vrot.lane.b32.xlu2 %v2033_v51, %s2717_s26  ;;  %s2464_s26 = sld [smem:[#allocation5 + $0x61]]  ;;  %v2149_v38 = vrot.slane %v2143_v12, 4 }
 0x253   : > { %v1638_v29 = vpop.permute.xlu1 %1637  ;;  %v1652_v45 = vpop.permute.xlu0 %1651 }
 0x254   : > { %v1642_v27 = vadd.f32 %v1638_v29, %v1621_v39  ;;  %v1713_v62 = vpop.permute.xlu2 %1712  ;;  %v2148_v39 = vrot.slane %v2142_v58, 4  ;;  %v2172_v29 = vrot.slane %v2165_v44, 5 }
 0x256   : > { %v1656_v1 = vadd.f32 %v1652_v45, %v1642_v27  ;;  %v2150_v28 = vsel %vm366_vm7, %v2148_v39, %v2149_v38  ;;  %v2173_v27 = vsel %vm384_vm8, %v2170_v31, %v2172_v29 }
 0x258   : > { %v1677_v9 = vadd.f32 %v1673_v25, %v1656_v1  ;;  %v2183_v25 = vstv %s2464_s26 }
 0x259   : > { %2090 = vrot.lane.b32.xlu1 %v2087_v15, %s2718_s29  ;;  %2111 = vrot.lane.b32.xlu0 %v2108_v7, %s2718_s29  ;;  %v2185_v42 = vmul.f32 %v3649_v20, %v2183_v25  ;;  %v2186_v43 = vmul.f32 %v3670_v56, %v2183_v25  ;;  %v2152_v56 = vsel %vm366_vm7, %v2149_v38, %v2151_v60 }
 0x25a   : > { %2069 = vrot.lane.b32.xlu2 %v2065_v2, %s2718_s29  ;;  %v2184_v47 = vmul.f32 %v3645_v17, %v2183_v25 }
 0x25b   : > { %v1671_v0 = vpop.permute.xlu1 %1670  ;;  %v1692_v8 = vpop.permute.xlu0 %1691  ;;  %v2191_v45 = vrot.slane %v2185_v42, 6  ;;  %v2193_v20 = vrot.slane %v2186_v43, 6 }
 0x25c   : > { %v1676_v63 = vadd.f32 %v1671_v0, %v1655_v26  ;;  %v1736_v11 = vpop.permute.xlu2 %1735  ;;  %v2190_v4 = vrot.slane %v2184_v47, 6 }
 0x25e   : > { %v1697_v22 = vadd.f32 %v1692_v8, %v1676_v63  ;;  %v2192_v14 = vsel %vm402_vm9, %v2190_v4, %v2191_v45 }
 0x260   : > { %v1718_v34 = vadd.f32 %v1713_v62, %v1697_v22  ;;  %v2194_v62 = vsel %vm402_vm9, %v2191_v45, %v2193_v20 }
 0x261   : > { %2113 = vrot.lane.b32.xlu1 %v2110_v23, %s2718_s29  ;;  %2134 = vrot.lane.b32.xlu0 %v2131_v24, %s2718_s29 }
 0x262   : > { %2092 = vrot.lane.b32.xlu2 %v2089_v10, %s2718_s29 }
 0x263   : > { %v1694_v30 = vpop.permute.xlu1 %1693  ;;  %v1715_v59 = vpop.permute.xlu0 %1714 }
 0x264   : > { %v1698_v40 = vadd.f32 %v1694_v30, %v1677_v9  ;;  %v1776_v35 = vpop.permute.xlu2 %1775 }
 0x266   : > { %v1719_v53 = vadd.f32 %v1715_v59, %v1698_v40 }
 0x268   : > { %v1740_v32 = vadd.f32 %v1736_v11, %v1719_v53 }
 0x269   : > { %2153 = vrot.lane.b32.xlu1 %v2150_v28, %s2718_s29  ;;  %2174 = vrot.lane.b32.xlu0 %v2171_v50, %s2718_s29 }
 0x26a   : > { %2132 = vrot.lane.b32.xlu2 %v2129_v55, %s2718_s29 }
 0x26b   : > { %v1734_v46 = vpop.permute.xlu1 %1733  ;;  %v1755_v48 = vpop.permute.xlu0 %1754 }
 0x26c   : > { %v1739_v26 = vadd.f32 %v1734_v46, %v1718_v34  ;;  %v1792_v51 = vpop.permute.xlu2 %1791 }
 0x26e   : > { %v1760_v54 = vadd.f32 %v1755_v48, %v1739_v26 }
 0x270   : > { %v1781_v41 = vadd.f32 %v1776_v35, %v1760_v54 }
 0x271   : > { %2176 = vrot.lane.b32.xlu1 %v2173_v27, %s2718_s29  ;;  %2197 = vrot.lane.b32.xlu0 %v2194_v62, %s2718_s29 }
 0x272   : > { %2155 = vrot.lane.b32.xlu2 %v2152_v56, %s2718_s29 }
 0x273   : > { %v1757_v57 = vpop.permute.xlu1 %1756  ;;  %v1778_v1 = vpop.permute.xlu0 %1777 }
 0x274   : > { %v1761_v2 = vadd.f32 %v1757_v57, %v1740_v32  ;;  %v1832_v5 = vpop.permute.xlu2 %1831 }
 0x276   : > { %v1782_v15 = vadd.f32 %v1778_v1, %v1761_v2 }
 0x278   : > { %v1796_v7 = vadd.f32 %v1792_v51, %v1782_v15 }
 0x27a   : > { %2195 = vrot.lane.b32.xlu2 %v2192_v14, %s2718_s29  ;;  %s2366_s29 = sshll.u32 %s2841_s17, 4 }
 0x27b   : > { %v1790_v9 = vpop.permute.xlu1 %1789  ;;  %v1811_v36 = vpop.permute.xlu0 %1810  ;;  %s194_s12 = scalar_lea.vmem [#allocation10], %s2366_s29 }
 0x27c   : > { %v1855_v0 = vpop.permute.xlu2 %1854  ;;  %v1795_v58 = vadd.f32 %v1790_v9, %v1781_v41  ;;  %s2256_s18 = sshll.u32 %s194_s12, 4  ;;  %s2257_s18 = int_to_ptr.vmem [resolvable:$true] %s2256_s18 }
 0x27e   : > { %v1816_v3 = vadd.f32 %v1811_v36, %v1795_v58 }
 0x280   : > { %v1837_v10 = vadd.f32 %v1832_v5, %v1816_v3 }
 0x283   : > { %v1813_v8 = vpop.permute.xlu1 %1812  ;;  %v1834_v6 = vpop.permute.xlu0 %1833 }
 0x284   : > { %v1895_v63 = vpop.permute.xlu2 %1894  ;;  %v1817_v34 = vadd.f32 %v1813_v8, %v1796_v7 }
 0x286   : > { %v1838_v39 = vadd.f32 %v1834_v6, %v1817_v34 }
 0x288   : > { %v1859_v35 = vadd.f32 %v1855_v0, %v1838_v39 }
 0x28b   : > { %v1853_v17 = vpop.permute.xlu1 %1852  ;;  %v1874_v11 = vpop.permute.xlu0 %1873 }
 0x28c   : > { %v1918_v19 = vpop.permute.xlu2 %1917  ;;  %v1858_v37 = vadd.f32 %v1853_v17, %v1837_v10 }
 0x28e   : > { %v1879_v40 = vadd.f32 %v1874_v11, %v1858_v37 }
 0x290   : > { %v1900_v31 = vadd.f32 %v1895_v63, %v1879_v40 }
 0x293   : > { %v1876_v18 = vpop.permute.xlu1 %1875  ;;  %v1897_v21 = vpop.permute.xlu0 %1896 }
 0x294   : > { %v1951_v33 = vpop.permute.xlu2 %1950  ;;  %v1880_v16 = vadd.f32 %v1876_v18, %v1859_v35 }
 0x296   : > { %v1901_v28 = vadd.f32 %v1897_v21, %v1880_v16 }
 0x298   : > { %v1922_v42 = vadd.f32 %v1918_v19, %v1901_v28 }
 0x29b   : > { %v1916_v13 = vpop.permute.xlu1 %1915  ;;  %v1930_v22 = vpop.permute.xlu0 %1929 }
 0x29c   : > { %v1974_v23 = vpop.permute.xlu2 %1973  ;;  %v1921_v53 = vadd.f32 %v1916_v13, %v1900_v31 }
 0x29e   : > { %v1935_v50 = vadd.f32 %v1930_v22, %v1921_v53 }
 0x2a0   : > { %v1956_v52 = vadd.f32 %v1951_v33, %v1935_v50 }
 0x2a3   : > { %v1932_v12 = vpop.permute.xlu1 %1931  ;;  %v1953_v24 = vpop.permute.xlu0 %1952 }
 0x2a4   : > { %v2014_v61 = vpop.permute.xlu2 %2013  ;;  %v1936_v55 = vadd.f32 %v1932_v12, %v1922_v42 }
 0x2a6   : > { %v1957_v48 = vadd.f32 %v1953_v24, %v1936_v55 }
 0x2a8   : > { %v1978_v20 = vadd.f32 %v1974_v23, %v1957_v48 }
 0x2ab   : > { %v1972_v30 = vpop.permute.xlu1 %1971  ;;  %v1993_v59 = vpop.permute.xlu0 %1992 }
 0x2ac   : > { %v2037_v38 = vpop.permute.xlu2 %2036  ;;  %v1977_v46 = vadd.f32 %v1972_v30, %v1956_v52 }
 0x2ae   : > { %v1998_v51 = vadd.f32 %v1993_v59, %v1977_v46 }
 0x2b0   : > { %v2019_v54 = vadd.f32 %v2014_v61, %v1998_v51 }
 0x2b3   : > { %v1995_v49 = vpop.permute.xlu1 %1994  ;;  %v2016_v25 = vpop.permute.xlu0 %2015 }
 0x2b4   : > { %v2070_v44 = vpop.permute.xlu2 %2069  ;;  %v1999_v60 = vadd.f32 %v1995_v49, %v1978_v20 }
 0x2b6   : > { %v2020_v62 = vadd.f32 %v2016_v25, %v1999_v60 }
 0x2b8   : > { %v2041_v1 = vadd.f32 %v2037_v38, %v2020_v62 }
 0x2bb   : > { %v2035_v43 = vpop.permute.xlu1 %2034  ;;  %v2056_v32 = vpop.permute.xlu0 %2055 }
 0x2bc   : > { %v2093_v26 = vpop.permute.xlu2 %2092  ;;  %v2040_v27 = vadd.f32 %v2035_v43, %v2019_v54 }
 0x2be   : > { %v2061_v57 = vadd.f32 %v2056_v32, %v2040_v27 }
 0x2c0   : > { %v2075_v5 = vadd.f32 %v2070_v44, %v2061_v57 }
 0x2c3   : > { %v2058_v29 = vpop.permute.xlu1 %2057  ;;  %v2072_v45 = vpop.permute.xlu0 %2071 }
 0x2c4   : > { %v2133_v41 = vpop.permute.xlu2 %2132  ;;  %v2062_v2 = vadd.f32 %v2058_v29, %v2041_v1 }
 0x2c6   : > { %v2076_v14 = vadd.f32 %v2072_v45, %v2062_v2 }
 0x2c8   : > { %v2097_v0 = vadd.f32 %v2093_v26, %v2076_v14 }
 0x2cb   : > { %v2091_v56 = vpop.permute.xlu1 %2090  ;;  %v2112_v47 = vpop.permute.xlu0 %2111 }
 0x2cc   : > { %v2096_v4 = vadd.f32 %v2091_v56, %v2075_v5  ;;  %v2156_v9 = vpop.permute.xlu2 %2155 }
 0x2ce   : > { %v2117_v36 = vadd.f32 %v2112_v47, %v2096_v4 }
 0x2d0   : > { %v2138_v6 = vadd.f32 %v2133_v41, %v2117_v36 }
 0x2d3   : > { %v2114_v15 = vpop.permute.xlu1 %2113  ;;  %v2135_v7 = vpop.permute.xlu0 %2134 }
 0x2d4   : > { %v2118_v8 = vadd.f32 %v2114_v15, %v2097_v0  ;;  %v2196_v21 = vpop.permute.xlu2 %2195 }
 0x2d6   : > { %v2139_v19 = vadd.f32 %v2135_v7, %v2118_v8 }
 0x2d8   : > { %v2160_v22 = vadd.f32 %v2156_v9, %v2139_v19 }
 0x2db   : > { %v2154_v63 = vpop.permute.xlu1 %2153  ;;  %v2175_v17 = vpop.permute.xlu0 %2174 }
 0x2dc   : > { %v2159_v11 = vadd.f32 %v2154_v63, %v2138_v6 }
 0x2de   : > { %v2180_v18 = vadd.f32 %v2175_v17, %v2159_v11 }
 0x2e0   : > { %v2201_v33 = vadd.f32 %v2196_v21, %v2180_v18 }
 0x2e2   : > { %v2465_v13 = vmul.f32 -1.442695, %v2201_v33 }
 0x2e3   : > { %v2177_v23 = vpop.permute.xlu1 %2176  ;;  %v2198_v12 = vpop.permute.xlu0 %2197 }
 0x2e4   : > { %2560 = vpow2.f32 %v2465_v13  ;;  %v2181_v58 = vadd.f32 %v2177_v23, %v2160_v22 }
 0x2e6   : > { %v2202_v24 = vadd.f32 %v2198_v12, %v2181_v58 }
 0x2e8   : > { %v2466_v3 = vmul.f32 -1.442695, %v2202_v24 }
 0x2ea   : > { %v2561_v61 = vpop.eup %2560  ;;  %2562 = vpow2.f32 %v2466_v3 }
 0x2eb   : > { %v2209_v34 = vadd.f32 1.0, %v2561_v61 }
 0x2ed   : > { %2564 = vrcp.f32 %v2209_v34  ;;  %v2222_v38 = vand.u32 2147483648, %v2209_v34  ;;  %v2220_v35 = vand.u32 2147483647, %v2209_v34  ;;  %vm2216_vm11 = vweird.f32 %v2209_v34 }
 0x2ef   : > { %v2223_v25 = vor.u32 1.1754944e-38, %v2222_v38  ;;  %vm2221_vm13 = vcmp.eq.f32.partialorder %v2220_v35, 8.507059e+37 }
 0x2f0   : > { %v2563_v10 = vpop.eup %2562 }
 0x2f1   : > { %v2210_v37 = vadd.f32 1.0, %v2563_v10 }
 0x2f3   : > { %v2565_v30 = vpop.eup %2564  ;;  %2566 = vrcp.f32 %v2210_v37  ;;  %v2237_v44 = vand.u32 2147483648, %v2210_v37  ;;  %v2235_v43 = vand.u32 2147483647, %v2210_v37  ;;  %vm2231_vm15 = vweird.f32 %v2210_v37 }
 0x2f4   : > { %v2212_v59 = vmul.f32 %v2565_v30, %v2209_v34  ;;  %vm2217_vm10 = vweird.f32 %v2565_v30 }
 0x2f5   : > { %vm2218_vm12 = vmor %vm2216_vm11, %vm2217_vm10  ;;  %v2238_v55 = vor.u32 1.1754944e-38, %v2237_v44  ;;  %vm2236_vm2 = vcmp.eq.f32.partialorder %v2235_v43, 8.507059e+37 }
 0x2f6   : > { %v2213_v39 = vsub.f32 1.0, %v2212_v59 }
 0x2f8   : > { %v2214_v40 = vmul.f32 %v2565_v30, %v2213_v39 }
 0x2f9   : > { %v2567_v16 = vpop.eup %2566 }
 0x2fa   : > { %v2227_v31 = vmul.f32 %v2567_v16, %v2210_v37  ;;  %v2215_v49 = vadd.f32 %v2565_v30, %v2214_v40  ;;  %vm2232_vm14 = vweird.f32 %v2567_v16 }
 0x2fb   : > { %vm2233_vm1 = vmor %vm2231_vm15, %vm2232_vm14 }
 0x2fc   : > { %v2228_v53 = vsub.f32 1.0, %v2227_v31  ;;  %v2219_v28 = vsel %vm2218_vm12, %v2565_v30, %v2215_v49 }
 0x2fd   : > { %v2224_v50 = vsel %vm2221_vm13, %v2223_v25, %v2219_v28 }
 0x2fe   : > { %v2229_v42 = vmul.f32 %v2567_v16, %v2228_v53  ;;  %2241 = vst.msk [vmem:[%s194_s12] sm:$0xff] %vm200_vm0, %v2224_v50 }
 0x300   : > { %v2230_v32 = vadd.f32 %v2567_v16, %v2229_v42 }
 0x302   : > { %v2234_v52 = vsel %vm2233_vm1, %v2567_v16, %v2230_v32 }
 0x303   : > { %v2239_v46 = vsel %vm2236_vm2, %v2238_v55, %v2234_v52 }
 0x304   : > { %2242 = vst.msk [vmem:[%s194_s12 + $0x8] sm:$0xff] %vm200_vm0, %v2239_v46 }
 0x305   : > { %2646 = shalt.err (!%p2643_p1)
}
 0x306   : > { %s2719_s17 = smov 128   ;;  %s2720_s30 = smov 8  }
 0x307   : > { %2480 = dma.vmem_to_hbm [thread:$0]  (%p2788_p8), %s2257_s18, 256, %s2259_s20, %s2244_s27, %s2719_s17, %s2719_s17, %s2720_s30  }
 0x308 PF: > { %s2273_s26 = sand.u32 1, %s2685_s9   ;;  %p2491_p2 = pnand %p2359_p13, %p2792_p9 }
 0x309   : > { %s2274_s29 = scalar_lea.sflag [#allocation7], %s2273_s26 }
 0x30a   : > { %p2492_p4 = pneg %p2491_p2 }
 0x30c   : > { %2680 = dma.done.wait (%p2492_p4), %s2274_s29, 256  }
 0x30d   : > { %2682 = vsyncadd (%p2492_p4), %s2274_s29, 4294967040  ;;  %s19_s14 = sadd.s32 1, %s2705_s14   ;;  %s3804_s9 = smov %s2689_s10 }
 0x30e   : > { %p16_p6 = scmp.ge.s32.totalorder %s19_s14, 4   ;;  %s3805_s10 = smov %s2693_s11 }
 0x30f   : > { %s3806_s11 = smov %s2830_s19  ;;  %s3807_s12 = smov %s2701_s13 }
 0x310   : > { %s3808_s13 = smov %s3810_s28  ;;  %18 = sbr.rel (!%p16_p6) target bundleno = 7 (0x7), region = 87 }
 0x315   :  { %2280 = vsyncpa [#allocation6], 1 }
 0x316   :  { %2282 = vsyncpa [#allocation6 + $0x1], 1 }
 0x317   :  { %2283 = vsyncpa [#allocation7], 1 }
 0x318   :  { %2285 = vsyncpa [#allocation7 + $0x1], 1 }
 0x319   :  { %2286 = vsyncpa [#allocation8], 1 }
 0x31a   :  { %2288 = vsyncpa [#allocation8 + $0x1], 1 }

</bundles_post_ra>
